<compile_context>
chip_gen: v5e
topology: v5e:2x2
jax: 0.10.0
libtpu: 0.0.40
codegen_flags: <defaults>
</compile_context>

<pallas_src>
import functools

import jax
import jax.numpy as jnp
import numpy as np
from jax.experimental import pallas as pl
from jax.experimental.pallas import tpu as pltpu

LEAKY_SLOPE = 0.01  # nn.LeakyReLU() default (the module uses the default)


def _leaky(v):
    return jnp.where(v >= 0, v, LEAKY_SLOPE * v)


# ------------------------- fused residual-block kernel -----------------------
# x_ref : (N, C, HW)   input images, channels-major, HW lanes (lane-dense)
# w1_ref: (Cred, C)    bf16, BN1 scale folded in
# b1_ref: (Cred, 1)    f32 folded BN1 bias
# w2_ref: (C, 9*Cred)  bf16, BN2 scale folded in, taps grouped (dh*3+dw) major
# b2_ref: (C, 1)       f32 folded BN2 bias
# o_ref : (N, C, HW)   output (residual added), lane-dense store
# p_ref : (9*Cred, N*HW) bf16 VMEM scratch: im2col patch matrix (3x3 conv)
def _fused_kernel(x_ref, w1_ref, b1_ref, w2_ref, b2_ref, o_ref, p_ref,
                  *, N, H, W, cred):
    HW = H * W
    HWT = N * HW

    # ---- layer1: 1x1 conv (+ folded BN) + LeakyReLU --------------------------
    # One matmul per image (the 1x1 conv is per-image anyway); results are
    # concatenated along lanes so everything downstream runs at N*HW width.
    w1 = w1_ref[...]
    y1 = jnp.concatenate(
        [jnp.dot(w1, x_ref[n].astype(jnp.bfloat16),
                 preferred_element_type=jnp.float32) for n in range(N)],
        axis=1)                                            # (Cred, N*HW) f32
    y1 = _leaky(y1 + b1_ref[...])

    # ---- precompute boundary masks once (shared by all taps) -----------------
    lane = jax.lax.broadcasted_iota(jnp.int32, (1, HWT), 1)
    if (W & (W - 1)) == 0:                                  # W power of two
        col = lane & (W - 1)
        row = lane >> (W.bit_length() - 1)
    else:
        col = lane % W
        row = lane // W
    row = (row & (H - 1)) if (H & (H - 1)) == 0 else (row % H)  # row in image
    not_left = col != 0
    not_right = col != (W - 1)
    not_top = row != 0
    not_bot = row != (H - 1)

    # ---- im2col: 9 taps, each a full-width lane roll + mask + aligned store --
    # P[t*Cred + ci, q] = y1[ci, q + delta] for in-image source pixels, else 0
    # (t = dh*3 + dw, delta = (dh-1)*W + (dw-1)).  The row masks also zero the
    # lanes where the roll wrapped across an image boundary, so no explicit
    # zero-init of p_ref is needed.
    for dh in range(3):
        for dw in range(3):
            oh, ow = dh - 1, dw - 1
            t = dh * 3 + dw
            delta = oh * W + ow
            if delta == 0:
                seg = y1
            else:
                seg = pltpu.roll(y1, shift=(-delta) % HWT, axis=1)
            mask = None
            if oh == -1:
                mask = not_top
            elif oh == 1:
                mask = not_bot
            if ow == -1:
                mask = not_left if mask is None else (mask & not_left)
            elif ow == 1:
                mask = not_right if mask is None else (mask & not_right)
            if mask is not None:
                seg = jnp.where(mask, seg, 0.0)
            # full 512-lane, sublane-aligned (t*cred multiple of 16) store
            p_ref[t * cred:(t + 1) * cred, :] = seg.astype(p_ref.dtype)

    # ---- layer2: 3x3 conv as ONE (C, 9*Cred) x (9*Cred, N*HW) matmul ---------
    y2 = jnp.dot(w2_ref[...], p_ref[...],
                 preferred_element_type=jnp.float32)        # (C, N*HW)
    y2 = _leaky(y2 + b2_ref[...])

    # ---- residual add; per-image aligned (C, HW) stores ----------------------
    for n in range(N):
        o_ref[n] = y2[:, n * HW:(n + 1) * HW] + x_ref[n]


# ----------------------------------- wrapper ---------------------------------
def dark_residual_block(x_nchw, params):
    w1, b1, w2, b2 = params
    N, C, H, W = x_nchw.shape
    Cred = C // 2
    HW = H * W

    x2 = x_nchw.reshape(N, C, HW)          # free (contiguous) reshape
    kernel = functools.partial(_fused_kernel, N=N, H=H, W=W, cred=Cred)

    out = pl.pallas_call(
        kernel,
        out_shape=jax.ShapeDtypeStruct((N, C, HW), jnp.float32),
        grid=(1,),
        in_specs=[
            pl.BlockSpec((N, C, HW), lambda i: (0, 0, 0)),
            pl.BlockSpec((Cred, C), lambda i: (0, 0)),
            pl.BlockSpec((Cred, 1), lambda i: (0, 0)),
            pl.BlockSpec((C, 9 * Cred), lambda i: (0, 0)),
            pl.BlockSpec((C, 1), lambda i: (0, 0)),
        ],
        out_specs=pl.BlockSpec((N, C, HW), lambda i: (0, 0, 0)),
        scratch_shapes=[pltpu.VMEM((9 * Cred, N * HW), jnp.bfloat16)],
        input_output_aliases={0: 0},       # out reuses x2's buffer
        compiler_params=pltpu.CompilerParams(
            dimension_semantics=("arbitrary",)),
    )(x2, w1, b1, w2, b2)

    return out.reshape(N, C, H, W)


# -------------------------- deterministic parameters -------------------------
def make_params(key, in_channels):
    C = in_channels
    Cred = C // 2
    eps = 1e-5
    ks = jax.random.split(key, 10)
    # PyTorch-layout conv weights (OIHW), no bias.
    w1_t = jax.random.normal(ks[0], (Cred, C, 1, 1), jnp.float32) * 0.1
    w2_t = jax.random.normal(ks[1], (C, Cred, 3, 3), jnp.float32) * 0.1
    # BN params + running stats (inference-mode fold).
    g1 = jax.random.uniform(ks[2], (Cred,), minval=0.5, maxval=1.5)
    be1 = jax.random.normal(ks[3], (Cred,)) * 0.1
    m1 = jax.random.normal(ks[4], (Cred,)) * 0.1
    v1 = jax.random.uniform(ks[5], (Cred,), minval=0.5, maxval=1.5)
    g2 = jax.random.uniform(ks[6], (C,), minval=0.5, maxval=1.5)
    be2 = jax.random.normal(ks[7], (C,)) * 0.1
    m2 = jax.random.normal(ks[8], (C,)) * 0.1
    v2 = jax.random.uniform(ks[9], (C,), minval=0.5, maxval=1.5)

    s1 = g1 / jnp.sqrt(v1 + eps)
    b1 = be1 - m1 * s1
    s2 = g2 / jnp.sqrt(v2 + eps)
    b2 = be2 - m2 * s2

    # Kernel-layout parameters: BN scale folded into the conv weights (bf16),
    # folded bias kept separately in f32.
    w1k = (s1[:, None] * w1_t[:, :, 0, 0]).astype(jnp.bfloat16)      # (Cred, C)
    w2k = s2[:, None, None, None] * w2_t                             # (C,Cred,3,3)
    w2k = jnp.transpose(w2k, (0, 2, 3, 1)).reshape(C, 9 * Cred)      # (C, 9*Cred)
    w2k = w2k.astype(jnp.bfloat16)
    kernel_params = (w1k, b1.reshape(Cred, 1), w2k, b2.reshape(C, 1))
    torch_params = (w1_t, s1, b1, w2_t, s2, b2)
    return kernel_params, torch_params


# ------------------------------ pure-JAX reference ----------------------------
def reference(x_nchw, torch_params):
    w1_t, s1, b1, w2_t, s2, b2 = torch_params
    dn = ('NCHW', 'OIHW', 'NCHW')
    hp = jax.lax.Precision.HIGHEST
    y = jax.lax.conv_general_dilated(x_nchw, w1_t, (1, 1), 'VALID',
                                     dimension_numbers=dn, precision=hp)
    y = _leaky(y * s1[None, :, None, None] + b1[None, :, None, None])
    y = jax.lax.conv_general_dilated(y, w2_t, (1, 1), ((1, 1), (1, 1)),
                                     dimension_numbers=dn, precision=hp)
    y = _leaky(y * s2[None, :, None, None] + b2[None, :, None, None])
    return y + x_nchw


if __name__ == "__main__":
    key = jax.random.PRNGKey(0)
    k_x, k_p = jax.random.split(key)
    N, C, H, W = 2, 64, 16, 16
    x = jax.random.normal(k_x, (N, C, H, W), jnp.float32)
    kernel_params, torch_params = make_params(k_p, C)

    fwd = jax.jit(dark_residual_block)
    out = jax.block_until_ready(fwd(x, kernel_params))
    ref = jax.block_until_ready(reference(x, torch_params))

    # Tolerance sized for the single-pass bf16 MXU path vs the f32 (HIGHEST)
    # reference.
    np.testing.assert_allclose(np.asarray(out), np.asarray(ref),
                               rtol=3e-2, atol=4e-2)
    print("KERNEL_OK")
</pallas_src>

<mosaic_0001>
module attributes {stable_mosaic.version = 11 : i64} {
  func.func @_fused_kernel(%arg0: i32, %arg1: memref<2x64x256xf32, #tpu.memory_space<vmem>>, %arg2: memref<32x64xbf16, #tpu.memory_space<vmem>>, %arg3: memref<32x1xf32, #tpu.memory_space<vmem>>, %arg4: memref<64x288xbf16, #tpu.memory_space<vmem>>, %arg5: memref<64x1xf32, #tpu.memory_space<vmem>>, %arg6: memref<2x64x256xf32, #tpu.memory_space<vmem>>, %arg7: memref<288x512xbf16, #tpu.memory_space<vmem>>) attributes {dimension_semantics = [#tpu.dimension_semantics<arbitrary>], iteration_bounds = array<i64: 1>, scalar_prefetch = 0 : i64, scratch_operands = 1 : i64, tpu.core_type = #tpu.core_type<tc>, window_params = [{pipeline_mode = #tpu.pipeline_mode<synchronous>, transform_indices = @transform_0, window_bounds = array<i64: 2, 64, 256>}, {pipeline_mode = #tpu.pipeline_mode<synchronous>, transform_indices = @transform_1, window_bounds = array<i64: 32, 64>}, {pipeline_mode = #tpu.pipeline_mode<synchronous>, transform_indices = @transform_2, window_bounds = array<i64: 32, 1>}, {pipeline_mode = #tpu.pipeline_mode<synchronous>, transform_indices = @transform_3, window_bounds = array<i64: 64, 288>}, {pipeline_mode = #tpu.pipeline_mode<synchronous>, transform_indices = @transform_4, window_bounds = array<i64: 64, 1>}, {pipeline_mode = #tpu.pipeline_mode<synchronous>, transform_indices = @transform_5, window_bounds = array<i64: 2, 64, 256>}]} {
    %c0 = arith.constant 0 : index
    %c0_0 = arith.constant 0 : index
    %0 = vector.load %arg2[%c0, %c0_0] : memref<32x64xbf16, #tpu.memory_space<vmem>>, vector<32x64xbf16>
    %c0_1 = arith.constant 0 : index
    %c0_2 = arith.constant 0 : index
    %c0_3 = arith.constant 0 : index
    %1 = vector.load %arg1[%c0_1, %c0_2, %c0_3] : memref<2x64x256xf32, #tpu.memory_space<vmem>>, vector<1x64x256xf32>
    %2 = vector.shape_cast %1 : vector<1x64x256xf32> to vector<64x256xf32>
    %3 = arith.truncf %2 : vector<64x256xf32> to vector<64x256xbf16>
    %cst = arith.constant dense<0.000000e+00> : vector<32x256xf32>
    %4 = tpu.matmul %0, %3, %cst {dimension_numbers = #tpu.dot_dimension_numbers<[1], [0], [0], [1], [0, 0, 1, 1], [], []>} : vector<32x64xbf16>, vector<64x256xbf16>, vector<32x256xf32> -> vector<32x256xf32>
    %c1 = arith.constant 1 : index
    %c0_4 = arith.constant 0 : index
    %c0_5 = arith.constant 0 : index
    %5 = vector.load %arg1[%c1, %c0_4, %c0_5] : memref<2x64x256xf32, #tpu.memory_space<vmem>>, vector<1x64x256xf32>
    %6 = vector.shape_cast %5 : vector<1x64x256xf32> to vector<64x256xf32>
    %7 = arith.truncf %6 : vector<64x256xf32> to vector<64x256xbf16>
    %cst_6 = arith.constant dense<0.000000e+00> : vector<32x256xf32>
    %8 = tpu.matmul %0, %7, %cst_6 {dimension_numbers = #tpu.dot_dimension_numbers<[1], [0], [0], [1], [0, 0, 1, 1], [], []>} : vector<32x64xbf16>, vector<64x256xbf16>, vector<32x256xf32> -> vector<32x256xf32>
    %9 = tpu.concatenate %4, %8 in 1 : vector<32x256xf32>, vector<32x256xf32> -> vector<32x512xf32>
    %c0_7 = arith.constant 0 : index
    %c0_8 = arith.constant 0 : index
    %10 = vector.load %arg3[%c0_7, %c0_8] : memref<32x1xf32, #tpu.memory_space<vmem>>, vector<32x1xf32>
    %11 = vector.broadcast %10 : vector<32x1xf32> to vector<32x512xf32>
    %12 = arith.addf %9, %11 : vector<32x512xf32>
    %cst_9 = arith.constant 0.000000e+00 : f32
    %13 = vector.broadcast %cst_9 : f32 to vector<32x512xf32>
    %14 = arith.cmpf oge, %12, %13 : vector<32x512xf32>
    %cst_10 = arith.constant 0.00999999977 : f32
    %15 = vector.broadcast %cst_10 : f32 to vector<32x512xf32>
    %16 = arith.mulf %15, %12 : vector<32x512xf32>
    %17 = arith.select %14, %12, %16 : vector<32x512xi1>, vector<32x512xf32>
    %18 = tpu.iota {dimensions = array<i32: 1>} : vector<1x512xi32>
    %c15_i32 = arith.constant 15 : i32
    %19 = vector.broadcast %c15_i32 : i32 to vector<1x512xi32>
    %20 = arith.andi %18, %19 : vector<1x512xi32>
    %c4_i32 = arith.constant 4 : i32
    %21 = vector.broadcast %c4_i32 : i32 to vector<1x512xi32>
    %22 = arith.shrsi %18, %21 : vector<1x512xi32>
    %c15_i32_11 = arith.constant 15 : i32
    %23 = vector.broadcast %c15_i32_11 : i32 to vector<1x512xi32>
    %24 = arith.andi %22, %23 : vector<1x512xi32>
    %c0_i32 = arith.constant 0 : i32
    %25 = vector.broadcast %c0_i32 : i32 to vector<1x512xi32>
    %26 = arith.cmpi ne, %20, %25 : vector<1x512xi32>
    %c15_i32_12 = arith.constant 15 : i32
    %27 = vector.broadcast %c15_i32_12 : i32 to vector<1x512xi32>
    %28 = arith.cmpi ne, %20, %27 : vector<1x512xi32>
    %c0_i32_13 = arith.constant 0 : i32
    %29 = vector.broadcast %c0_i32_13 : i32 to vector<1x512xi32>
    %30 = arith.cmpi ne, %24, %29 : vector<1x512xi32>
    %c15_i32_14 = arith.constant 15 : i32
    %31 = vector.broadcast %c15_i32_14 : i32 to vector<1x512xi32>
    %32 = arith.cmpi ne, %24, %31 : vector<1x512xi32>
    %c17_i32 = arith.constant 17 : i32
    %33 = tpu.dynamic_rotate %17 by %c17_i32 dim 1 : vector<32x512xf32>, i32 -> vector<32x512xf32>
    %34 = arith.andi %30, %26 : vector<1x512xi1>
    %cst_15 = arith.constant 0.000000e+00 : f32
    %35 = vector.shape_cast %34 : vector<1x512xi1> to vector<1x512xi1>
    %36 = vector.broadcast %35 : vector<1x512xi1> to vector<32x512xi1>
    %37 = vector.broadcast %cst_15 : f32 to vector<32x512xf32>
    %38 = arith.select %36, %33, %37 : vector<32x512xi1>, vector<32x512xf32>
    %39 = arith.truncf %38 : vector<32x512xf32> to vector<32x512xbf16>
    %c0_16 = arith.constant 0 : index
    %c0_17 = arith.constant 0 : index
    %40 = vector.load %arg7[%c0_16, %c0_17] : memref<288x512xbf16, #tpu.memory_space<vmem>>, vector<32x512xbf16>
    tpu.vector_store %arg7[%c0_16, %c0_17], %39 {strides = array<i32>} : memref<288x512xbf16, #tpu.memory_space<vmem>>, vector<32x512xbf16>,
    %c16_i32 = arith.constant 16 : i32
    %41 = tpu.dynamic_rotate %17 by %c16_i32 dim 1 : vector<32x512xf32>, i32 -> vector<32x512xf32>
    %cst_18 = arith.constant 0.000000e+00 : f32
    %42 = vector.shape_cast %30 : vector<1x512xi1> to vector<1x512xi1>
    %43 = vector.broadcast %42 : vector<1x512xi1> to vector<32x512xi1>
    %44 = vector.broadcast %cst_18 : f32 to vector<32x512xf32>
    %45 = arith.select %43, %41, %44 : vector<32x512xi1>, vector<32x512xf32>
    %46 = arith.truncf %45 : vector<32x512xf32> to vector<32x512xbf16>
    %c32 = arith.constant 32 : index
    %c0_19 = arith.constant 0 : index
    %47 = vector.load %arg7[%c32, %c0_19] : memref<288x512xbf16, #tpu.memory_space<vmem>>, vector<32x512xbf16>
    tpu.vector_store %arg7[%c32, %c0_19], %46 {strides = array<i32>} : memref<288x512xbf16, #tpu.memory_space<vmem>>, vector<32x512xbf16>,
    %c15_i32_20 = arith.constant 15 : i32
    %48 = tpu.dynamic_rotate %17 by %c15_i32_20 dim 1 : vector<32x512xf32>, i32 -> vector<32x512xf32>
    %49 = arith.andi %30, %28 : vector<1x512xi1>
    %cst_21 = arith.constant 0.000000e+00 : f32
    %50 = vector.shape_cast %49 : vector<1x512xi1> to vector<1x512xi1>
    %51 = vector.broadcast %50 : vector<1x512xi1> to vector<32x512xi1>
    %52 = vector.broadcast %cst_21 : f32 to vector<32x512xf32>
    %53 = arith.select %51, %48, %52 : vector<32x512xi1>, vector<32x512xf32>
    %54 = arith.truncf %53 : vector<32x512xf32> to vector<32x512xbf16>
    %c64 = arith.constant 64 : index
    %c0_22 = arith.constant 0 : index
    %55 = vector.load %arg7[%c64, %c0_22] : memref<288x512xbf16, #tpu.memory_space<vmem>>, vector<32x512xbf16>
    tpu.vector_store %arg7[%c64, %c0_22], %54 {strides = array<i32>} : memref<288x512xbf16, #tpu.memory_space<vmem>>, vector<32x512xbf16>,
    %c1_i32 = arith.constant 1 : i32
    %56 = tpu.dynamic_rotate %17 by %c1_i32 dim 1 : vector<32x512xf32>, i32 -> vector<32x512xf32>
    %cst_23 = arith.constant 0.000000e+00 : f32
    %57 = vector.shape_cast %26 : vector<1x512xi1> to vector<1x512xi1>
    %58 = vector.broadcast %57 : vector<1x512xi1> to vector<32x512xi1>
    %59 = vector.broadcast %cst_23 : f32 to vector<32x512xf32>
    %60 = arith.select %58, %56, %59 : vector<32x512xi1>, vector<32x512xf32>
    %61 = arith.truncf %60 : vector<32x512xf32> to vector<32x512xbf16>
    %c96 = arith.constant 96 : index
    %c0_24 = arith.constant 0 : index
    %62 = vector.load %arg7[%c96, %c0_24] : memref<288x512xbf16, #tpu.memory_space<vmem>>, vector<32x512xbf16>
    tpu.vector_store %arg7[%c96, %c0_24], %61 {strides = array<i32>} : memref<288x512xbf16, #tpu.memory_space<vmem>>, vector<32x512xbf16>,
    %63 = arith.truncf %17 : vector<32x512xf32> to vector<32x512xbf16>
    %c128 = arith.constant 128 : index
    %c0_25 = arith.constant 0 : index
    %64 = vector.load %arg7[%c128, %c0_25] : memref<288x512xbf16, #tpu.memory_space<vmem>>, vector<32x512xbf16>
    tpu.vector_store %arg7[%c128, %c0_25], %63 {strides = array<i32>} : memref<288x512xbf16, #tpu.memory_space<vmem>>, vector<32x512xbf16>,
    %c511_i32 = arith.constant 511 : i32
    %65 = tpu.dynamic_rotate %17 by %c511_i32 dim 1 : vector<32x512xf32>, i32 -> vector<32x512xf32>
    %cst_26 = arith.constant 0.000000e+00 : f32
    %66 = vector.shape_cast %28 : vector<1x512xi1> to vector<1x512xi1>
    %67 = vector.broadcast %66 : vector<1x512xi1> to vector<32x512xi1>
    %68 = vector.broadcast %cst_26 : f32 to vector<32x512xf32>
    %69 = arith.select %67, %65, %68 : vector<32x512xi1>, vector<32x512xf32>
    %70 = arith.truncf %69 : vector<32x512xf32> to vector<32x512xbf16>
    %c160 = arith.constant 160 : index
    %c0_27 = arith.constant 0 : index
    %71 = vector.load %arg7[%c160, %c0_27] : memref<288x512xbf16, #tpu.memory_space<vmem>>, vector<32x512xbf16>
    tpu.vector_store %arg7[%c160, %c0_27], %70 {strides = array<i32>} : memref<288x512xbf16, #tpu.memory_space<vmem>>, vector<32x512xbf16>,
    %c497_i32 = arith.constant 497 : i32
    %72 = tpu.dynamic_rotate %17 by %c497_i32 dim 1 : vector<32x512xf32>, i32 -> vector<32x512xf32>
    %73 = arith.andi %32, %26 : vector<1x512xi1>
    %cst_28 = arith.constant 0.000000e+00 : f32
    %74 = vector.shape_cast %73 : vector<1x512xi1> to vector<1x512xi1>
    %75 = vector.broadcast %74 : vector<1x512xi1> to vector<32x512xi1>
    %76 = vector.broadcast %cst_28 : f32 to vector<32x512xf32>
    %77 = arith.select %75, %72, %76 : vector<32x512xi1>, vector<32x512xf32>
    %78 = arith.truncf %77 : vector<32x512xf32> to vector<32x512xbf16>
    %c192 = arith.constant 192 : index
    %c0_29 = arith.constant 0 : index
    %79 = vector.load %arg7[%c192, %c0_29] : memref<288x512xbf16, #tpu.memory_space<vmem>>, vector<32x512xbf16>
    tpu.vector_store %arg7[%c192, %c0_29], %78 {strides = array<i32>} : memref<288x512xbf16, #tpu.memory_space<vmem>>, vector<32x512xbf16>,
    %c496_i32 = arith.constant 496 : i32
    %80 = tpu.dynamic_rotate %17 by %c496_i32 dim 1 : vector<32x512xf32>, i32 -> vector<32x512xf32>
    %cst_30 = arith.constant 0.000000e+00 : f32
    %81 = vector.shape_cast %32 : vector<1x512xi1> to vector<1x512xi1>
    %82 = vector.broadcast %81 : vector<1x512xi1> to vector<32x512xi1>
    %83 = vector.broadcast %cst_30 : f32 to vector<32x512xf32>
    %84 = arith.select %82, %80, %83 : vector<32x512xi1>, vector<32x512xf32>
    %85 = arith.truncf %84 : vector<32x512xf32> to vector<32x512xbf16>
    %c224 = arith.constant 224 : index
    %c0_31 = arith.constant 0 : index
    %86 = vector.load %arg7[%c224, %c0_31] : memref<288x512xbf16, #tpu.memory_space<vmem>>, vector<32x512xbf16>
    tpu.vector_store %arg7[%c224, %c0_31], %85 {strides = array<i32>} : memref<288x512xbf16, #tpu.memory_space<vmem>>, vector<32x512xbf16>,
    %c495_i32 = arith.constant 495 : i32
    %87 = tpu.dynamic_rotate %17 by %c495_i32 dim 1 : vector<32x512xf32>, i32 -> vector<32x512xf32>
    %88 = arith.andi %32, %28 : vector<1x512xi1>
    %cst_32 = arith.constant 0.000000e+00 : f32
    %89 = vector.shape_cast %88 : vector<1x512xi1> to vector<1x512xi1>
    %90 = vector.broadcast %89 : vector<1x512xi1> to vector<32x512xi1>
    %91 = vector.broadcast %cst_32 : f32 to vector<32x512xf32>
    %92 = arith.select %90, %87, %91 : vector<32x512xi1>, vector<32x512xf32>
    %93 = arith.truncf %92 : vector<32x512xf32> to vector<32x512xbf16>
    %c256 = arith.constant 256 : index
    %c0_33 = arith.constant 0 : index
    %94 = vector.load %arg7[%c256, %c0_33] : memref<288x512xbf16, #tpu.memory_space<vmem>>, vector<32x512xbf16>
    tpu.vector_store %arg7[%c256, %c0_33], %93 {strides = array<i32>} : memref<288x512xbf16, #tpu.memory_space<vmem>>, vector<32x512xbf16>,
    %c0_34 = arith.constant 0 : index
    %c0_35 = arith.constant 0 : index
    %95 = vector.load %arg4[%c0_34, %c0_35] : memref<64x288xbf16, #tpu.memory_space<vmem>>, vector<64x288xbf16>
    %c0_36 = arith.constant 0 : index
    %c0_37 = arith.constant 0 : index
    %96 = vector.load %arg7[%c0_36, %c0_37] : memref<288x512xbf16, #tpu.memory_space<vmem>>, vector<288x512xbf16>
    %cst_38 = arith.constant dense<0.000000e+00> : vector<64x512xf32>
    %97 = tpu.matmul %95, %96, %cst_38 {dimension_numbers = #tpu.dot_dimension_numbers<[1], [0], [0], [1], [0, 0, 1, 1], [], []>} : vector<64x288xbf16>, vector<288x512xbf16>, vector<64x512xf32> -> vector<64x512xf32>
    %c0_39 = arith.constant 0 : index
    %c0_40 = arith.constant 0 : index
    %98 = vector.load %arg5[%c0_39, %c0_40] : memref<64x1xf32, #tpu.memory_space<vmem>>, vector<64x1xf32>
    %99 = vector.broadcast %98 : vector<64x1xf32> to vector<64x512xf32>
    %100 = arith.addf %97, %99 : vector<64x512xf32>
    %cst_41 = arith.constant 0.000000e+00 : f32
    %101 = vector.broadcast %cst_41 : f32 to vector<64x512xf32>
    %102 = arith.cmpf oge, %100, %101 : vector<64x512xf32>
    %cst_42 = arith.constant 0.00999999977 : f32
    %103 = vector.broadcast %cst_42 : f32 to vector<64x512xf32>
    %104 = arith.mulf %103, %100 : vector<64x512xf32>
    %105 = arith.select %102, %100, %104 : vector<64x512xi1>, vector<64x512xf32>
    %106 = vector.extract_strided_slice %105 {offsets = [0, 0], sizes = [64, 256], strides = [1, 1]} : vector<64x512xf32> to vector<64x256xf32>
    %c0_43 = arith.constant 0 : index
    %c0_44 = arith.constant 0 : index
    %c0_45 = arith.constant 0 : index
    %107 = vector.load %arg1[%c0_43, %c0_44, %c0_45] : memref<2x64x256xf32, #tpu.memory_space<vmem>>, vector<1x64x256xf32>
    %108 = vector.shape_cast %107 : vector<1x64x256xf32> to vector<64x256xf32>
    %109 = arith.addf %106, %108 : vector<64x256xf32>
    %c0_46 = arith.constant 0 : index
    %c0_47 = arith.constant 0 : index
    %c0_48 = arith.constant 0 : index
    %110 = vector.load %arg6[%c0_46, %c0_47, %c0_48] : memref<2x64x256xf32, #tpu.memory_space<vmem>>, vector<1x64x256xf32>
    %111 = vector.shape_cast %110 : vector<1x64x256xf32> to vector<64x256xf32>
    %112 = vector.shape_cast %109 : vector<64x256xf32> to vector<1x64x256xf32>
    tpu.vector_store %arg6[%c0_46, %c0_47, %c0_48], %112 {strides = array<i32>} : memref<2x64x256xf32, #tpu.memory_space<vmem>>, vector<1x64x256xf32>,
    %113 = vector.extract_strided_slice %105 {offsets = [0, 256], sizes = [64, 256], strides = [1, 1]} : vector<64x512xf32> to vector<64x256xf32>
    %c1_49 = arith.constant 1 : index
    %c0_50 = arith.constant 0 : index
    %c0_51 = arith.constant 0 : index
    %114 = vector.load %arg1[%c1_49, %c0_50, %c0_51] : memref<2x64x256xf32, #tpu.memory_space<vmem>>, vector<1x64x256xf32>
    %115 = vector.shape_cast %114 : vector<1x64x256xf32> to vector<64x256xf32>
    %116 = arith.addf %113, %115 : vector<64x256xf32>
    %c1_52 = arith.constant 1 : index
    %c0_53 = arith.constant 0 : index
    %c0_54 = arith.constant 0 : index
    %117 = vector.load %arg6[%c1_52, %c0_53, %c0_54] : memref<2x64x256xf32, #tpu.memory_space<vmem>>, vector<1x64x256xf32>
    %118 = vector.shape_cast %117 : vector<1x64x256xf32> to vector<64x256xf32>
    %119 = vector.shape_cast %116 : vector<64x256xf32> to vector<1x64x256xf32>
    tpu.vector_store %arg6[%c1_52, %c0_53, %c0_54], %119 {strides = array<i32>} : memref<2x64x256xf32, #tpu.memory_space<vmem>>, vector<1x64x256xf32>,
    return
  }
  func.func @transform_0(%arg0: i32) -> (i32, i32, i32) {
    %c0_i32 = arith.constant 0 : i32
    %c0_i32_0 = arith.constant 0 : i32
    %c0_i32_1 = arith.constant 0 : i32
    %c0_i32_2 = arith.constant 0 : i32
    return %c0_i32, %c0_i32_0, %c0_i32_1 : i32, i32, i32
  }
  func.func @transform_1(%arg0: i32) -> (i32, i32) {
    %c0_i32 = arith.constant 0 : i32
    %c0_i32_0 = arith.constant 0 : i32
    %c0_i32_1 = arith.constant 0 : i32
    return %c0_i32, %c0_i32_0 : i32, i32
  }
  func.func @transform_2(%arg0: i32) -> (i32, i32) {
    %c0_i32 = arith.constant 0 : i32
    %c0_i32_0 = arith.constant 0 : i32
    %c0_i32_1 = arith.constant 0 : i32
    return %c0_i32, %c0_i32_0 : i32, i32
  }
  func.func @transform_3(%arg0: i32) -> (i32, i32) {
    %c0_i32 = arith.constant 0 : i32
    %c0_i32_0 = arith.constant 0 : i32
    %c0_i32_1 = arith.constant 0 : i32
    return %c0_i32, %c0_i32_0 : i32, i32
  }
  func.func @transform_4(%arg0: i32) -> (i32, i32) {
    %c0_i32 = arith.constant 0 : i32
    %c0_i32_0 = arith.constant 0 : i32
    %c0_i32_1 = arith.constant 0 : i32
    return %c0_i32, %c0_i32_0 : i32, i32
  }
  func.func @transform_5(%arg0: i32) -> (i32, i32, i32) {
    %c0_i32 = arith.constant 0 : i32
    %c0_i32_0 = arith.constant 0 : i32
    %c0_i32_1 = arith.constant 0 : i32
    %c0_i32_2 = arith.constant 0 : i32
    return %c0_i32, %c0_i32_0, %c0_i32_1 : i32, i32, i32
  }
}

</mosaic_0001>

<bundles_post_ra>
// kernel: dark_residual_block.1
= control target key start
LH: loop header
LB: loop body
LE: loop exit
PB: predicated region body
PF: predicated region fallthrough
CT: control target
= control target key end

     0   :  { %v2975_v3 = vmov 0   ;;  %vm59_vm0 = vcmask 523264   ;;  %s2978_s19 = smov 112   ;;  %s2979_s20 = smov 15   ;;  %s5113_s0 = inlined_call_operand.vmem [shape: f32[2,64,256], index: 0, kind: input, shape index: {}, may-alias: {0,5}]   ;;  %s5114_s2 = inlined_call_operand.vmem [shape: f32[32,1], index: 2, kind: input, shape index: {}]   ;;  %s5115_s1 = inlined_call_operand.vmem [shape: bf16[32,64], index: 1, kind: input, shape index: {}]   ;;  %s5116_s4 = inlined_call_operand.vmem [shape: f32[64,1], index: 4, kind: input, shape index: {}]   ;;  %s5117_s3 = inlined_call_operand.vmem [shape: bf16[64,288], index: 3, kind: input, shape index: {}]   ;;  %s5118_s5 = inlined_call_operand.vmem [shape: f32[2,64,256], index: 5, kind: output, shape index: {}, may-alias: {0,5}]  }
   0x1   :  { %v37_v0 = vld [vmem:[%s5113_s0 + $0x60] sm:$0xff]  ;;  %v39_v1 = vld [vmem:[%s5113_s0 + $0x70] sm:$0xff]  ;;  %v38_v2 = vld [vmem:[%s5113_s0 + $0x68] sm:$0xff]  ;;  %2658 = vset.pattern.permute.xlu1 %v2975_v3  ;;  %2657 = vset.pattern.permute.xlu0 %v2975_v3  ;;  %s2980_s21 = smov 113   ;;  %s2981_s22 = smov 16  }
   0x2   :  { %v47_v4 = vpack.c.bf16 %v39_v1, %v37_v0  ;;  %v40_v5 = vld [vmem:[%s5113_s0 + $0x78] sm:$0xff]  ;;  %v2170_v6 = vld [vmem:[%s5113_s0 + $0xe0] sm:$0xff]  ;;  %v2172_v7 = vld [vmem:[%s5113_s0 + $0xf0] sm:$0xff]  ;;  %2974 = vset.pattern.permute.xlu2 %v2975_v3  ;;  %s2982_s23 = smov 127   ;;  %s2983_s24 = smov 111  }
   0x3   :  { %v48_v8 = vpack.c.bf16 %v40_v5, %v38_v2  ;;  %v127_v9 = vpack.c.bf16 %v2172_v7, %v2170_v6  ;;  %v2171_v10 = vld [vmem:[%s5113_s0 + $0xe8] sm:$0xff]  ;;  %v2173_v11 = vld [vmem:[%s5113_s0 + $0xf8] sm:$0xff]  ;;  %v33_v12 = vld [vmem:[%s5113_s0 + $0x40] sm:$0xff] }
   0x4   :  { %70 = vmatpush.bf16.msra.mxu0 %v47_v4  ;;  %v128_v13 = vpack.c.bf16 %v2173_v11, %v2171_v10  ;;  %v35_v14 = vld [vmem:[%s5113_s0 + $0x50] sm:$0xff]  ;;  %v34_v15 = vld [vmem:[%s5113_s0 + $0x48] sm:$0xff]  ;;  %v36_v16 = vld [vmem:[%s5113_s0 + $0x58] sm:$0xff] }
   0x5   :  { %89 = vmatpush.bf16.msra.mxu1 %v48_v8  ;;  %133 = vmatpush.bf16.msra.mxu2 %v127_v9  ;;  %v45_v17 = vpack.c.bf16 %v35_v14, %v33_v12  ;;  %v46_v18 = vpack.c.bf16 %v36_v16, %v34_v15  ;;  %v2166_v19 = vld [vmem:[%s5113_s0 + $0xc0] sm:$0xff]  ;;  %v2168_v20 = vld [vmem:[%s5113_s0 + $0xd0] sm:$0xff]  ;;  %v2167_v21 = vld [vmem:[%s5113_s0 + $0xc8] sm:$0xff] }
   0x6   :  { %152 = vmatpush.bf16.msra.mxu3 %v128_v13  ;;  %v125_v22 = vpack.c.bf16 %v2168_v20, %v2166_v19  ;;  %v2169_v23 = vld [vmem:[%s5113_s0 + $0xd8] sm:$0xff]  ;;  %v29_v24 = vld [vmem:[%s5113_s0 + $0x20] sm:$0xff]  ;;  %v31_v25 = vld [vmem:[%s5113_s0 + $0x30] sm:$0xff] }
   0x7   :  { %v126_v26 = vpack.c.bf16 %v2169_v23, %v2167_v21  ;;  %v30_v27 = vld [vmem:[%s5113_s0 + $0x28] sm:$0xff]  ;;  %v32_v28 = vld [vmem:[%s5113_s0 + $0x38] sm:$0xff]  ;;  %v2162_v29 = vld [vmem:[%s5113_s0 + $0xa0] sm:$0xff]  ;;  %v43_v30 = vpack.c.bf16 %v31_v25, %v29_v24 }
   0x8   :  { %71 = vmatpush.bf16.msra.mxu0 %v45_v17  ;;  %v2164_v31 = vld [vmem:[%s5113_s0 + $0xb0] sm:$0xff]  ;;  %v2163_v32 = vld [vmem:[%s5113_s0 + $0xa8] sm:$0xff]  ;;  %v2165_v33 = vld [vmem:[%s5113_s0 + $0xb8] sm:$0xff]  ;;  %v44_v34 = vpack.c.bf16 %v32_v28, %v30_v27 }
   0x9   :  { %90 = vmatpush.bf16.msra.mxu1 %v46_v18  ;;  %134 = vmatpush.bf16.msra.mxu2 %v125_v22  ;;  %v123_v35 = vpack.c.bf16 %v2164_v31, %v2162_v29  ;;  %v25_v36 = vld [vmem:[%s5113_s0] sm:$0xff]  ;;  %v27_v37 = vld [vmem:[%s5113_s0 + $0x10] sm:$0xff]  ;;  %v26_v38 = vld [vmem:[%s5113_s0 + $0x8] sm:$0xff]  ;;  %v124_v39 = vpack.c.bf16 %v2165_v33, %v2163_v32 }
   0xa   :  { %153 = vmatpush.bf16.msra.mxu3 %v126_v26  ;;  %v28_v40 = vld [vmem:[%s5113_s0 + $0x18] sm:$0xff]  ;;  %v2158_v41 = vld [vmem:[%s5113_s0 + $0x80] sm:$0xff]  ;;  %v2160_v42 = vld [vmem:[%s5113_s0 + $0x90] sm:$0xff]  ;;  %v41_v45 = vpack.c.bf16 %v27_v37, %v25_v36 }
   0xb   :  { %v2159_v43 = vld [vmem:[%s5113_s0 + $0x88] sm:$0xff]  ;;  %v2161_v44 = vld [vmem:[%s5113_s0 + $0x98] sm:$0xff]  ;;  %v167_v46 = vld [vmem:[%s5114_s2] sm:$0xff]  ;;  %v42_v47 = vpack.c.bf16 %v28_v40, %v26_v38  ;;  %v121_v48 = vpack.c.bf16 %v2160_v42, %v2158_v41 }
   0xc   :  { %72 = vmatpush.bf16.msra.mxu0 %v43_v30  ;;  %v169_v49 = vld [vmem:[%s5114_s2 + $0x10] sm:$0xff]  ;;  %v122_v50 = vpack.c.bf16 %v2161_v44, %v2159_v43  ;;  %173 = vperm.xlu1 %2658, %v167_v46   ;;  %v2562_v51 = vld [vmem:[%s5115_s1] sm:$0xff]  ;;  %v168_v52 = vld [vmem:[%s5114_s2 + $0x8] sm:$0xff] }
   0xd   :  { %91 = vmatpush.bf16.msra.mxu1 %v44_v34  ;;  %135 = vmatpush.bf16.msra.mxu2 %v123_v35  ;;  %v170_v53 = vld [vmem:[%s5114_s2 + $0x18] sm:$0xff]  ;;  %v2563_v54 = vld [vmem:[%s5115_s1 + $0x8] sm:$0xff]  ;;  %s2976_s1 = smov 17   ;;  %s2977_s2 = smov 1  }
   0xe   :  { %154 = vmatpush.bf16.msra.mxu3 %v124_v39  ;;  %183 = vperm.xlu0 %2657, %v169_v49  }
  0x10   :  { %73 = vmatpush.bf16.msra.mxu0 %v41_v45 }
  0x11   :  { %92 = vmatpush.bf16.msra.mxu1 %v42_v47  ;;  %136 = vmatpush.bf16.msra.mxu2 %v121_v48 }
  0x12   :  { %155 = vmatpush.bf16.msra.mxu3 %v122_v50 }
  0x13   :  { %2154 = vmatmul.msk.bf16.vlgmr.msra.gmra.mxu0 %vm59_vm0, %v2562_v51 }
  0x14   :  { %2156 = vmatmul.msk.bf16.vlgmr.msra.gmra.mxu1 %vm59_vm0, %v2562_v51  ;;  %2174 = vmatmul.msk.bf16.vlgmr.msra.gmra.mxu2 %vm59_vm0, %v2562_v51 }
  0x15   :  { %2176 = vmatmul.msk.bf16.vlgmr.msra.gmra.mxu3 %vm59_vm0, %v2562_v51  ;;  %178 = vperm.xlu1 %2658, %v168_v52  }
  0x16   :  { %188 = vperm.xlu0 %2657, %v170_v53  }
  0x23   :  { %2155 = vmatmul.msk.bf16.gmra.mxu0 %vm59_vm0, %v2563_v54 }
  0x24   :  { %2175 = vmatmul.msk.bf16.gmra.mxu2 %vm59_vm0, %v2563_v54  ;;  %2157 = vmatmul.msk.bf16.gmra.mxu1 %vm59_vm0, %v2563_v54 }
  0x25   :  { %2177 = vmatmul.msk.bf16.gmra.mxu3 %vm59_vm0, %v2563_v54 }
  0x7e   :  { %v174_v55 = vpop.permute.xlu1 %173 }
  0x80   :  { %v184_v17 = vpop.permute.xlu0 %183 }
  0x87   :  { %v179_v0 = vpop.permute.xlu1 %178 }
  0x88   :  { %v189_v40 = vpop.permute.xlu0 %188 }
  0x90   :  { %v75_v56 = vpop.f32.mrf.mxu0 }
  0x91   :  { %v191_v57 = vadd.f32 %v174_v55, %v75_v56  ;;  %v94_v58 = vpop.f32.mrf.mxu1 }
  0x92   :  { %v192_v59 = vadd.f32 %v174_v55, %v94_v58 }
  0x93   :  { %vm207_vm1 = vcmp.ge.f32.partialorder %v191_v57, 0.0  ;;  %v223_v60 = vmul.f32 0.01, %v191_v57 }
  0x94   :  { %vm208_vm2 = vcmp.ge.f32.partialorder %v192_v59, 0.0  ;;  %v224_v61 = vmul.f32 0.01, %v192_v59 }
  0x95   :  { %v239_v62 = vsel %vm207_vm1, %v191_v57, %v223_v60 }
  0x96   :  { %v240_v63 = vsel %vm208_vm2, %v192_v59, %v224_v61 }
  0x97   :  { %v652_v1 = vpack.c.bf16 %v240_v63, %v239_v62  ;;  %v138_v2 = vpop.f32.mrf.mxu2 }
  0x98   :  { %v193_v3 = vadd.f32 %v174_v55, %v138_v2  ;;  %v157_v4 = vpop.f32.mrf.mxu3  ;;  %v77_v5 = vpop.f32.mrf.mxu0 }
  0x99   :  { %660 = vst [vmem:[#allocation2 + $0x100] sm:$0xff] %v652_v1  ;;  %v194_v6 = vadd.f32 %v174_v55, %v157_v4  ;;  %v195_v7 = vadd.f32 %v179_v0, %v77_v5  ;;  %v96_v8 = vpop.f32.mrf.mxu1 }
  0x9a   :  { %vm209_vm3 = vcmp.ge.f32.partialorder %v193_v3, 0.0  ;;  %v225_v9 = vmul.f32 0.01, %v193_v3  ;;  %v196_v10 = vadd.f32 %v179_v0, %v96_v8 }
  0x9b   :  { %vm210_vm4 = vcmp.ge.f32.partialorder %v194_v6, 0.0  ;;  %v226_v11 = vmul.f32 0.01, %v194_v6  ;;  %vm211_vm5 = vcmp.ge.f32.partialorder %v195_v7, 0.0  ;;  %v227_v12 = vmul.f32 0.01, %v195_v7 }
  0x9c   :  { %v3136_v13 = vsel %vm209_vm3, %v193_v3, %v225_v9  ;;  %vm212_vm6 = vcmp.ge.f32.partialorder %v196_v10, 0.0  ;;  %v228_v14 = vmul.f32 0.01, %v196_v10 }
  0x9d   :  { %v3138_v15 = vsel %vm210_vm4, %v194_v6, %v226_v11  ;;  %v243_v16 = vsel %vm211_vm5, %v195_v7, %v227_v12 }
  0x9e   :  { %v653_v18 = vpack.c.bf16 %v3138_v15, %v3136_v13  ;;  %v244_v19 = vsel %vm212_vm6, %v196_v10, %v228_v14  ;;  %v3142_v20 = vpack.i.bf16 %v243_v16, %v239_v62 }
  0x9f   :  { %v654_v21 = vpack.c.bf16 %v244_v19, %v243_v16  ;;  %v140_v22 = vpop.f32.mrf.mxu2  ;;  %v3144_v23 = vpack.i.bf16 %v244_v19, %v240_v63  ;;  %v255_v16 = vlaneseq }
  0xa0   :  { %661 = vst [vmem:[#allocation2 + $0x108] sm:$0xff] %v653_v18  ;;  %v197_v24 = vadd.f32 %v179_v0, %v140_v22  ;;  %v159_v25 = vpop.f32.mrf.mxu3  ;;  %2660 = vrot.lane.b32.xlu2 %v3142_v20, %s2976_s1  ;;  %v80_v26 = vpop.f32.mrf.mxu0 }
  0xa1   :  { %662 = vst [vmem:[#allocation2 + $0x110] sm:$0xff] %v654_v21  ;;  %v198_v27 = vadd.f32 %v179_v0, %v159_v25  ;;  %2675 = vrot.lane.b32.xlu1 %v3144_v23, %s2977_s2  ;;  %2665 = vrot.lane.b32.xlu0 %v3144_v23, %s2976_s1  ;;  %v99_v28 = vpop.f32.mrf.mxu1  ;;  %v199_v30 = vadd.f32 %v184_v17, %v80_v26 }
  0xa2   :  { %vm213_vm7 = vcmp.ge.f32.partialorder %v197_v24, 0.0  ;;  %v229_v29 = vmul.f32 0.01, %v197_v24  ;;  %v200_v31 = vadd.f32 %v184_v17, %v99_v28 }
  0xa3   :  { %vm214_vm8 = vcmp.ge.f32.partialorder %v198_v27, 0.0  ;;  %v230_v32 = vmul.f32 0.01, %v198_v27  ;;  %vm215_vm9 = vcmp.ge.f32.partialorder %v199_v30, 0.0  ;;  %v231_v34 = vmul.f32 0.01, %v199_v30 }
  0xa4   :  { %v3152_v33 = vsel %vm213_vm7, %v197_v24, %v229_v29  ;;  %vm216_vm10 = vcmp.ge.f32.partialorder %v200_v31, 0.0  ;;  %v232_v36 = vmul.f32 0.01, %v200_v31 }
  0xa5   :  { %v3154_v35 = vsel %vm214_vm8, %v198_v27, %v230_v32  ;;  %v247_v39 = vsel %vm215_vm9, %v199_v30, %v231_v34  ;;  %v3170_v58 = vpack.i.bf16 %v3152_v33, %v3136_v13 }
  0xa6   :  { %v655_v37 = vpack.c.bf16 %v3154_v35, %v3152_v33  ;;  %v3160_v38 = vpack.i.bf16 %v3154_v35, %v3138_v15  ;;  %v248_v41 = vsel %vm216_vm10, %v200_v31, %v232_v36 }
  0xa7   :  { %v143_v42 = vpop.f32.mrf.mxu2  ;;  %v656_v44 = vpack.c.bf16 %v248_v41, %v247_v39 }
  0xa8   :  { %663 = vst [vmem:[#allocation2 + $0x118] sm:$0xff] %v655_v37  ;;  %v162_v43 = vpop.f32.mrf.mxu3  ;;  %2735 = vrot.lane.b32.xlu2 %v3160_v38, %s2977_s2  ;;  %v201_v45 = vadd.f32 %v184_v17, %v143_v42  ;;  %v82_v46 = vpop.f32.mrf.mxu0 }
  0xa9   :  { %v202_v47 = vadd.f32 %v184_v17, %v162_v43  ;;  %2685 = vrot.lane.b32.xlu1 %v3144_v23, %s2978_s19  ;;  %2670 = vrot.lane.b32.xlu0 %v3142_v20, %s2977_s2  ;;  %v203_v48 = vadd.f32 %v189_v40, %v82_v46  ;;  %v101_v49 = vpop.f32.mrf.mxu1  ;;  %664 = vst [vmem:[#allocation2 + $0x120] sm:$0xff] %v656_v44  ;;  %v3244_v17 = vand.u32 127, %v255_v16 }
  0xaa   :  { %vm217_vm11 = vcmp.ge.f32.partialorder %v201_v45, 0.0  ;;  %v233_v50 = vmul.f32 0.01, %v201_v45  ;;  %v204_v51 = vadd.f32 %v189_v40, %v101_v49 }
  0xab   :  { %vm218_vm12 = vcmp.ge.f32.partialorder %v202_v47, 0.0  ;;  %v234_v52 = vmul.f32 0.01, %v202_v47  ;;  %vm219_vm13 = vcmp.ge.f32.partialorder %v203_v48, 0.0  ;;  %v235_v53 = vmul.f32 0.01, %v203_v48 }
  0xac   :  { %v249_v54 = vsel %vm217_vm11, %v201_v45, %v233_v50  ;;  %vm220_vm14 = vcmp.ge.f32.partialorder %v204_v51, 0.0  ;;  %v236_v55 = vmul.f32 0.01, %v204_v51  ;;  %vm320_vm1 = vcmp.lt.s32.totalorder %v3244_v17, 17 }
  0xad   :  { %v250_v56 = vsel %vm218_vm12, %v202_v47, %v234_v52  ;;  %v251_v57 = vsel %vm219_vm13, %v203_v48, %v235_v53  ;;  %v257_v28 = vadd.s32 128, %v3244_v17  ;;  %v260_v29 = vand.u32 15, %v3244_v17 }
  0xae   :  { %v657_v59 = vpack.c.bf16 %v250_v56, %v249_v54  ;;  %v252_v60 = vsel %vm220_vm14, %v204_v51, %v236_v55  ;;  %v2809_v9 = vpack.i.bf16 %v251_v57, %v247_v39  ;;  %v2764_v12 = vpack.i.bf16 %v250_v56, %v3136_v13 }
  0xaf   :  { %v658_v61 = vpack.c.bf16 %v252_v60, %v251_v57  ;;  %v145_v62 = vpop.f32.mrf.mxu2  ;;  %v2804_v8 = vpack.i.bf16 %v252_v60, %v248_v41  ;;  %v261_v30 = vand.u32 15, %v257_v28  ;;  %vm5158_vm2 = vcmp.lt.s32.totalorder %v3244_v17, 1 }
  0xb0   :  { %v164_v63 = vpop.f32.mrf.mxu3  ;;  %2740 = vrot.lane.b32.xlu2 %v3170_v58, %s2978_s19  ;;  %665 = vst [vmem:[#allocation2 + $0x128] sm:$0xff] %v657_v59  ;;  %v205_v0 = vadd.f32 %v189_v40, %v145_v62  ;;  %v264_v36 = vshra.s32 %v3244_v17, 4  ;;  %v265_v42 = vshra.s32 %v257_v28, 4  ;;  %vm3288_vm3 = vcmp.ne.s32.totalorder %v260_v29, 0 }
  0xb1   :  { %v206_v1 = vadd.f32 %v189_v40, %v164_v63  ;;  %2695 = vrot.lane.b32.xlu1 %v3144_v23, %s2979_s20  ;;  %2680 = vrot.lane.b32.xlu0 %v3142_v20, %s2978_s19  ;;  %666 = vst [vmem:[#allocation2 + $0x130] sm:$0xff] %v658_v61  ;;  %vm3293_vm4 = vcmp.ne.s32.totalorder %v261_v30, 0  ;;  %vm5164_vm5 = vcmp.lt.s32.totalorder %v3244_v17, 112  ;;  %vm3374_vm8 = vcmp.ne.s32.totalorder %v261_v30, 15 }
  0xb2   :  { %vm221_vm15 = vcmp.ge.f32.partialorder %v205_v0, 0.0  ;;  %v237_v2 = vmul.f32 0.01, %v205_v0  ;;  %v3311_v51 = vand.u32 15, %v264_v36  ;;  %vm3378_vm9 = vcmp.ne.s32.totalorder %v260_v29, 15 }
  0xb3   :  { %vm222_vm0 = vcmp.ge.f32.partialorder %v206_v1, 0.0  ;;  %v238_v3 = vmul.f32 0.01, %v206_v1  ;;  %vm5119_vm12 = vcmp.lt.s32.totalorder %v3244_v17, 15 }
  0xb4   :  { %v253_v4 = vsel %vm221_vm15, %v205_v0, %v237_v2  ;;  %vm284_vm7 = vcmp.ne.s32.totalorder %v3311_v51, 15  ;;  %vm280_vm10 = vcmp.ne.s32.totalorder %v3311_v51, 0  ;;  %vm5121_vm15 = vcmp.lt.s32.totalorder %v3244_v17, 113 }
  0xb5   :  { %v254_v5 = vsel %vm222_vm0, %v206_v1, %v238_v3  ;;  %v3187_v11 = vpack.i.bf16 %v253_v4, %v249_v54  ;;  %vm3402_vm14 = vmand %vm280_vm10, %vm3378_vm9 }
  0xb6   :  { %v659_v6 = vpack.c.bf16 %v254_v5, %v253_v4  ;;  %v2889_v7 = vpack.i.bf16 %v3138_v15, %v254_v5  ;;  %v3185_v10 = vpack.i.bf16 %v254_v5, %v250_v56  ;;  %v3323_v56 = vand.u32 15, %v265_v42 }
  0xb8   :  { %2745 = vrot.lane.b32.xlu2 %v3160_v38, %s2979_s20  ;;  %667 = vst [vmem:[#allocation2 + $0x138] sm:$0xff] %v659_v6  ;;  %vm5126_vm6 = vcmp.ne.s32.totalorder %v3323_v56, 15  ;;  %vm281_vm11 = vcmp.ne.s32.totalorder %v3323_v56, 0 }
  0xb9   :  { %2705 = vrot.lane.b32.xlu1 %v3144_v23, %s2980_s21  ;;  %2690 = vrot.lane.b32.xlu0 %v3142_v20, %s2979_s20  ;;  %vm3393_vm13 = vmand %vm281_vm11, %vm3374_vm8 }
  0xba   :  { %vm3446_vm0 = vmand %vm5126_vm6, %vm3293_vm4 }
  0xc0   :  { %2750 = vrot.lane.b32.xlu2 %v3170_v58, %s2980_s21 }
  0xc1   :  { %2715 = vrot.lane.b32.xlu1 %v3144_v23, %s2981_s22  ;;  %2700 = vrot.lane.b32.xlu0 %v3142_v20, %s2980_s21 }
  0xc8   :  { %2755 = vrot.lane.b32.xlu2 %v3160_v38, %s2981_s22 }
  0xc9   :  { %2725 = vrot.lane.b32.xlu1 %v3144_v23, %s2982_s23  ;;  %2710 = vrot.lane.b32.xlu0 %v3142_v20, %s2981_s22 }
  0xd0   :  { %2760 = vrot.lane.b32.xlu2 %v3170_v58, %s2982_s23 }
  0xd1   :  { %2730 = vrot.lane.b32.xlu1 %v3142_v20, %s2983_s24  ;;  %2720 = vrot.lane.b32.xlu0 %v3142_v20, %s2982_s23 }
  0xd8   :  { %2765 = vrot.lane.b32.xlu2 %v2764_v12, %s2976_s1 }
  0xd9   :  { %2775 = vrot.lane.b32.xlu1 %v2804_v8, %s2976_s1  ;;  %2780 = vrot.lane.b32.xlu0 %v2809_v9, %s2977_s2 }
  0xe0   :  { %2770 = vrot.lane.b32.xlu2 %v2809_v9, %s2976_s1 }
  0xe1   :  { %2785 = vrot.lane.b32.xlu1 %v2804_v8, %s2977_s2  ;;  %2790 = vrot.lane.b32.xlu0 %v2809_v9, %s2978_s19 }
  0xe8   :  { %2850 = vrot.lane.b32.xlu2 %v3185_v10, %s2977_s2 }
  0xe9   :  { %2795 = vrot.lane.b32.xlu1 %v2804_v8, %s2978_s19  ;;  %2800 = vrot.lane.b32.xlu0 %v2809_v9, %s2979_s20 }
  0xf0   :  { %2855 = vrot.lane.b32.xlu2 %v3187_v11, %s2978_s19 }
  0xf1   :  { %2805 = vrot.lane.b32.xlu1 %v2804_v8, %s2979_s20  ;;  %2810 = vrot.lane.b32.xlu0 %v2809_v9, %s2980_s21 }
  0xf8   :  { %2860 = vrot.lane.b32.xlu2 %v3185_v10, %s2979_s20 }
  0xf9   :  { %2815 = vrot.lane.b32.xlu1 %v2804_v8, %s2980_s21  ;;  %2820 = vrot.lane.b32.xlu0 %v2809_v9, %s2981_s22 }
  0xfa   :  { %v3226_v13 = vpop.permute.xlu2 %2660 }
  0xfb   :  { %v5156_v21 = vunpack.i.h.bf16 %v3226_v13  ;;  %v5157_v22 = vunpack.i.l.bf16 %v3226_v13 }
 0x100   :  { %2865 = vrot.lane.b32.xlu2 %v3187_v11, %s2980_s21 }
 0x101   :  { %2825 = vrot.lane.b32.xlu1 %v2804_v8, %s2981_s22  ;;  %2830 = vrot.lane.b32.xlu0 %v2809_v9, %s2982_s23 }
 0x102   :  { %v3232_v14 = vpop.permute.xlu2 %2735 }
 0x103   :  { %v5141_v41 = vunpack.i.l.bf16 %v3232_v14  ;;  %v5140_v44 = vunpack.i.h.bf16 %v3232_v14 }
 0x108   :  { %2870 = vrot.lane.b32.xlu2 %v3185_v10, %s2981_s22 }
 0x109   :  { %2835 = vrot.lane.b32.xlu1 %v2804_v8, %s2982_s23  ;;  %2840 = vrot.lane.b32.xlu0 %v2809_v9, %s2983_s24 }
 0x10a   :  { %v3238_v15 = vpop.permute.xlu2 %2740 }
 0x10b   :  { %v5172_v60 = vunpack.i.h.bf16 %v3238_v15  ;;  %v5163_v61 = vunpack.i.l.bf16 %v3238_v15 }
 0x110   :  { %2875 = vrot.lane.b32.xlu2 %v3187_v11, %s2982_s23 }
 0x111   :  { %2845 = vrot.lane.b32.xlu1 %v2804_v8, %s2983_s24  ;;  %2890 = vrot.lane.b32.xlu0 %v2889_v7, %s2976_s1 }
 0x112   :  { %v3246_v18 = vpop.permute.xlu2 %2745 }
 0x113   :  { %v3248_v19 = vpop.permute.xlu1 %2675  ;;  %v3251_v20 = vpop.permute.xlu0 %2665 }
 0x114   :  { %5216 = vst [vmem:[#allocation3_spill] sm:$0xff] %v3251_v20  ;;  %v5120_v24 = vunpack.i.h.bf16 %v3251_v20  ;;  %v2667_v25 = vunpack.i.l.bf16 %v3251_v20  ;;  %v5142_v37 = vunpack.i.h.bf16 %v3248_v19  ;;  %v5139_v39 = vunpack.i.l.bf16 %v3248_v19 }
 0x116   :  { %v3263_v26 = vsel %vm320_vm1, %v5157_v22, %v2667_v25  ;;  %v3271_v27 = vsel %vm320_vm1, %v5156_v21, %v5120_v24 }
 0x118   :  { %2880 = vrot.lane.b32.xlu2 %v3187_v11, %s2983_s24 }
 0x119   :  { %314 = vrot.lane.b32.xlu1 %v3154_v35, %s2976_s1  ;;  %2895 = vrot.lane.b32.xlu0 %v3170_v58, %s2983_s24 }
 0x11a   :  { %v3281_v31 = vpop.permute.xlu2 %2750 }
 0x11b   :  { %5217 = vst [vmem:[#allocation4_spill] sm:$0xff] %v3281_v31  ;;  %v2686_v32 = vpop.permute.xlu1 %2685  ;;  %v2671_v34 = vpop.permute.xlu0 %2670 }
 0x11c   :  { %v2673_v40 = vunpack.i.h.bf16 %v2671_v34  ;;  %v2672_v35 = vunpack.i.l.bf16 %v2671_v34  ;;  %v2688_v48 = vunpack.i.h.bf16 %v2686_v32  ;;  %v2687_v52 = vunpack.i.l.bf16 %v2686_v32 }
 0x11d   :  { %v5306_v32 = vunpack.i.l.bf16 %v3238_v15 }
 0x11e   :  { %v605_v46 = vsel %vm5158_vm2, %v2673_v40, %v5142_v37  ;;  %v604_v47 = vsel %vm5158_vm2, %v2672_v35, %v5139_v39  ;;  %v608_v50 = vsel %vm5158_vm2, %v5141_v41, %v2672_v35  ;;  %v609_v53 = vsel %vm5158_vm2, %v5140_v44, %v2673_v40 }
 0x11f   :  { %v625_v49 = vsel %vm3293_vm4, %v605_v46, 0.0  ;;  %v620_v54 = vsel %vm3288_vm3, %v608_v50, 0.0  ;;  %v621_v55 = vsel %vm3293_vm4, %v604_v47, 0.0  ;;  %v624_v57 = vsel %vm3288_vm3, %v609_v53, 0.0 }
 0x120   :  { %2885 = vrot.lane.b32.xlu2 %v3144_v23, %s2983_s24  ;;  %v636_v59 = vpack.c.bf16 %v621_v55, %v620_v54  ;;  %v638_v62 = vpack.c.bf16 %v625_v49, %v624_v57  ;;  %v887_v1 = vsel %vm5164_vm5, %v2687_v52, %v5163_v61  ;;  %v888_v2 = vsel %vm5164_vm5, %v2688_v48, %v5172_v60 }
 0x121   :  { %2900 = vrot.lane.b32.xlu1 %v3170_v58, %s2977_s2  ;;  %2920 = vrot.lane.b32.xlu0 %v3185_v10, %s2978_s19  ;;  %v908_v7 = vsel %vm5126_vm6, %v887_v1, 0.0  ;;  %v912_v8 = vsel %vm5126_vm6, %v888_v2, 0.0  ;;  %v5146_v50 = vunpack.i.h.bf16 %v3246_v18  ;;  %vm5134_vm6 = vcmp.lt.s32.totalorder %v3244_v17, 127 }
 0x122   :  { %v3334_v23 = vpop.permute.xlu2 %2755  ;;  %644 = vst [vmem:[#allocation2 + $0xc0] sm:$0xff] %v636_v59 }
 0x123   :  { %5222 = vst [vmem:[#allocation5_spill] sm:$0xff] %v3334_v23  ;;  %v3337_v63 = vpop.permute.xlu1 %2695  ;;  %v3340_v0 = vpop.permute.xlu0 %2680 }
 0x124   :  { %646 = vst [vmem:[#allocation2 + $0xd0] sm:$0xff] %v638_v62  ;;  %v5171_v3 = vunpack.i.h.bf16 %v3340_v0  ;;  %v5161_v4 = vunpack.i.l.bf16 %v3340_v0  ;;  %v5145_v30 = vunpack.i.h.bf16 %v3337_v63  ;;  %v5143_v42 = vunpack.i.l.bf16 %v3337_v63 }
 0x126   :  { %v892_v5 = vsel %vm5164_vm5, %v5171_v3, %v2688_v48  ;;  %v891_v6 = vsel %vm5164_vm5, %v5161_v4, %v2687_v52  ;;  %v5144_v48 = vunpack.i.l.bf16 %v3246_v18 }
 0x127   :  { %v911_v9 = vsel %vm284_vm7, %v892_v5, 0.0  ;;  %v907_v12 = vsel %vm284_vm7, %v891_v6, 0.0 }
 0x128   :  { %v923_v16 = vpack.c.bf16 %v908_v7, %v907_v12  ;;  %v925_v28 = vpack.c.bf16 %v912_v8, %v911_v9  ;;  %2905 = vrot.lane.b32.xlu2 %v3160_v38, %s2978_s19  ;;  %v5138_v7 = vunpack.i.h.bf16 %v3281_v31  ;;  %v5124_v8 = vunpack.i.l.bf16 %v3281_v31 }
 0x129   :  { %2940 = vrot.lane.b32.xlu1 %v3185_v10, %s2980_s21  ;;  %2925 = vrot.lane.b32.xlu0 %v3187_v11, %s2979_s20 }
 0x12a   :  { %931 = vst [vmem:[#allocation2 + $0x1c0] sm:$0xff] %v923_v16  ;;  %v3383_v36 = vpop.permute.xlu2 %2760 }
 0x12b   :  { %5227 = vst [vmem:[#allocation6_spill] sm:$0xff] %v3383_v36  ;;  %v2706_v40 = vpop.permute.xlu1 %2705  ;;  %v2691_v35 = vpop.permute.xlu0 %2690 }
 0x12c   :  { %933 = vst [vmem:[#allocation2 + $0x1d0] sm:$0xff] %v925_v28  ;;  %v2693_v46 = vunpack.i.h.bf16 %v2691_v35  ;;  %v2692_v47 = vunpack.i.l.bf16 %v2691_v35  ;;  %v2708_v54 = vunpack.i.h.bf16 %v2706_v40  ;;  %v2707_v59 = vunpack.i.l.bf16 %v2706_v40 }
 0x12e   :  { %v512_v52 = vsel %vm5119_vm12, %v2693_v46, %v5145_v30  ;;  %v511_v53 = vsel %vm5119_vm12, %v2692_v47, %v5143_v42  ;;  %v515_v57 = vsel %vm5119_vm12, %v5144_v48, %v2692_v47  ;;  %v516_v62 = vsel %vm5119_vm12, %v5146_v50, %v2693_v46  ;;  %vm3467_vm12 = vmand %vm284_vm7, %vm3288_vm3 }
 0x12f   :  { %v536_v55 = vsel %vm3393_vm13, %v512_v52, 0.0  ;;  %v531_v1 = vsel %vm3402_vm14, %v515_v57, 0.0  ;;  %v532_v2 = vsel %vm3393_vm13, %v511_v53, 0.0  ;;  %v535_v5 = vsel %vm3402_vm14, %v516_v62, 0.0 }
 0x130   :  { %2910 = vrot.lane.b32.xlu2 %v3187_v11, %s2977_s2  ;;  %v547_v6 = vpack.c.bf16 %v532_v2, %v531_v1  ;;  %v549_v9 = vpack.c.bf16 %v536_v55, %v535_v5  ;;  %v794_v46 = vsel %vm5121_vm15, %v2707_v59, %v5124_v8  ;;  %v795_v47 = vsel %vm5121_vm15, %v2708_v54, %v5138_v7 }
 0x131   :  { %2945 = vrot.lane.b32.xlu1 %v3187_v11, %s2981_s22  ;;  %2930 = vrot.lane.b32.xlu0 %v3160_v38, %s2980_s21  ;;  %v819_v2 = vsel %vm3446_vm0, %v794_v46, 0.0  ;;  %v823_v5 = vsel %vm3446_vm0, %v795_v47, 0.0 }
 0x132   :  { %v3440_v12 = vpop.permute.xlu2 %2765  ;;  %555 = vst [vmem:[#allocation2 + $0x80] sm:$0xff] %v547_v6 }
 0x133   :  { %v3450_v28 = vpop.permute.xlu1 %2715  ;;  %v3452_v40 = vpop.permute.xlu0 %2700  ;;  %v5147_v35 = vunpack.i.l.bf16 %v3440_v12  ;;  %557 = vst [vmem:[#allocation2 + $0x90] sm:$0xff] %v549_v9  ;;  %v3794_v20 = vld [vmem:[#allocation2 + $0x1d0] sm:$0xf0] }
 0x134   :  { %5234 = vst [vmem:[#allocation7_spill] sm:$0xff] %v3450_v28  ;;  %v5133_v53 = vunpack.i.h.bf16 %v3452_v40  ;;  %v5122_v55 = vunpack.i.l.bf16 %v3452_v40  ;;  %v5123_v47 = vunpack.i.h.bf16 %v3450_v28 }
 0x135   :  { %5235 = vst [vmem:[#allocation8_spill] sm:$0xff] %v3452_v40  ;;  %v3479_v57 = vsel %vm320_vm1, %v2667_v25, %v5147_v35 }
 0x136   :  { %5238 = vst [vmem:[#allocation9_spill] sm:$0xff] %v3479_v57  ;;  %v799_v62 = vsel %vm5121_vm15, %v5133_v53, %v2708_v54  ;;  %v798_v1 = vsel %vm5121_vm15, %v5122_v55, %v2707_v59  ;;  %vm5135_vm15 = vcmp.lt.s32.totalorder %v3244_v17, 16 }
 0x137   :  { %v822_v25 = vsel %vm3467_vm12, %v799_v62, 0.0  ;;  %v818_v6 = vsel %vm3467_vm12, %v798_v1, 0.0  ;;  %v5125_v62 = vunpack.i.l.bf16 %v3450_v28  ;;  %5264 = vst [vmem:[#allocation19_spill] sm:$0xff] %v3794_v20 }
 0x138   :  { %v834_v9 = vpack.c.bf16 %v819_v2, %v818_v6  ;;  %v836_v24 = vpack.c.bf16 %v823_v5, %v822_v25  ;;  %2915 = vrot.lane.b32.xlu2 %v3170_v58, %s2979_s20  ;;  %v5127_v5 = vunpack.i.l.bf16 %v3334_v23  ;;  %v5128_v25 = vunpack.i.h.bf16 %v3334_v23 }
 0x139   :  { %2950 = vrot.lane.b32.xlu1 %v3160_v38, %s2982_s23  ;;  %2935 = vrot.lane.b32.xlu0 %v3170_v58, %s2981_s22  ;;  %v3790_v60 = vld [vmem:[#allocation2 + $0x80] sm:$0xf]  ;;  %v2592_v16 = vld [vmem:[#allocation2 + $0x84] sm:$0xf] }
 0x13a   :  { %842 = vst [vmem:[#allocation2 + $0x180] sm:$0xff] %v834_v9  ;;  %v3503_v54 = vpop.permute.xlu2 %2770 }
 0x13b   :  { %844 = vst [vmem:[#allocation2 + $0x190] sm:$0xff] %v836_v24  ;;  %v2726_v59 = vpop.permute.xlu1 %2725  ;;  %v2711_v46 = vpop.permute.xlu0 %2710 }
 0x13c   :  { %v2713_v1 = vunpack.i.h.bf16 %v2711_v46  ;;  %v2712_v2 = vunpack.i.l.bf16 %v2711_v46  ;;  %v2728_v6 = vunpack.i.h.bf16 %v2726_v59  ;;  %v2727_v55 = vunpack.i.l.bf16 %v2726_v59 }
 0x13e   :  { %v423_v58 = vsel %vm5135_vm15, %v2713_v1, %v5123_v47  ;;  %v422_v24 = vsel %vm5135_vm15, %v2712_v2, %v5125_v62  ;;  %v426_v46 = vsel %vm5135_vm15, %v5127_v5, %v2712_v2  ;;  %v427_v47 = vsel %vm5135_vm15, %v5128_v25, %v2713_v1  ;;  %vm3606_vm15 = vmand %vm281_vm11, %vm3293_vm4 }
 0x13f   :  { %v443_v9 = vsel %vm281_vm11, %v423_v58, 0.0  ;;  %v438_v8 = vsel %vm280_vm10, %v426_v46, 0.0  ;;  %v439_v62 = vsel %vm281_vm11, %v422_v24, 0.0  ;;  %v442_v2 = vsel %vm280_vm10, %v427_v47, 0.0 }
 0x140   :  { %2955 = vrot.lane.b32.xlu2 %v3185_v10, %s2982_s23  ;;  %v454_v59 = vpack.c.bf16 %v439_v62, %v438_v8  ;;  %v5129_v1 = vunpack.i.h.bf16 %v3383_v36  ;;  %v5132_v58 = vunpack.i.l.bf16 %v3383_v36  ;;  %v456_v24 = vpack.c.bf16 %v443_v9, %v442_v2  ;;  %v1121_v2 = vld [vmem:[%s5116_s4 + $0x8] sm:$0xff] }
 0x141   :  { %2965 = vrot.lane.b32.xlu1 %v3185_v10, %s2983_s24  ;;  %306 = vrot.lane.b32.xlu0 %v3152_v33, %s2976_s1 }
 0x142   :  { %v3543_v46 = vpop.permute.xlu2 %2850  ;;  %462 = vst [vmem:[#allocation2 + $0x40] sm:$0xff] %v454_v59  ;;  %v705_v10 = vsel %vm5134_vm6, %v2727_v55, %v5132_v58  ;;  %v706_v33 = vsel %vm5134_vm6, %v2728_v6, %v5129_v1  ;;  %v1120_v59 = vld [vmem:[%s5116_s4] sm:$0xff]  ;;  %v3842_v40 = vld [vmem:[#allocation2 + $0x190] sm:$0xf0] }
 0x143   :  { %v3545_v5 = vpop.permute.xlu1 %2730  ;;  %v3547_v25 = vpop.permute.xlu0 %2720  ;;  %464 = vst [vmem:[#allocation2 + $0x50] sm:$0xff] %v456_v24  ;;  %v726_v24 = vsel %vm3374_vm8, %v705_v10, 0.0  ;;  %v730_v1 = vsel %vm3374_vm8, %v706_v33, 0.0  ;;  %v5136_v10 = vunpack.i.h.bf16 %v3440_v12  ;;  %v5152_v7 = vunpack.i.l.bf16 %v3543_v46 }
 0x144   :  { %5239 = vst [vmem:[#allocation10_spill] sm:$0xff] %v3545_v5  ;;  %v5130_v8 = vunpack.i.h.bf16 %v3547_v25  ;;  %v5131_v47 = vunpack.i.l.bf16 %v3547_v25 }
 0x145   :  { %5240 = vst [vmem:[#allocation11_spill] sm:$0xff] %v3547_v25 }
 0x146   :  { %v710_v62 = vsel %vm5134_vm6, %v5130_v8, %v2728_v6  ;;  %v709_v9 = vsel %vm5134_vm6, %v5131_v47, %v2727_v55  ;;  %v2772_v8 = vunpack.i.l.bf16 %v3503_v54  ;;  %vm3598_vm6 = vmand %vm280_vm10, %vm3288_vm3  ;;  %5274 = vst [vmem:[#allocation23_spill] sm:$0xff] %v3842_v40 }
 0x147   :  { %v729_v6 = vsel %vm3378_vm9, %v710_v62, 0.0  ;;  %v725_v55 = vsel %vm3378_vm9, %v709_v9, 0.0 }
 0x148   :  { %v741_v47 = vpack.c.bf16 %v726_v24, %v725_v55  ;;  %v743_v58 = vpack.c.bf16 %v730_v1, %v729_v6  ;;  %2960 = vrot.lane.b32.xlu2 %v3187_v11, %s2976_s1  ;;  %v335_v9 = vsel %vm320_vm1, %v5136_v10, %v2772_v8  ;;  %v2565_v11 = vld [vmem:[%s5117_s3 + $0x8] sm:$0xf0] }
 0x149   :  { %1135 = vperm.xlu1 %2658, %v1121_v2   ;;  %1130 = vperm.xlu0 %2657, %v1120_v59   ;;  %v1124_v2 = vld [vmem:[%s5116_s4 + $0x20] sm:$0xff]  ;;  %v1123_v59 = vld [vmem:[%s5116_s4 + $0x18] sm:$0xff]  ;;  %v357_v6 = vsel %vm3598_vm6, %v335_v9, 0.0 }
 0x14a   :  { %749 = vst [vmem:[#allocation2 + $0x140] sm:$0xff] %v741_v47  ;;  %v3585_v53 = vpop.permute.xlu2 %2855  ;;  %v3848_v31 = vld [vmem:[#allocation2 + $0x40] sm:$0xf]  ;;  %v3875_v57 = vld [vmem:[#allocation2 + $0x50] sm:$0xf0] }
 0x14b   :  { %751 = vst [vmem:[#allocation2 + $0x150] sm:$0xff] %v743_v58  ;;  %v3587_v33 = vpop.permute.xlu1 %2775  ;;  %v2781_v62 = vpop.permute.xlu0 %2780  ;;  %v5148_v50 = vunpack.i.h.bf16 %v3585_v53 }
 0x14c   :  { %5241 = vst [vmem:[#allocation12_spill] sm:$0xff] %v3587_v33  ;;  %v5137_v1 = vunpack.i.l.bf16 %v3587_v33  ;;  %v2783_v55 = vunpack.i.h.bf16 %v2781_v62  ;;  %v2782_v10 = vunpack.i.l.bf16 %v2781_v62 }
 0x14e   :  { %v331_v47 = vsel %vm320_vm1, %v2772_v8, %v5137_v1  ;;  %v5153_v1 = vunpack.i.h.bf16 %v3543_v46  ;;  %v610_v62 = vsel %vm5158_vm2, %v5152_v7, %v2782_v10 }
 0x14f   :  { %v358_v24 = vsel %vm3606_vm15, %v331_v47, 0.0  ;;  %v628_v41 = vsel %vm3288_vm3, %v610_v62, 0.0  ;;  %v5149_v62 = vunpack.i.l.bf16 %v3585_v53 }
 0x150   :  { %2970 = vrot.lane.b32.xlu2 %v3160_v38, %s2983_s24  ;;  %v369_v8 = vpack.c.bf16 %v358_v24, %v357_v6  ;;  %v611_v38 = vsel %vm5158_vm2, %v5153_v1, %v2783_v55  ;;  %v1127_v6 = vld [vmem:[%s5116_s4 + $0x38] sm:$0xff]  ;;  %v2324_v1 = vld [vmem:[#allocation2 + $0xc0] sm:$0xf] }
 0x151   :  { %1150 = vperm.xlu1 %2658, %v1124_v2   ;;  %1145 = vperm.xlu0 %2657, %v1123_v59   ;;  %v632_v37 = vsel %vm3288_vm3, %v611_v38, 0.0  ;;  %vm5247_vm3 = vcmp.ne.s32.totalorder %v3323_v56, 15 }
 0x152   :  { %v3628_v39 = vpop.permute.xlu2 %2860  ;;  %377 = vst [vmem:[#allocation2 + $0x20] sm:$0xff] %v369_v8  ;;  %v1126_v8 = vld [vmem:[%s5116_s4 + $0x30] sm:$0xff] }
 0x153   :  { %5246 = vst [vmem:[#allocation13_spill] sm:$0xff] %v3628_v39  ;;  %v3630_v44 = vpop.permute.xlu1 %2785  ;;  %v3632_v47 = vpop.permute.xlu0 %2790 }
 0x154   :  { %v5155_v9 = vunpack.i.h.bf16 %v3630_v44  ;;  %v5151_v2 = vunpack.i.l.bf16 %v3630_v44  ;;  %v5154_v35 = vunpack.i.h.bf16 %v3632_v47 }
 0x156   :  { %v606_v59 = vsel %vm5158_vm2, %v2782_v10, %v5151_v2  ;;  %v607_v24 = vsel %vm5158_vm2, %v2783_v55, %v5155_v9 }
 0x157   :  { %v629_v10 = vsel %vm3293_vm4, %v606_v59, 0.0  ;;  %v633_v55 = vsel %vm3293_vm4, %v607_v24, 0.0  ;;  %v5150_v59 = vunpack.i.l.bf16 %v3632_v47  ;;  %vm5248_vm4 = vmmov %vm5247_vm3 }
 0x158   :  { %v640_v42 = vpack.c.bf16 %v629_v10, %v628_v41  ;;  %v642_v48 = vpack.c.bf16 %v633_v55, %v632_v37  ;;  %v3673_v37 = vadd.s32 256, %v3244_v17 }
 0x159   :  { %1165 = vperm.xlu1 %2658, %v1127_v6   ;;  %1160 = vperm.xlu0 %2657, %v1126_v8  }
 0x15a   :  { %648 = vst [vmem:[#allocation2 + $0xe0] sm:$0xff] %v640_v42  ;;  %v3666_v30 = vpop.permute.xlu2 %2865 }
 0x15b   :  { %650 = vst [vmem:[#allocation2 + $0xf0] sm:$0xff] %v642_v48  ;;  %v2796_v43 = vpop.permute.xlu1 %2795  ;;  %v2801_v38 = vpop.permute.xlu0 %2800  ;;  %v5168_v29 = vunpack.i.l.bf16 %v3666_v30 }
 0x15c   :  { %v2798_v45 = vunpack.i.h.bf16 %v2796_v43  ;;  %v2797_v24 = vunpack.i.l.bf16 %v2796_v43 }
 0x15e   :  { %v889_v41 = vsel %vm5164_vm5, %v2797_v24, %v5149_v62  ;;  %v890_v42 = vsel %vm5164_vm5, %v2798_v45, %v5148_v50  ;;  %v893_v48 = vsel %vm5164_vm5, %v5150_v59, %v2797_v24  ;;  %v894_v6 = vsel %vm5164_vm5, %v5154_v35, %v2798_v45  ;;  %v2600_v45 = vld [vmem:[#allocation2 + $0xc4] sm:$0xf] }
 0x15f   :  { %v915_v8 = vsel %vm284_vm7, %v893_v48, 0.0  ;;  %v916_v10 = vsel %vm5247_vm3, %v889_v41, 0.0  ;;  %v919_v55 = vsel %vm284_vm7, %v894_v6, 0.0  ;;  %v920_v43 = vsel %vm5248_vm4, %v890_v42, 0.0 }
 0x160   :  { %v927_v50 = vpack.c.bf16 %v916_v10, %v915_v8  ;;  %v929_v62 = vpack.c.bf16 %v920_v43, %v919_v55  ;;  %v2803_v24 = vunpack.i.h.bf16 %v2801_v38  ;;  %v2802_v59 = vunpack.i.l.bf16 %v2801_v38  ;;  %v2602_v10 = vld [vmem:[#allocation2 + $0xcc] sm:$0xf0]  ;;  %v2326_v55 = vld [vmem:[#allocation2 + $0xd0] sm:$0xf0] }
 0x161   :  { %v2340_v2 = vld [vmem:[#allocation2 + $0xe0] sm:$0xf]  ;;  %v2604_v7 = vld [vmem:[#allocation2 + $0xe4] sm:$0xf]  ;;  %v5159_v35 = vunpack.i.h.bf16 %v3628_v39  ;;  %v5160_v48 = vunpack.i.l.bf16 %v3628_v39  ;;  %vm5250_vm3 = vcmp.lt.s32.totalorder %v3244_v17, 15 }
 0x162   :  { %935 = vst [vmem:[#allocation2 + $0x1e0] sm:$0xff] %v927_v50  ;;  %v3701_v41 = vpop.permute.xlu2 %2870  ;;  %v2606_v9 = vld [vmem:[#allocation2 + $0xec] sm:$0xf0]  ;;  %v2342_v6 = vld [vmem:[#allocation2 + $0xf0] sm:$0xf0]  ;;  %vm5251_vm4 = vmmov %vm5250_vm3 }
 0x163   :  { %5249 = vst [vmem:[#allocation14_spill] sm:$0xff] %v3701_v41  ;;  %v3703_v21 = vpop.permute.xlu1 %2805  ;;  %v3705_v42 = vpop.permute.xlu0 %2810  ;;  %v2341_v8 = vor.u32 %v2606_v9, %v2340_v2  ;;  %v2345_v38 = vor.u32 %v2604_v7, %v2342_v6  ;;  %v517_v43 = vsel %vm5250_vm3, %v5160_v48, %v2802_v59  ;;  %v518_v50 = vsel %vm5251_vm4, %v5159_v35, %v2803_v24  ;;  %vm5252_vm2 = vmmov %vm5250_vm3 }
 0x164   :  { %937 = vst [vmem:[#allocation2 + $0x1f0] sm:$0xff] %v929_v62  ;;  %v5165_v62 = vunpack.i.h.bf16 %v3703_v21  ;;  %v5162_v22 = vunpack.i.l.bf16 %v3703_v21  ;;  %v266_v7 = vshra.s32 %v3673_v37, 4  ;;  %vm5253_vm3 = vmmov %vm5252_vm2  ;;  %v2325_v6 = vor.u32 %v2602_v10, %v2324_v1 }
 0x165   :  { %1601 = vmatpush.bf16.msrb.mxu0 %v2341_v8  ;;  %1688 = vmatpush.bf16.msrb.mxu3 %v2345_v38  ;;  %v2329_v35 = vor.u32 %v2600_v45, %v2326_v55  ;;  %v539_v48 = vsel %vm3402_vm14, %v517_v43, 0.0  ;;  %v543_v8 = vsel %vm3402_vm14, %v518_v50, 0.0  ;;  %v5170_v45 = vand.u32 15, %v3673_v37  ;;  %v2634_v55 = vld [vmem:[#allocation2 + $0x1cc] sm:$0xf0] }
 0x166   :  { %v513_v9 = vsel %vm5252_vm2, %v2802_v59, %v5162_v22  ;;  %v514_v2 = vsel %vm5253_vm3, %v2803_v24, %v5165_v62  ;;  %v2452_v24 = vld [vmem:[#allocation2 + $0x1c0] sm:$0xf]  ;;  %v3734_v1 = vand.u32 15, %v266_v7  ;;  %v5166_v43 = vunpack.i.h.bf16 %v3666_v30 }
 0x167   :  { %v540_v38 = vsel %vm3393_vm13, %v513_v9, 0.0  ;;  %v544_v4 = vsel %vm3393_vm13, %v514_v2, 0.0  ;;  %v5169_v50 = vunpack.i.h.bf16 %v3705_v42  ;;  %v5167_v7 = vunpack.i.l.bf16 %v3705_v42 }
 0x168   :  { %v551_v59 = vpack.c.bf16 %v540_v38, %v539_v48  ;;  %v553_v22 = vpack.c.bf16 %v544_v4, %v543_v8  ;;  %vm3747_vm2 = vcmp.ne.s32.totalorder %v5170_v45, 0  ;;  %vm282_vm13 = vcmp.ne.s32.totalorder %v3734_v1, 0  ;;  %v3754_v38 = vld [vmem:[#allocation2 + $0x10c] sm:$0xf0] }
 0x169   :  { %1602 = vmatpush.bf16.msrb.mxu0 %v2325_v6  ;;  %1689 = vmatpush.bf16.msrb.mxu3 %v2329_v35  ;;  %v2468_v61 = vld [vmem:[#allocation2 + $0x1e0] sm:$0xf]  ;;  %v2453_v6 = vor.u32 %v2634_v55, %v2452_v24  ;;  %vm5257_vm14 = vcmp.lt.s32.totalorder %v3244_v17, 113  ;;  %v3772_v55 = vld [vmem:[#allocation2 + $0x12c] sm:$0xf0]  ;;  %v5269_v25 = vunpack.i.l.bf16 %v3701_v41 }
 0x16a   :  { %559 = vst [vmem:[#allocation2 + $0xa0] sm:$0xff] %v551_v59  ;;  %v3737_v10 = vpop.permute.xlu2 %2875  ;;  %vm5258_vm4 = vmmov %vm5257_vm14 }
 0x16b   :  { %5254 = vst [vmem:[#allocation15_spill] sm:$0xff] %v3737_v10  ;;  %v2638_v49 = vld [vmem:[#allocation2 + $0x1ec] sm:$0xf0]  ;;  %v2816_v48 = vpop.permute.xlu1 %2815  ;;  %v3741_v4 = vpop.permute.xlu0 %2820  ;;  %vm5259_vm3 = vmmov %vm5258_vm4 }
 0x16c   :  { %561 = vst [vmem:[#allocation2 + $0xb0] sm:$0xff] %v553_v22  ;;  %v2469_v35 = vor.u32 %v2638_v49, %v2468_v61  ;;  %v2818_v9 = vunpack.i.h.bf16 %v2816_v48  ;;  %v2817_v2 = vunpack.i.l.bf16 %v2816_v48  ;;  %v3752_v22 = vld [vmem:[#allocation2 + $0x120] sm:$0xf]  ;;  %vm5260_vm5 = vmmov %vm5259_vm3  ;;  %v3774_v48 = vld [vmem:[#allocation2 + $0x124] sm:$0xf]  ;;  %v2823_v45 = vunpack.i.h.bf16 %v3741_v4 }
 0x16d   :  { %5261 = vst [vmem:[#allocation16_spill] sm:$0xff] %v3774_v48  ;;  %v2822_v3 = vunpack.i.l.bf16 %v3741_v4 }
 0x16e   :  { %1630 = vmatpush.bf16.msrb.mxu1 %v2469_v35  ;;  %v796_v61 = vsel %vm5257_vm14, %v2817_v2, %v5168_v29  ;;  %v797_v59 = vsel %vm5258_vm4, %v2818_v9, %v5166_v43  ;;  %v800_v24 = vsel %vm5259_vm3, %v5167_v7, %v2817_v2  ;;  %v801_v49 = vsel %vm5260_vm5, %v5169_v50, %v2818_v9  ;;  %v3776_v35 = vld [vmem:[#allocation2 + $0x130] sm:$0xf0]  ;;  %v3786_v29 = vld [vmem:[#allocation2 + $0x100] sm:$0xf]  ;;  %vm3814_vm5 = vmand %vm282_vm13, %vm3747_vm2 }
 0x16f   :  { %5262 = vst [vmem:[#allocation17_spill] sm:$0xff] %v3776_v35  ;;  %v826_v62 = vsel %vm3467_vm12, %v800_v24, 0.0  ;;  %v827_v43 = vsel %vm3446_vm0, %v796_v61, 0.0  ;;  %v830_v2 = vsel %vm3467_vm12, %v801_v49, 0.0  ;;  %v831_v7 = vsel %vm3446_vm0, %v797_v59, 0.0 }
 0x170   :  { %v838_v9 = vpack.c.bf16 %v827_v43, %v826_v62  ;;  %v840_v50 = vpack.c.bf16 %v831_v7, %v830_v2  ;;  %v3792_v24 = vld [vmem:[#allocation2 + $0x1c4] sm:$0xf]  ;;  %v2594_v49 = vld [vmem:[#allocation2 + $0x8c] sm:$0xf0]  ;;  %v5265_v43 = vmov 0  ;;  %vm5270_vm12 = vcmp.lt.s32.totalorder %v3244_v17, 16 }
 0x171   :  { %5263 = vst [vmem:[#allocation18_spill] sm:$0xff] %v3792_v24  ;;  %v2308_v52 = vld [vmem:[#allocation2 + $0xa0] sm:$0xf]  ;;  %v2596_v61 = vld [vmem:[#allocation2 + $0xa4] sm:$0xf]  ;;  %v5266_v43 = vsel %vm3814_vm5, 4294967295, %v5265_v43  ;;  %v428_v36 = vsel %vm5270_vm12, %v5269_v25, %v2822_v3  ;;  %vm5272_vm0 = vmmov %vm5270_vm12  ;;  %v2293_v48 = vor.u32 %v2594_v49, %v3790_v60 }
 0x172   :  { %1631 = vmatpush.bf16.msrb.mxu1 %v2453_v6  ;;  %846 = vst [vmem:[#allocation2 + $0x1a0] sm:$0xff] %v838_v9  ;;  %v3808_v28 = vpop.permute.xlu2 %2880  ;;  %v2294_v2 = vld [vmem:[#allocation2 + $0x90] sm:$0xf0]  ;;  %v3823_v35 = vld [vmem:[#allocation2 + $0x180] sm:$0xf]  ;;  %v3846_v25 = vadd.s32 384, %v3244_v17  ;;  %vm5278_vm14 = vmmov %vm5272_vm0 }
 0x173   :  { %v2598_v59 = vld [vmem:[#allocation2 + $0xac] sm:$0xf0]  ;;  %v2310_v23 = vld [vmem:[#allocation2 + $0xb0] sm:$0xf0]  ;;  %5267 = vst [vmem:[#allocation20_spill] sm:$0xff] %v5266_v43  ;;  %v3819_v4 = vpop.permute.xlu1 %2825  ;;  %v3821_v7 = vpop.permute.xlu0 %2830  ;;  %vm5280_vm4 = vmmov %vm5272_vm0  ;;  %v2297_v43 = vor.u32 %v2592_v16, %v2294_v2 }
 0x174   :  { %848 = vst [vmem:[#allocation2 + $0x1b0] sm:$0xff] %v840_v50  ;;  %v2309_v9 = vor.u32 %v2598_v59, %v2308_v52  ;;  %v2313_v6 = vor.u32 %v2596_v61, %v2310_v23  ;;  %v5271_v50 = vunpack.i.h.bf16 %v3701_v41  ;;  %v3838_v61 = vld [vmem:[#allocation2 + $0x18c] sm:$0xf0]  ;;  %v3840_v59 = vld [vmem:[#allocation2 + $0x184] sm:$0xf]  ;;  %v5275_v41 = vunpack.i.h.bf16 %v3587_v33 }
 0x175   :  { %5268 = vst [vmem:[#allocation21_spill] sm:$0xff] %v3819_v4  ;;  %v5277_v49 = vunpack.i.l.bf16 %v3819_v4  ;;  %v5279_v39 = vunpack.i.h.bf16 %v3819_v4  ;;  %v3873_v23 = vld [vmem:[#allocation2 + $0x4c] sm:$0xf0]  ;;  %v3877_v33 = vld [vmem:[#allocation2 + $0x140] sm:$0xf]  ;;  %v2421_v2 = vor.u32 %v3838_v61, %v3823_v35 }
 0x176   :  { %v429_v62 = vsel %vm5272_vm0, %v5271_v50, %v2823_v45  ;;  %5273 = vst [vmem:[#allocation22_spill] sm:$0xff] %v3840_v59  ;;  %1603 = vmatpush.bf16.msrb.mxu0 %v2309_v9  ;;  %1690 = vmatpush.bf16.msrb.mxu3 %v2313_v6  ;;  %v3850_v50 = vld [vmem:[#allocation2 + $0x44] sm:$0xf]  ;;  %v5276_v6 = vunpack.i.h.bf16 %v3503_v54 }
 0x177   :  { %v424_v9 = vsel %vm5278_vm14, %v2822_v3, %v5277_v49  ;;  %v425_v52 = vsel %vm5280_vm4, %v2823_v45, %v5279_v39  ;;  %v3887_v39 = vld [vmem:[#allocation2 + $0x14c] sm:$0xf0]  ;;  %vm5215_vm14 = vcmp.ne.s32.totalorder %v3734_v1, 15  ;;  %vm3969_vm4 = vmand %vm284_vm7, %vm3378_vm9  ;;  %vm5299_vm7 = vcmp.ne.s32.totalorder %v3323_v56, 15 }
 0x178   :  { %v3863_v60 = vsel %vm320_vm1, %v5276_v6, %v5275_v41  ;;  %v446_v41 = vsel %vm280_vm10, %v428_v36, 0.0  ;;  %v450_v6 = vsel %vm280_vm10, %v429_v62, 0.0  ;;  %v447_v3 = vsel %vm281_vm11, %v424_v9, 0.0 }
 0x179   :  { %v451_v49 = vsel %vm281_vm11, %v425_v52, 0.0  ;;  %v458_v45 = vpack.c.bf16 %v447_v3, %v446_v41  ;;  %v2436_v52 = vld [vmem:[#allocation2 + $0x1a0] sm:$0xf]  ;;  %v267_v41 = vshra.s32 %v3846_v25, 4  ;;  %vm5213_vm10 = vcmp.lt.s32.totalorder %v3244_v17, 111 }
 0x17a   :  { %v460_v16 = vpack.c.bf16 %v451_v49, %v450_v6  ;;  %1604 = vmatpush.bf16.msrb.mxu0 %v2293_v48  ;;  %1691 = vmatpush.bf16.msrb.mxu3 %v2297_v43  ;;  %v3899_v6 = vld [vmem:[#allocation2 + $0x144] sm:$0xf]  ;;  %v3902_v35 = vpop.permute.xlu2 %2885  ;;  %v3910_v43 = vld [vmem:[#allocation2 + $0x150] sm:$0xf0]  ;;  %v5283_v48 = vunpack.i.h.bf16 %v3545_v5  ;;  %v5285_v3 = vunpack.i.l.bf16 %v3737_v10  ;;  %vm5286_vm11 = vcmp.lt.s32.totalorder %v3244_v17, 127 }
 0x17b   :  { %5281 = vst [vmem:[#allocation24_spill] sm:$0xff] %v3899_v6  ;;  %v2630_v61 = vld [vmem:[#allocation2 + $0x1ac] sm:$0xf0]  ;;  %v2836_v9 = vpop.permute.xlu1 %2835  ;;  %v3914_v62 = vpop.permute.xlu0 %2840  ;;  %v5202_v36 = vunpack.i.h.bf16 %v3902_v35  ;;  %vm5288_vm3 = vmmov %vm5286_vm11 }
 0x17c   :  { %466 = vst [vmem:[#allocation2 + $0x60] sm:$0xff] %v458_v45  ;;  %v2437_v40 = vor.u32 %v2630_v61, %v2436_v52  ;;  %v2838_v59 = vunpack.i.h.bf16 %v2836_v9  ;;  %v2837_v20 = vunpack.i.l.bf16 %v2836_v9  ;;  %v3928_v45 = vand.u32 15, %v267_v41  ;;  %v3930_v52 = vld [vmem:[#allocation2 + $0x1e4] sm:$0xf]  ;;  %v3932_v61 = vld [vmem:[#allocation2 + $0x1f0] sm:$0xf0]  ;;  %vm5290_vm12 = vmmov %vm5288_vm3 }
 0x17d   :  { %5282 = vst [vmem:[#allocation25_spill] sm:$0xff] %v3910_v43  ;;  %v3925_v4 = vsel %vm5213_vm10, %v5283_v48, %v5202_v36  ;;  %v5287_v48 = vunpack.i.h.bf16 %v3737_v10  ;;  %vm5292_vm0 = vmmov %vm5288_vm3  ;;  %v3953_v43 = vld [vmem:[#allocation2 + $0x1a4] sm:$0xf] }
 0x17e   :  { %468 = vst [vmem:[#allocation2 + $0x70] sm:$0xff] %v460_v16  ;;  %1632 = vmatpush.bf16.msrb.mxu1 %v2437_v40  ;;  %v707_v49 = vsel %vm5286_vm11, %v2837_v20, %v5285_v3  ;;  %v5289_v40 = vunpack.i.l.bf16 %v3821_v7  ;;  %v5291_v16 = vunpack.i.h.bf16 %v3821_v7  ;;  %v3955_v3 = vld [vmem:[#allocation2 + $0x1b0] sm:$0xf0]  ;;  %vm5214_vm11 = vcmp.ne.s32.totalorder %v3928_v45, 15 }
 0x17f   :  { %5284 = vst [vmem:[#allocation26_spill] sm:$0xff] %v3932_v61  ;;  %v708_v36 = vsel %vm5288_vm3, %v2838_v59, %v5287_v48  ;;  %v734_v48 = vsel %vm3374_vm8, %v707_v49, 0.0  ;;  %v5302_v61 = vunpack.i.h.bf16 %v3238_v15  ;;  %vm5303_vm3 = vcmp.lt.s32.totalorder %v3244_v17, 112 }
 0x180   :  { %v711_v41 = vsel %vm5290_vm12, %v5289_v40, %v2837_v20  ;;  %v712_v9 = vsel %vm5292_vm0, %v5291_v16, %v2838_v59  ;;  %5293 = vst [vmem:[#allocation27_spill] sm:$0xff] %v3953_v43  ;;  %v738_v40 = vsel %vm3374_vm8, %v708_v36, 0.0  ;;  %vm5305_vm12 = vmmov %vm5303_vm3  ;;  %v5312_v15 = vunpack.i.l.bf16 %v3914_v62 }
 0x181   :  { %5294 = vst [vmem:[#allocation28_spill] sm:$0xff] %v3955_v3  ;;  %v733_v6 = vsel %vm3378_vm9, %v711_v41, 0.0  ;;  %v737_v20 = vsel %vm3378_vm9, %v712_v9, 0.0  ;;  %vm4000_vm9 = vmand %vm5299_vm7, %vm3374_vm8 }
 0x182   :  { %v745_v41 = vpack.c.bf16 %v734_v48, %v733_v6  ;;  %v747_v24 = vpack.c.bf16 %v738_v40, %v737_v20  ;;  %1633 = vmatpush.bf16.msrb.mxu1 %v2421_v2  ;;  %v5297_v2 = vunpack.i.l.bf16 %v3902_v35  ;;  %v5298_v20 = vunpack.i.l.bf16 %v3545_v5  ;;  %v2906_v49 = vpop.permute.xlu2 %2905  ;;  %vm5307_vm8 = vmmov %vm5303_vm3 }
 0x183   :  { %v2276_v36 = vld [vmem:[#allocation2 + $0x60] sm:$0xf]  ;;  %v2588_v34 = vld [vmem:[#allocation2 + $0x64] sm:$0xf]  ;;  %v3994_v16 = vpop.permute.xlu0 %2890  ;;  %v2908_v6 = vunpack.i.h.bf16 %v2906_v49  ;;  %v2907_v9 = vunpack.i.l.bf16 %v2906_v49  ;;  %vm5309_vm0 = vmmov %vm5303_vm3  ;;  %v5342_v48 = vsel %vm3969_vm4, %v3925_v4, 0.0 }
 0x184   :  { %753 = vst [vmem:[#allocation2 + $0x160] sm:$0xff] %v745_v41  ;;  %v3992_v40 = vsel %vm5213_vm10, %v5298_v20, %v5297_v2  ;;  %v2846_v41 = vpop.permute.xlu1 %2845  ;;  %v2893_v5 = vunpack.i.h.bf16 %v3994_v16 }
 0x185   :  { %v2590_v51 = vld [vmem:[#allocation2 + $0x6c] sm:$0xf0]  ;;  %v2278_v10 = vld [vmem:[#allocation2 + $0x70] sm:$0xf0]  ;;  %755 = vst [vmem:[#allocation2 + $0x170] sm:$0xff] %v747_v24  ;;  %v2848_v2 = vunpack.i.h.bf16 %v2846_v41  ;;  %v2847_v20 = vunpack.i.l.bf16 %v2846_v41  ;;  %v884_v49 = vsel %vm5303_vm3, %v5302_v61, %v2908_v6  ;;  %v5310_v41 = vunpack.i.l.bf16 %v3808_v28 }
 0x186   :  { %v2277_v3 = vor.u32 %v2590_v51, %v2276_v36  ;;  %v2281_v43 = vor.u32 %v2588_v34, %v2278_v10  ;;  %v5304_v10 = vunpack.i.h.bf16 %v3340_v0  ;;  %v883_v36 = vsel %vm5307_vm8, %v5306_v32, %v2907_v9 }
 0x187   :  { %v5308_v34 = vunpack.i.l.bf16 %v3340_v0  ;;  %v978_v61 = vsel %vm5213_vm10, %v2847_v20, %v5310_v41  ;;  %v5311_v24 = vunpack.i.h.bf16 %v3808_v28  ;;  %v5313_v0 = vunpack.i.h.bf16 %v3914_v62 }
 0x188   :  { %v896_v56 = vsel %vm5305_vm12, %v2908_v6, %v5304_v10  ;;  %1605 = vmatpush.bf16.msrb.mxu0 %v2277_v3  ;;  %v982_v10 = vsel %vm5213_vm10, %v5312_v15, %v2847_v20  ;;  %1692 = vmatpush.bf16.msrb.mxu3 %v2281_v43  ;;  %v1009_v32 = vsel %vm4000_vm9, %v978_v61, 0.0  ;;  %v5314_v20 = vand.u32 15, %v3846_v25 }
 0x189   :  { %v895_v51 = vsel %vm5309_vm0, %v2907_v9, %v5308_v34  ;;  %v979_v6 = vsel %vm5213_vm10, %v2848_v2, %v5311_v24  ;;  %v983_v3 = vsel %vm5213_vm10, %v5313_v0, %v2848_v2  ;;  %v1008_v9 = vsel %vm3969_vm4, %v982_v10, 0.0 }
 0x18a   :  { %v1012_v24 = vsel %vm3969_vm4, %v983_v3, 0.0  ;;  %v1013_v34 = vsel %vm4000_vm9, %v979_v6, 0.0  ;;  %vm4048_vm7 = vcmp.ne.s32.totalorder %v5314_v20, 0  ;;  %v1000_v43 = vsel %vm3969_vm4, %v3992_v40, 0.0 }
 0x18b   :  { %v1020_v2 = vpack.c.bf16 %v1009_v32, %v1008_v9  ;;  %v1022_v15 = vpack.c.bf16 %v1013_v34, %v1012_v24  ;;  %v5317_v61 = vunpack.i.l.bf16 %v3226_v13  ;;  %v5318_v6 = vunpack.i.h.bf16 %v3503_v54  ;;  %v2404_v24 = vld [vmem:[#allocation2 + $0x160] sm:$0xf] }
 0x18c   :  { %v5319_v0 = vunpack.i.l.bf16 %v3994_v16  ;;  %v913_v20 = vsel %vm5215_vm14, %v884_v49, 0.0  ;;  %v914_v40 = vsel %vm5214_vm11, %v896_v56, 0.0  ;;  %v909_v9 = vsel %vm5215_vm14, %v883_v36, 0.0  ;;  %v2911_v36 = vpop.permute.xlu2 %2910 }
 0x18d   :  { %v333_v10 = vsel %vm320_vm1, %v2893_v5, %v5317_v61  ;;  %v5320_v32 = vor.u32 %v3873_v23, %v3848_v31  ;;  %1028 = vst [vmem:[#allocation2 + $0x220] sm:$0xff] %v1020_v2  ;;  %v926_v54 = vpack.c.bf16 %v914_v40, %v913_v20  ;;  %v910_v34 = vsel %vm5214_vm11, %v895_v51, 0.0  ;;  %v4085_v23 = vpop.permute.xlu1 %314 }
 0x18e   :  { %v336_v3 = vsel %vm320_vm1, %v5319_v0, %v5318_v6  ;;  %v5321_v61 = vor.u32 %v3850_v50, %v3875_v57  ;;  %v349_v49 = vsel %vm3598_vm6, %v333_v10, 0.0  ;;  %v2622_v6 = vld [vmem:[#allocation2 + $0x16c] sm:$0xf0]  ;;  %1030 = vst [vmem:[#allocation2 + $0x230] sm:$0xff] %v1022_v15  ;;  %v924_v31 = vpack.c.bf16 %v910_v34, %v909_v9  ;;  %v4095_v10 = vpop.permute.xlu0 %2895 }
 0x18f   :  { %1606 = vmatpush.bf16.msrb.mxu0 %v5320_v32  ;;  %v361_v56 = vsel %vm3598_vm6, %v336_v3, 0.0  ;;  %v5322_v51 = vsel %vm3606_vm15, %v3263_v26, 0.0  ;;  %v5323_v57 = vsel %vm3606_vm15, %v3863_v60, 0.0  ;;  %v2913_v0 = vunpack.i.h.bf16 %v2911_v36  ;;  %934 = vst [vmem:[#allocation2 + $0x1d8] sm:$0xff] %v926_v54  ;;  %v2564_v54 = vld [vmem:[%s5117_s3 + $0x4] sm:$0xf] }
 0x190   :  { %1693 = vmatpush.bf16.msrb.mxu3 %v5321_v61  ;;  %v365_v2 = vpack.c.bf16 %v5322_v51, %v349_v49  ;;  %v371_v50 = vpack.c.bf16 %v5323_v57, %v361_v56  ;;  %v5324_v3 = vand.u32 15, %v3673_v37  ;;  %v5327_v20 = vunpack.i.h.bf16 %v3226_v13  ;;  %v2182_v13 = vld [vmem:[%s5117_s3 + $0xc] sm:$0xf0]  ;;  %932 = vst [vmem:[#allocation2 + $0x1c8] sm:$0xff] %v924_v31  ;;  %v2180_v51 = vld [vmem:[%s5117_s3] sm:$0xf] }
 0x191   :  { %v2898_v40 = vunpack.i.h.bf16 %v4095_v10  ;;  %v2897_v60 = vunpack.i.l.bf16 %v4095_v10  ;;  %v2912_v9 = vunpack.i.l.bf16 %v2911_v36  ;;  %v5328_v32 = vand.u32 15, %v3846_v25  ;;  %v2188_v31 = vld [vmem:[%s5117_s3 + $0x8] sm:$0xf]  ;;  %v2200_v37 = vld [vmem:[%s5117_s3 + $0x20] sm:$0xf]  ;;  %v5476_v10 = vld [vmem:[#allocation25_spill] sm:$0xff] }
 0x192   :  { %vm4099_vm3 = vcmp.ne.s32.totalorder %v5324_v3, 15  ;;  %v334_v26 = vsel %vm320_vm1, %v4085_v23, %v5327_v20  ;;  %v5331_v61 = vunpack.i.h.bf16 %v3630_v44  ;;  %vm5332_vm8 = vcmp.lt.s32.totalorder %v3244_v17, 1  ;;  %373 = vst [vmem:[#allocation2] sm:$0xff] %v365_v2  ;;  %v4163_v2 = vld [vmem:[#allocation2 + $0x164] sm:$0xf] }
 0x193   :  { %vm4112_vm12 = vcmp.ne.s32.totalorder %v5328_v32, 15  ;;  %v353_v34 = vsel %vm3598_vm6, %v334_v26, 0.0  ;;  %v5333_v49 = vunpack.i.h.bf16 %v3543_v46  ;;  %vm5334_vm0 = vmmov %vm5332_vm8  ;;  %v2405_v36 = vor.u32 %v2622_v6, %v2404_v24  ;;  %379 = vst [vmem:[#allocation2 + $0x30] sm:$0xff] %v371_v50 }
 0x194   :  { %v603_v25 = vsel %vm5332_vm8, %v5331_v61, %v2913_v0  ;;  %v5335_v57 = vsel %vm3606_vm15, %v3271_v27, 0.0  ;;  %v5336_v24 = vunpack.i.l.bf16 %v3902_v35  ;;  %vm283_vm6 = vcmp.ne.s32.totalorder %v3928_v45, 0  ;;  %v2566_v27 = vld [vmem:[%s5117_s3 + $0x10] sm:$0xf0]  ;;  %vm5339_vm15 = vmmov %vm5334_vm0  ;;  %v2500_v4 = vld [vmem:[#allocation2 + $0x220] sm:$0xf] }
 0x195   :  { %v599_v56 = vsel %vm5334_vm0, %v2913_v0, %v5333_v49  ;;  %v367_v3 = vpack.c.bf16 %v5335_v57, %v353_v34  ;;  %v5337_v0 = vunpack.i.h.bf16 %v3902_v35  ;;  %v634_v58 = vsel %vm3747_vm2, %v603_v25, 0.0  ;;  %vm5341_vm8 = vmmov %vm5334_vm0  ;;  %1634 = vmatpush.bf16.msrb.mxu1 %v2405_v36  ;;  %v4177_v49 = vld [vmem:[#allocation2 + $0x170] sm:$0xf0]  ;;  %v4197_v36 = vld [vmem:[#allocation2 + $0x224] sm:$0xf] }
 0x196   :  { %v976_v6 = vsel %vm5213_vm10, %v5336_v24, %v2897_v60  ;;  %v5338_v32 = vunpack.i.l.bf16 %v3543_v46  ;;  %v5340_v61 = vunpack.i.l.bf16 %v3630_v44  ;;  %v5343_v44 = vunpack.i.l.bf16 %v3440_v12 }
 0x197   :  { %v977_v20 = vsel %vm5213_vm10, %v5337_v0, %v2898_v40  ;;  %v1001_v26 = vsel %vm4000_vm9, %v976_v6, 0.0  ;;  %375 = vst [vmem:[#allocation2 + $0x10] sm:$0xff] %v367_v3  ;;  %v635_v59 = vsel %vm4048_vm7, %v599_v56, 0.0  ;;  %v4199_v3 = vor.u32 %v2564_v54, %v2182_v13  ;;  %v2916_v0 = vpop.permute.xlu2 %2915  ;;  %v2901_v54 = vpop.permute.xlu1 %2900 }
 0x198   :  { %v1005_v35 = vsel %vm4000_vm9, %v977_v20, 0.0  ;;  %v598_v34 = vsel %vm5339_vm15, %v2912_v9, %v5338_v32  ;;  %v602_v25 = vsel %vm5341_vm8, %v5340_v61, %v2912_v9  ;;  %v1016_v50 = vpack.c.bf16 %v1001_v26, %v1000_v43  ;;  %v2646_v20 = vld [vmem:[#allocation2 + $0x22c] sm:$0xf0]  ;;  %v4201_v26 = vld [vmem:[#allocation2 + $0x230] sm:$0xf0]  ;;  %v2921_v13 = vpop.permute.xlu0 %2920 }
 0x199   :  { %v1018_v57 = vpack.c.bf16 %v1005_v35, %v5342_v48  ;;  %v630_v46 = vsel %vm3747_vm2, %v602_v25, 0.0  ;;  %v631_v24 = vsel %vm4048_vm7, %v598_v34, 0.0  ;;  %v4193_v9 = vsel %vm320_vm1, %v5343_v44, %v2893_v5 }
 0x19a   :  { %v641_v43 = vpack.c.bf16 %v631_v24, %v630_v46  ;;  %1024 = vst [vmem:[#allocation2 + $0x200] sm:$0xff] %v1016_v50  ;;  %v643_v6 = vpack.c.bf16 %v635_v59, %v634_v58  ;;  %v4203_v35 = vor.u32 %v2565_v11, %v2180_v51  ;;  %v4205_v32 = vor.u32 %v2566_v27, %v2188_v31 }
 0x19b   :  { %v2409_v5 = vor.u32 %v4163_v2, %v4177_v49  ;;  %1026 = vst [vmem:[#allocation2 + $0x210] sm:$0xff] %v1018_v57  ;;  %v5344_v56 = vor.u32 %v3887_v39, %v3877_v33  ;;  %v2918_v34 = vunpack.i.h.bf16 %v2916_v0  ;;  %v2917_v58 = vunpack.i.l.bf16 %v2916_v0  ;;  %v2206_v49 = vld [vmem:[%s5117_s3 + $0x3c] sm:$0xf0] }
 0x19c   :  { %v2501_v61 = vor.u32 %v2646_v20, %v2500_v4  ;;  %v2505_v25 = vor.u32 %v4197_v36, %v4201_v26  ;;  %649 = vst [vmem:[#allocation2 + $0xe8] sm:$0xff] %v641_v43  ;;  %v2903_v51 = vunpack.i.h.bf16 %v2901_v54  ;;  %v2902_v11 = vunpack.i.l.bf16 %v2901_v54 }
 0x19d   :  { %1635 = vmatpush.bf16.msrb.mxu1 %v5344_v56  ;;  %v2923_v31 = vunpack.i.h.bf16 %v2921_v13  ;;  %v2922_v27 = vunpack.i.l.bf16 %v2921_v13  ;;  %651 = vst [vmem:[#allocation2 + $0xf8] sm:$0xff] %v643_v6  ;;  %v5345_v50 = vunpack.i.h.bf16 %v3246_v18  ;;  %vm5346_vm4 = vcmp.lt.s32.totalorder %v3244_v17, 15 }
 0x19e   :  { %v5347_v39 = vunpack.i.h.bf16 %v3337_v63  ;;  %vm5348_vm9 = vmmov %vm5346_vm4  ;;  %v5349_v57 = vunpack.i.l.bf16 %v3246_v18  ;;  %v5351_v24 = vunpack.i.l.bf16 %v3337_v63  ;;  %v5353_v59 = vunpack.i.h.bf16 %v3248_v19  ;;  %1665 = vmatpush.bf16.msrb.mxu2 %v2501_v61 }
 0x19f   :  { %v504_v33 = vsel %vm5346_vm4, %v2918_v34, %v5345_v50  ;;  %vm5350_vm0 = vmmov %vm5346_vm4  ;;  %v5354_v4 = vunpack.i.l.bf16 %v3232_v14  ;;  %v5356_v18 = vunpack.i.h.bf16 %v3232_v14  ;;  %v5358_v63 = vunpack.i.l.bf16 %v3248_v19 }
 0x1a0   :  { %v508_v48 = vsel %vm5348_vm9, %v5347_v39, %v2918_v34  ;;  %v503_v46 = vsel %vm5350_vm0, %v2917_v58, %v5349_v57  ;;  %vm5352_vm15 = vmmov %vm5350_vm0  ;;  %v601_v43 = vsel %vm5341_vm8, %v5353_v59, %v2903_v51  ;;  %v5364_v13 = vor.u32 %v3772_v55, %v3752_v22  ;;  %v2582_v39 = vld [vmem:[#allocation2 + $0x2c] sm:$0xf0]  ;;  %v2246_v57 = vld [vmem:[#allocation2 + $0x30] sm:$0xf0] }
 0x1a1   :  { %v507_v44 = vsel %vm5352_vm15, %v5351_v24, %v2917_v58  ;;  %vm5355_vm4 = vmmov %vm5341_vm8  ;;  %v626_v14 = vsel %vm3747_vm2, %v601_v43, 0.0  ;;  %v5365_v61 = vunpack.i.l.bf16 %v3585_v53  ;;  %v5369_v24 = vunpack.i.l.bf16 %v3632_v47 }
 0x1a2   :  { %v596_v36 = vsel %vm5355_vm4, %v2902_v11, %v5354_v4  ;;  %vm5357_vm9 = vmmov %vm5355_vm4  ;;  %1636 = vmatpush.bf16.msrb.mxu1 %v5364_v13  ;;  %v5371_v55 = vunpack.i.h.bf16 %v3632_v47  ;;  %v2244_v4 = vld [vmem:[#allocation2 + $0x20] sm:$0xf]  ;;  %v5373_v13 = vor.u32 %v3754_v38, %v3786_v29 }
 0x1a3   :  { %v597_v6 = vsel %vm5357_vm9, %v2903_v51, %v5356_v18  ;;  %vm5359_vm0 = vmmov %vm5355_vm4  ;;  %v623_v19 = vsel %vm4048_vm7, %v596_v36, 0.0  ;;  %vm5366_vm4 = vcmp.lt.s32.totalorder %v3244_v17, 112  ;;  %v2578_v36 = vld [vmem:[#allocation2 + $0xc] sm:$0xf0]  ;;  %v2230_v18 = vld [vmem:[#allocation2 + $0x10] sm:$0xf0] }
 0x1a4   :  { %v600_v0 = vsel %vm5359_vm0, %v5358_v63, %v2902_v11  ;;  %vm4250_vm15 = vmand %vm282_vm13, %vm4099_vm3  ;;  %v627_v56 = vsel %vm4048_vm7, %v597_v6, 0.0  ;;  %v885_v51 = vsel %vm5366_vm4, %v5365_v61, %v2922_v27  ;;  %v5367_v11 = vunpack.i.h.bf16 %v3585_v53  ;;  %v4301_v63 = vpop.permute.xlu2 %2955  ;;  %v2941_v61 = vpop.permute.xlu1 %2940 }
 0x1a5   :  { %v622_v26 = vsel %vm3747_vm2, %v600_v0, 0.0  ;;  %vm4266_vm8 = vmand %vm283_vm6, %vm4112_vm12  ;;  %v639_v58 = vpack.c.bf16 %v627_v56, %v626_v14  ;;  %v917_v43 = vsel %vm5215_vm14, %v885_v51, 0.0  ;;  %v537_v47 = vsel %vm4250_vm15, %v508_v48, 0.0  ;;  %v2580_v56 = vld [vmem:[#allocation2 + $0x24] sm:$0xf]  ;;  %v2926_v48 = vpop.permute.xlu0 %2925 }
 0x1a6   :  { %v637_v34 = vpack.c.bf16 %v623_v19, %v622_v26  ;;  %vm5368_vm9 = vmmov %vm5366_vm4  ;;  %v533_v19 = vsel %vm4250_vm15, %v507_v44, 0.0  ;;  %1637 = vmatpush.bf16.msrb.mxu1 %v5373_v13  ;;  %v2245_v51 = vor.u32 %v2582_v39, %v2244_v4  ;;  %v2942_v39 = vunpack.i.l.bf16 %v2941_v61  ;;  %v2484_v13 = vld [vmem:[#allocation2 + $0x200] sm:$0xf] }
 0x1a7   :  { %v886_v50 = vsel %vm5368_vm9, %v5367_v11, %v2923_v31  ;;  %vm5370_vm0 = vmmov %vm5366_vm4  ;;  %647 = vst [vmem:[#allocation2 + $0xd8] sm:$0xff] %v639_v58  ;;  %v2249_v11 = vor.u32 %v2580_v56, %v2246_v57  ;;  %v2928_v8 = vunpack.i.h.bf16 %v2926_v48  ;;  %v2927_v57 = vunpack.i.l.bf16 %v2926_v48 }
 0x1a8   :  { %v897_v22 = vsel %vm5370_vm0, %v2922_v27, %v5369_v24  ;;  %vm5372_vm10 = vmmov %vm5370_vm0  ;;  %v921_v53 = vsel %vm5215_vm14, %v886_v50, 0.0  ;;  %645 = vst [vmem:[#allocation2 + $0xc8] sm:$0xff] %v637_v34  ;;  %v2228_v34 = vld [vmem:[#allocation2] sm:$0xf]  ;;  %v2576_v50 = vld [vmem:[#allocation2 + $0x4] sm:$0xf]  ;;  %1607 = vmatpush.bf16.msrb.mxu0 %v2245_v51  ;;  %v2958_v24 = vunpack.i.h.bf16 %v4301_v63  ;;  %v5382_v4 = vunpack.i.l.bf16 %v3705_v42 }
 0x1a9   :  { %v898_v59 = vsel %vm5372_vm10, %v2923_v31, %v5371_v55  ;;  %v918_v6 = vsel %vm5214_vm11, %v897_v22, 0.0  ;;  %v538_v31 = vsel %vm4266_vm8, %v504_v33, 0.0  ;;  %v534_v33 = vsel %vm4266_vm8, %v503_v46, 0.0  ;;  %vm4314_vm10 = vmand %vm5215_vm14, %vm3747_vm2  ;;  %1694 = vmatpush.bf16.msrb.mxu3 %v2249_v11  ;;  %1638 = vmatmul.bf16.vlgmr.msrb.gmra.mxu1 %v4199_v3 }
 0x1aa   :  { %v922_v27 = vsel %vm5214_vm11, %v898_v59, 0.0  ;;  %v928_v0 = vpack.c.bf16 %v918_v6, %v917_v43  ;;  %v550_v26 = vpack.c.bf16 %v538_v31, %v537_v47  ;;  %1752 = vmatpush.bf16.msra.mxu1 %v2505_v25  ;;  %v2229_v58 = vor.u32 %v2578_v36, %v2228_v34  ;;  %vm4322_vm4 = vmand %vm5214_vm11, %vm4048_vm7  ;;  %v2642_v34 = vld [vmem:[#allocation2 + $0x20c] sm:$0xf0] }
 0x1ab   :  { %v930_v14 = vpack.c.bf16 %v922_v27, %v921_v53  ;;  %v548_v29 = vpack.c.bf16 %v534_v33, %v533_v19  ;;  %v2233_v38 = vor.u32 %v2576_v50, %v2230_v18  ;;  %v2943_v25 = vunpack.i.h.bf16 %v2941_v61  ;;  %v2640_v61 = vld [vmem:[#allocation2 + $0x204] sm:$0xf] }
 0x1ac   :  { %936 = vst [vmem:[#allocation2 + $0x1e8] sm:$0xff] %v928_v0  ;;  %v2957_v22 = vunpack.i.l.bf16 %v4301_v63  ;;  %v5378_v55 = vunpack.i.l.bf16 %v3666_v30  ;;  %vm5379_vm2 = vcmp.lt.s32.totalorder %v3244_v17, 113  ;;  %v5380_v43 = vunpack.i.h.bf16 %v3666_v30  ;;  %1608 = vmatpush.bf16.msrb.mxu0 %v2229_v58  ;;  %v2946_v20 = vpop.permute.xlu1 %2945 }
 0x1ad   :  { %938 = vst [vmem:[#allocation2 + $0x1f8] sm:$0xff] %v930_v14  ;;  %vm5381_vm9 = vmmov %vm5379_vm2  ;;  %v5384_v18 = vunpack.i.h.bf16 %v3705_v42  ;;  %vm1588_vm14 = vcmask 261120   ;;  %v5386_v0 = vunpack.i.h.bf16 %v3703_v21  ;;  %1695 = vmatpush.bf16.msrb.mxu3 %v2233_v38  ;;  %v5393_v11 = vunpack.i.l.bf16 %v3703_v21 }
 0x1ae   :  { %558 = vst [vmem:[#allocation2 + $0x98] sm:$0xff] %v550_v26  ;;  %v792_v59 = vsel %vm5379_vm2, %v5378_v55, %v2942_v39  ;;  %v793_v53 = vsel %vm5381_vm9, %v5380_v43, %v2943_v25  ;;  %vm5383_vm0 = vmmov %vm5379_vm2  ;;  %v5388_v26 = vld [vmem:[#allocation13_spill] sm:$0xff]  ;;  %v5395_v55 = vunpack.i.h.bf16 %v3821_v7  ;;  %v5400_v43 = vld [vmem:[#allocation26_spill] sm:$0xff] }
 0x1af   :  { %v804_v36 = vsel %vm5383_vm0, %v2942_v39, %v5382_v4  ;;  %vm5385_vm11 = vmmov %vm5383_vm0  ;;  %556 = vst [vmem:[#allocation2 + $0x88] sm:$0xff] %v548_v29  ;;  %v828_v27 = vsel %vm4314_vm10, %v792_v59, 0.0  ;;  %v832_v47 = vsel %vm4314_vm10, %v793_v53, 0.0  ;;  %v5389_v19 = vunpack.i.l.bf16 %v5388_v26  ;;  %v2348_v39 = vld [vmem:[#allocation2 + $0xe8] sm:$0xf]  ;;  %1609 = vmatmul.bf16.vlgmr.msrb.gmra.mxu0 %v4203_v35 }
 0x1b0   :  { %v805_v6 = vsel %vm5385_vm11, %v2943_v25, %v5384_v18  ;;  %v829_v30 = vsel %vm4322_vm4, %v804_v36, 0.0  ;;  %vm5387_vm11 = vcmp.lt.s32.totalorder %v3244_v17, 15  ;;  %v5391_v33 = vunpack.i.h.bf16 %v5388_v26  ;;  %v2486_v25 = vld [vmem:[#allocation2 + $0x210] sm:$0xf0]  ;;  %v2607_v4 = vld [vmem:[#allocation2 + $0xf4] sm:$0xf0]  ;;  %v4388_v36 = vpop.permute.xlu0 %2930  ;;  %1696 = vmatmul.bf16.vlgmr.msrb.gmra.mxu3 %v4203_v35 }
 0x1b1   :  { %v833_v31 = vsel %vm4322_vm4, %v805_v6, 0.0  ;;  %v839_v42 = vpack.c.bf16 %v829_v30, %v828_v27  ;;  %v510_v14 = vsel %vm5387_vm11, %v5386_v0, %v2928_v8  ;;  %vm5390_vm2 = vmmov %vm5387_vm11  ;;  %vm5396_vm11 = vcmp.lt.s32.totalorder %v3244_v17, 127 }
 0x1b2   :  { %v841_v63 = vpack.c.bf16 %v833_v31, %v832_v47  ;;  %v505_v56 = vsel %vm5390_vm2, %v2927_v57, %v5389_v19  ;;  %v545_v48 = vsel %vm4250_vm15, %v510_v14, 0.0  ;;  %vm5392_vm9 = vmmov %vm5390_vm2  ;;  %v716_v21 = vsel %vm5396_vm11, %v2958_v24, %v5395_v55  ;;  %v2605_v47 = vld [vmem:[#allocation2 + $0xec] sm:$0xf]  ;;  %v2350_v31 = vld [vmem:[#allocation2 + $0xf8] sm:$0xf0] }
 0x1b3   :  { %v506_v51 = vsel %vm5392_vm9, %v2928_v8, %v5391_v33  ;;  %vm5394_vm0 = vmmov %vm5390_vm2  ;;  %v542_v29 = vsel %vm4266_vm8, %v505_v56, 0.0  ;;  %847 = vst [vmem:[#allocation2 + $0x1a8] sm:$0xff] %v839_v42  ;;  %v5397_v8 = vld [vmem:[#allocation15_spill] sm:$0xff]  ;;  %v5401_v53 = vor.u32 %v3930_v52, %v5400_v43  ;;  %v740_v6 = vsel %vm4112_vm12, %v716_v21, 0.0  ;;  %v4396_v42 = vpop.permute.xlu2 %2960 }
 0x1b4   :  { %v509_v50 = vsel %vm5394_vm0, %v5393_v11, %v2927_v57  ;;  %v546_v38 = vsel %vm4266_vm8, %v506_v51, 0.0  ;;  %v5398_v59 = vunpack.i.l.bf16 %v5397_v8  ;;  %vm5399_vm2 = vmmov %vm5396_vm11  ;;  %849 = vst [vmem:[#allocation2 + $0x1b8] sm:$0xff] %v841_v63  ;;  %v5402_v27 = vunpack.i.h.bf16 %v5397_v8  ;;  %v5409_v33 = vld [vmem:[#allocation19_spill] sm:$0xff]  ;;  %v5416_v8 = vld [vmem:[#allocation21_spill] sm:$0xff] }
 0x1b5   :  { %v541_v58 = vsel %vm4250_vm15, %v509_v50, 0.0  ;;  %1717 = vmatpush.bf16.msra.mxu0 %v5401_v53  ;;  %v554_v18 = vpack.c.bf16 %v546_v38, %v545_v48  ;;  %vm5403_vm15 = vmmov %vm5399_vm2  ;;  %v5404_v52 = vunpack.i.l.bf16 %v3821_v7  ;;  %v2485_v26 = vor.u32 %v2642_v34, %v2484_v13  ;;  %v5408_v48 = vld [vmem:[#allocation18_spill] sm:$0xff] }
 0x1b6   :  { %v703_v57 = vsel %vm5399_vm2, %v5398_v59, %v2957_v22  ;;  %v552_v54 = vpack.c.bf16 %v542_v29, %v541_v58  ;;  %v704_v30 = vsel %vm5403_vm15, %v5402_v27, %v2958_v24  ;;  %vm5405_vm8 = vmmov %vm5399_vm2  ;;  %v2489_v7 = vor.u32 %v2640_v61, %v2486_v25 }
 0x1b7   :  { %v715_v0 = vsel %vm5405_vm8, %v2957_v22, %v5404_v52  ;;  %v735_v63 = vsel %vm4099_vm3, %v703_v57, 0.0  ;;  %v739_v14 = vsel %vm4099_vm3, %v704_v30, 0.0  ;;  %v2349_v56 = vor.u32 %v2607_v4, %v2348_v39  ;;  %vm4414_vm9 = vmand %vm283_vm6, %vm4048_vm7  ;;  %562 = vst [vmem:[#allocation2 + $0xb8] sm:$0xff] %v554_v18  ;;  %1666 = vmatpush.bf16.msrb.mxu2 %v2485_v26  ;;  %v5411_v39 = vld [vmem:[#allocation14_spill] sm:$0xff]  ;;  %v2332_v18 = vld [vmem:[#allocation2 + $0xc8] sm:$0xf] }
 0x1b8   :  { %560 = vst [vmem:[#allocation2 + $0xa8] sm:$0xff] %v552_v54  ;;  %v736_v24 = vsel %vm4112_vm12, %v715_v0, 0.0  ;;  %v748_v19 = vpack.c.bf16 %v740_v6, %v739_v14  ;;  %v2353_v34 = vor.u32 %v2605_v47, %v2350_v31  ;;  %v5410_v51 = vor.u32 %v5408_v48, %v5409_v33  ;;  %1753 = vmatpush.bf16.msra.mxu1 %v2489_v7  ;;  %v2601_v6 = vld [vmem:[#allocation2 + $0xcc] sm:$0xf]  ;;  %v5427_v14 = vld [vmem:[#allocation27_spill] sm:$0xff] }
 0x1b9   :  { %v746_v13 = vpack.c.bf16 %v736_v24, %v735_v63  ;;  %v2948_v11 = vunpack.i.h.bf16 %v2946_v20  ;;  %v2947_v50 = vunpack.i.l.bf16 %v2946_v20  ;;  %v2933_v41 = vunpack.i.h.bf16 %v4388_v36  ;;  %v5421_v47 = vld [vmem:[#allocation4_spill] sm:$0xff]  ;;  %v2334_v7 = vld [vmem:[#allocation2 + $0xd8] sm:$0xf0] }
 0x1ba   :  { %1718 = vmatpush.bf16.msra.mxu0 %v5410_v51  ;;  %756 = vst [vmem:[#allocation2 + $0x178] sm:$0xff] %v748_v19  ;;  %v2932_v61 = vunpack.i.l.bf16 %v4388_v36  ;;  %v2963_v29 = vunpack.i.h.bf16 %v4396_v42  ;;  %v2962_v25 = vunpack.i.l.bf16 %v4396_v42  ;;  %v5412_v58 = vunpack.i.l.bf16 %v5411_v39  ;;  %2514 = vmatmul.msk.bf16.vlgmr.msrb.gmra.mxu2 %vm1588_vm14, %v4205_v32  ;;  %v5424_v52 = vld [vmem:[#allocation8_spill] sm:$0xff]  ;;  %v2603_v19 = vld [vmem:[#allocation2 + $0xd4] sm:$0xf0] }
 0x1bb   :  { %1775 = vmatpush.bf16.msra.mxu2 %v2349_v56  ;;  %754 = vst [vmem:[#allocation2 + $0x168] sm:$0xff] %v746_v13  ;;  %vm5413_vm7 = vcmp.lt.s32.totalorder %v3244_v17, 16  ;;  %v5414_v55 = vunpack.i.h.bf16 %v5411_v39  ;;  %v5417_v59 = vunpack.i.l.bf16 %v5416_v8  ;;  %v352_v43 = vsel %vm4414_vm9, %v4193_v9, 0.0  ;;  %v5428_v26 = vld [vmem:[#allocation28_spill] sm:$0xff]  ;;  %v4505_v46 = vpop.permute.xlu2 %2970 }
 0x1bc   :  { %1862 = vmatpush.bf16.msrb.mxu1 %v2353_v34  ;;  %v416_v38 = vsel %vm5413_vm7, %v2947_v50, %v5412_v58  ;;  %vm5415_vm0 = vmmov %vm5413_vm7  ;;  %v5419_v53 = vunpack.i.h.bf16 %v5416_v8  ;;  %v5422_v31 = vunpack.i.h.bf16 %v5421_v47  ;;  %vm5423_vm15 = vcmp.lt.s32.totalorder %v3244_v17, 113  ;;  %v2476_v51 = vld [vmem:[#allocation2 + $0x1e8] sm:$0xf]  ;;  %v2635_v8 = vld [vmem:[#allocation2 + $0x1d4] sm:$0xf0] }
 0x1bd   :  { %v417_v21 = vsel %vm5415_vm0, %v2948_v11, %v5414_v55  ;;  %vm5418_vm11 = vmmov %vm5415_vm0  ;;  %v449_v36 = vsel %vm283_vm6, %v416_v38, 0.0  ;;  %v5425_v0 = vunpack.i.h.bf16 %v5424_v52  ;;  %v5429_v24 = vor.u32 %v5427_v14, %v5428_v26 }
 0x1be   :  { %v420_v57 = vsel %vm5418_vm11, %v5417_v59, %v2947_v50  ;;  %vm5420_vm2 = vmmov %vm5415_vm0  ;;  %v453_v54 = vsel %vm283_vm6, %v417_v21, 0.0  ;;  %v791_v42 = vsel %vm5423_vm15, %v5422_v31, %v2933_v41  ;;  %v5430_v48 = vunpack.i.l.bf16 %v5421_v47  ;;  %v2460_v21 = vld [vmem:[#allocation2 + $0x1c8] sm:$0xf]  ;;  %v2951_v59 = vpop.permute.xlu1 %2950 }
 0x1bf   :  { %v421_v4 = vsel %vm5420_vm2, %v5419_v53, %v2948_v11  ;;  %v448_v20 = vsel %vm282_vm13, %v420_v57, 0.0  ;;  %vm5426_vm8 = vmmov %vm5423_vm15  ;;  %1719 = vmatpush.bf16.msra.mxu0 %v5429_v24  ;;  %v824_v13 = vsel %vm4314_vm10, %v791_v42, 0.0  ;;  %v2639_v11 = vld [vmem:[#allocation2 + $0x1f4] sm:$0xf0]  ;;  %v5434_v38 = vunpack.i.l.bf16 %v3994_v16  ;;  %v2936_v57 = vpop.permute.xlu0 %2935 }
 0x1c0   :  { %v452_v27 = vsel %vm282_vm13, %v421_v4, 0.0  ;;  %v459_v30 = vpack.c.bf16 %v449_v36, %v448_v20  ;;  %v803_v63 = vsel %vm5426_vm8, %v2933_v41, %v5425_v0  ;;  %vm5431_vm7 = vmmov %vm5426_vm8  ;;  %v5432_v41 = vunpack.i.l.bf16 %v5424_v52  ;;  %v5435_v4 = vld [vmem:[#allocation12_spill] sm:$0xff]  ;;  %v5439_v42 = vld [vmem:[#allocation22_spill] sm:$0xff] }
 0x1c1   :  { %v461_v56 = vpack.c.bf16 %v453_v54, %v452_v27  ;;  %v825_v34 = vsel %vm4322_vm4, %v803_v63, 0.0  ;;  %v790_v33 = vsel %vm5431_vm7, %v5430_v48, %v2932_v61  ;;  %vm5433_vm0 = vmmov %vm5431_vm7  ;;  %v4483_v55 = vsel %vm320_vm1, %v2963_v29, %v5434_v38  ;;  %v2567_v27 = vld [vmem:[%s5117_s3 + $0x1c] sm:$0xf]  ;;  %v5440_v52 = vld [vmem:[#allocation23_spill] sm:$0xff] }
 0x1c2   :  { %467 = vst [vmem:[#allocation2 + $0x68] sm:$0xff] %v459_v30  ;;  %v837_v50 = vpack.c.bf16 %v825_v34, %v824_v13  ;;  %v802_v39 = vsel %vm5433_vm0, %v2932_v61, %v5432_v41  ;;  %v820_v58 = vsel %vm4314_vm10, %v790_v33, 0.0  ;;  %v5436_v20 = vunpack.i.h.bf16 %v5435_v4  ;;  %v5447_v33 = vld [vmem:[#allocation11_spill] sm:$0xff] }
 0x1c3   :  { %469 = vst [vmem:[#allocation2 + $0x78] sm:$0xff] %v461_v56  ;;  %v821_v53 = vsel %vm4322_vm4, %v802_v39, 0.0  ;;  %v5437_v16 = vunpack.i.h.bf16 %v3440_v12  ;;  %v5438_v36 = vunpack.i.l.bf16 %v5435_v4  ;;  %v2194_v12 = vld [vmem:[%s5117_s3 + $0x24] sm:$0xf0]  ;;  %v2333_v30 = vor.u32 %v2603_v19, %v2332_v18  ;;  %v5442_v18 = vld [vmem:[#allocation6_spill] sm:$0xff] }
 0x1c4   :  { %v4491_v44 = vsel %vm320_vm1, %v5436_v20, %v2963_v29  ;;  %845 = vst [vmem:[#allocation2 + $0x198] sm:$0xff] %v837_v50  ;;  %v835_v29 = vpack.c.bf16 %v821_v53, %v820_v58  ;;  %v2477_v47 = vor.u32 %v2639_v11, %v2476_v51  ;;  %v2337_v31 = vor.u32 %v2601_v6, %v2334_v7  ;;  %v5455_v53 = vld [vmem:[#allocation5_spill] sm:$0xff] }
 0x1c5   :  { %v4497_v61 = vsel %vm320_vm1, %v2962_v25, %v5437_v16  ;;  %v4503_v54 = vsel %vm320_vm1, %v5438_v36, %v2962_v25  ;;  %v5441_v0 = vor.u32 %v5439_v42, %v5440_v52  ;;  %v2461_v25 = vor.u32 %v2635_v8, %v2460_v21  ;;  %1776 = vmatpush.bf16.msra.mxu2 %v2333_v30  ;;  %v5458_v16 = vld [vmem:[#allocation7_spill] sm:$0xff]  ;;  %v2597_v52 = vld [vmem:[#allocation2 + $0xac] sm:$0xf]  ;;  %v2570_v8 = vld [vmem:[%s5117_s3 + $0x34] sm:$0xf] }
 0x1c6   :  { %v2953_v63 = vunpack.i.h.bf16 %v2951_v59  ;;  %v2952_v14 = vunpack.i.l.bf16 %v2951_v59  ;;  %v2938_v26 = vunpack.i.h.bf16 %v2936_v57  ;;  %843 = vst [vmem:[#allocation2 + $0x188] sm:$0xff] %v835_v29  ;;  %1804 = vmatpush.bf16.msra.mxu3 %v2477_v47  ;;  %v2937_v24 = vunpack.i.l.bf16 %v2936_v57  ;;  %1863 = vmatpush.bf16.msrb.mxu1 %v2337_v31 }
 0x1c7   :  { %1720 = vmatpush.bf16.msra.mxu0 %v5441_v0  ;;  %v2973_v56 = vunpack.i.h.bf16 %v4505_v46  ;;  %v2972_v13 = vunpack.i.l.bf16 %v4505_v46  ;;  %v4518_v34 = vor.u32 %v2567_v27, %v2194_v12  ;;  %v5443_v6 = vunpack.i.l.bf16 %v5442_v18  ;;  %v2316_v46 = vld [vmem:[#allocation2 + $0xa8] sm:$0xf]  ;;  %v2631_v12 = vld [vmem:[#allocation2 + $0x1b4] sm:$0xf0] }
 0x1c8   :  { %vm5444_vm10 = vcmp.lt.s32.totalorder %v3244_v17, 127  ;;  %v5445_v7 = vunpack.i.h.bf16 %v5442_v18  ;;  %v5448_v51 = vunpack.i.l.bf16 %v5447_v33  ;;  %v5450_v50 = vunpack.i.h.bf16 %v5447_v33  ;;  %v2444_v27 = vld [vmem:[#allocation2 + $0x1a8] sm:$0xf]  ;;  %v2192_v0 = vld [vmem:[%s5117_s3 + $0x18] sm:$0xf] }
 0x1c9   :  { %v701_v19 = vsel %vm5444_vm10, %v5443_v6, %v2952_v14  ;;  %vm5446_vm4 = vmmov %vm5444_vm10  ;;  %vm5452_vm15 = vcmp.ne.s32.totalorder %v3734_v1, 15  ;;  %1643 = vmatmul.bf16.gmra.mxu1 %v4518_v34  ;;  %v5456_v4 = vunpack.i.h.bf16 %v5455_v53  ;;  %vm5457_vm7 = vcmp.lt.s32.totalorder %v3244_v17, 16 }
 0x1ca   :  { %v702_v48 = vsel %vm5446_vm4, %v5445_v7, %v2953_v63  ;;  %vm5449_vm11 = vmmov %vm5446_vm4  ;;  %v727_v39 = vsel %vm4099_vm3, %v701_v19, 0.0  ;;  %v5459_v36 = vunpack.i.h.bf16 %v5458_v16  ;;  %1805 = vmatpush.bf16.msra.mxu3 %v2461_v25  ;;  %v5461_v47 = vunpack.i.l.bf16 %v5455_v53  ;;  %v2568_v25 = vld [vmem:[%s5117_s3 + $0x20] sm:$0xf0]  ;;  %v2318_v19 = vld [vmem:[#allocation2 + $0xb8] sm:$0xf0] }
 0x1cb   :  { %v713_v11 = vsel %vm5449_vm11, %v2952_v14, %v5448_v51  ;;  %vm5451_vm2 = vmmov %vm5446_vm4  ;;  %v731_v38 = vsel %vm4099_vm3, %v702_v48, 0.0  ;;  %v415_v20 = vsel %vm5457_vm7, %v2938_v26, %v5456_v4  ;;  %1721 = vmatpush.bf16.msra.mxu0 %v2409_v5  ;;  %v5463_v42 = vunpack.i.l.bf16 %v5458_v16  ;;  %v2599_v5 = vld [vmem:[#allocation2 + $0xb4] sm:$0xf0] }
 0x1cc   :  { %v714_v41 = vsel %vm5451_vm2, %v2953_v63, %v5450_v50  ;;  %v728_v58 = vsel %vm4112_vm12, %v713_v11, 0.0  ;;  %vm4548_vm8 = vmand %vm5452_vm15, %vm4099_vm3  ;;  %v445_v30 = vsel %vm283_vm6, %v415_v20, 0.0  ;;  %vm5465_vm4 = vcmp.ne.s32.totalorder %v3928_v45, 15  ;;  %v2569_v63 = vld [vmem:[%s5117_s3 + $0x28] sm:$0xf0]  ;;  %v5469_v48 = vld [vmem:[#allocation10_spill] sm:$0xff] }
 0x1cd   :  { %v732_v21 = vsel %vm4112_vm12, %v714_v41, 0.0  ;;  %v742_v59 = vpack.c.bf16 %v728_v58, %v727_v39  ;;  %vm5460_vm0 = vmmov %vm5457_vm7  ;;  %v2595_v14 = vld [vmem:[#allocation2 + $0x94] sm:$0xf0]  ;;  %v5470_v33 = vunpack.i.h.bf16 %v5469_v48  ;;  %v2300_v11 = vld [vmem:[#allocation2 + $0x88] sm:$0xf]  ;;  %v5473_v41 = vunpack.i.l.bf16 %v5469_v48 }
 0x1ce   :  { %v744_v57 = vpack.c.bf16 %v732_v21, %v731_v38  ;;  %v419_v15 = vsel %vm5460_vm0, %v5459_v36, %v2938_v26  ;;  %vm5462_vm3 = vmmov %vm5460_vm0  ;;  %v2302_v50 = vld [vmem:[#allocation2 + $0x98] sm:$0xf0]  ;;  %v2317_v58 = vor.u32 %v2599_v5, %v2316_v46  ;;  %v5475_v38 = vld [vmem:[#allocation24_spill] sm:$0xff]  ;;  %v2445_v20 = vor.u32 %v2631_v12, %v2444_v27 }
 0x1cf   :  { %v444_v29 = vsel %vm282_vm13, %v419_v15, 0.0  ;;  %v414_v31 = vsel %vm5462_vm3, %v2937_v24, %v5461_v47  ;;  %vm5464_vm10 = vmmov %vm5460_vm0  ;;  %750 = vst [vmem:[#allocation2 + $0x148] sm:$0xff] %v742_v59  ;;  %v5477_v21 = vor.u32 %v5475_v38, %v5476_v10  ;;  %v2966_v59 = vpop.permute.xlu1 %2965  ;;  %v2321_v16 = vor.u32 %v2597_v52, %v2318_v19  ;;  %v5478_v27 = vld [vmem:[#allocation3_spill] sm:$0xff]  ;;  %v2591_v19 = vld [vmem:[#allocation2 + $0x74] sm:$0xf0] }
 0x1d0   :  { %v418_v2 = vsel %vm5464_vm10, %v5463_v42, %v2937_v24  ;;  %vm4580_vm11 = vmand %vm5465_vm4, %vm4112_vm12  ;;  %v457_v26 = vpack.c.bf16 %v445_v30, %v444_v29  ;;  %v441_v18 = vsel %vm283_vm6, %v414_v31, 0.0  ;;  %vm5468_vm12 = vcmp.lt.s32.totalorder %v3244_v17, 111  ;;  %752 = vst [vmem:[#allocation2 + $0x158] sm:$0xff] %v744_v57  ;;  %v307_v57 = vpop.permute.xlu0 %306  ;;  %1777 = vmatpush.bf16.msra.mxu2 %v2317_v58  ;;  %1806 = vmatpush.bf16.msra.mxu3 %v2445_v20  ;;  %v2358_v42 = vld [vmem:[#allocation2 + $0x110] sm:$0xf0] }
 0x1d1   :  { %v440_v24 = vsel %vm282_vm13, %v418_v2, 0.0  ;;  %v973_v6 = vsel %vm5468_vm12, %v2898_v40, %v2973_v56  ;;  %vm5471_vm2 = vmmov %vm5468_vm12  ;;  %1722 = vmatpush.bf16.msra.mxu0 %v5477_v21  ;;  %v4629_v15 = vor.u32 %v2569_v63, %v2200_v37  ;;  %v2301_v46 = vor.u32 %v2595_v14, %v2300_v11  ;;  %1864 = vmatpush.bf16.msrb.mxu1 %v2321_v16  ;;  %v2589_v37 = vld [vmem:[#allocation2 + $0x6c] sm:$0xf]  ;;  %v2286_v48 = vld [vmem:[#allocation2 + $0x78] sm:$0xf0] }
 0x1d2   :  { %v455_v7 = vpack.c.bf16 %v441_v18, %v440_v24  ;;  %v985_v51 = vsel %vm5471_vm2, %v2973_v56, %v5470_v33  ;;  %v1006_v1 = vsel %vm4548_vm8, %v973_v6, 0.0  ;;  %vm5472_vm13 = vmmov %vm5471_vm2  ;;  %465 = vst [vmem:[#allocation2 + $0x58] sm:$0xff] %v457_v26  ;;  %v2968_v30 = vunpack.i.h.bf16 %v2966_v59  ;;  %v2608_v33 = vld [vmem:[#allocation2 + $0x104] sm:$0xf]  ;;  %v5490_v17 = vld [vmem:[#allocation17_spill] sm:$0xff] }
 0x1d3   :  { %v972_v45 = vsel %vm5472_vm13, %v2897_v60, %v2972_v13  ;;  %v1007_v40 = vsel %vm4580_vm11, %v985_v51, 0.0  ;;  %vm5474_vm6 = vmmov %vm5471_vm2  ;;  %v2593_v60 = vld [vmem:[#allocation2 + $0x8c] sm:$0xf]  ;;  %v2967_v47 = vunpack.i.l.bf16 %v2966_v59  ;;  %v322_v31 = vsel %vm320_vm1, %v307_v57, %v4085_v23  ;;  %2515 = vmatmul.msk.bf16.gmra.mxu2 %vm1588_vm14, %v4629_v15  ;;  %v5492_v38 = vld [vmem:[#allocation9_spill] sm:$0xff] }
 0x1d4   :  { %v984_v39 = vsel %vm5474_vm6, %v2972_v13, %v5473_v41  ;;  %v1002_v56 = vsel %vm4548_vm8, %v972_v45, 0.0  ;;  %463 = vst [vmem:[#allocation2 + $0x48] sm:$0xff] %v455_v7  ;;  %v1019_v53 = vpack.c.bf16 %v1007_v40, %v1006_v1  ;;  %v4627_v13 = vor.u32 %v2568_v25, %v2192_v0  ;;  %v2284_v25 = vld [vmem:[#allocation2 + $0x68] sm:$0xf]  ;;  %v2627_v7 = vld [vmem:[#allocation2 + $0x194] sm:$0xf0]  ;;  %1778 = vmatpush.bf16.msra.mxu2 %v2301_v46 }
 0x1d5   :  { %v1003_v4 = vsel %vm4580_vm11, %v984_v39, 0.0  ;;  %v2305_v29 = vor.u32 %v2593_v60, %v2302_v50  ;;  %v5479_v12 = vunpack.i.h.bf16 %v5478_v27  ;;  %v356_v5 = vsel %vm4414_vm9, %v322_v31, 0.0  ;;  %v5489_v45 = vld [vmem:[#allocation16_spill] sm:$0xff]  ;;  %v2204_v27 = vld [vmem:[%s5117_s3 + $0x30] sm:$0xf] }
 0x1d6   :  { %v1017_v36 = vpack.c.bf16 %v1003_v4, %v1002_v56  ;;  %1027 = vst [vmem:[#allocation2 + $0x218] sm:$0xff] %v1019_v53  ;;  %1614 = vmatmul.bf16.gmra.mxu0 %v4627_v13  ;;  %1701 = vmatmul.bf16.gmra.mxu3 %v4627_v13  ;;  %v359_v0 = vsel %vm3814_vm5, %v4503_v54, 0.0  ;;  %v360_v23 = vsel %vm4414_vm9, %v4497_v61, 0.0  ;;  %v5481_v63 = vunpack.i.l.bf16 %v3808_v28  ;;  %v2428_v50 = vld [vmem:[#allocation2 + $0x188] sm:$0xf] }
 0x1d7   :  { %v326_v2 = vsel %vm320_vm1, %v5479_v12, %v307_v57  ;;  %vm5482_vm1 = vmmov %vm5471_vm2  ;;  %v5483_v26 = vunpack.i.h.bf16 %v3808_v28  ;;  %v5485_v54 = vunpack.i.l.bf16 %v3914_v62  ;;  %v5487_v18 = vunpack.i.h.bf16 %v3914_v62  ;;  %1865 = vmatpush.bf16.msrb.mxu1 %v2305_v29  ;;  %v2412_v29 = vld [vmem:[#allocation2 + $0x168] sm:$0xf]  ;;  %v2571_v12 = vld [vmem:[%s5117_s3 + $0x38] sm:$0xf0] }
 0x1d8   :  { %1025 = vst [vmem:[#allocation2 + $0x208] sm:$0xff] %v1017_v36  ;;  %v974_v14 = vsel %vm5482_vm1, %v5481_v63, %v2967_v47  ;;  %vm5484_vm15 = vmmov %vm5482_vm1  ;;  %v5491_v11 = vor.u32 %v5489_v45, %v5490_v17  ;;  %v355_v39 = vsel %vm3814_vm5, %v326_v2, 0.0  ;;  %v363_v56 = vsel %vm3814_vm5, %v4491_v44, 0.0  ;;  %v2212_v2 = vld [vmem:[%s5117_s3 + $0x38] sm:$0xf] }
 0x1d9   :  { %v975_v24 = vsel %vm5484_vm15, %v5483_v26, %v2968_v30  ;;  %vm5486_vm7 = vmmov %vm5482_vm1  ;;  %v1010_v28 = vsel %vm4548_vm8, %v974_v14, 0.0  ;;  %v364_v58 = vsel %vm4414_vm9, %v4483_v55, 0.0  ;;  %v5493_v10 = vsel %vm3814_vm5, %v5492_v38, 0.0  ;;  %v2587_v57 = vld [vmem:[#allocation2 + $0x54] sm:$0xf0]  ;;  %v1122_v38 = vld [vmem:[%s5116_s4 + $0x10] sm:$0xff] }
 0x1da   :  { %v986_v61 = vsel %vm5486_vm7, %v2967_v47, %v5485_v54  ;;  %vm5488_vm0 = vmmov %vm5482_vm1  ;;  %v1014_v1 = vsel %vm4548_vm8, %v975_v24, 0.0  ;;  %1723 = vmatpush.bf16.msra.mxu0 %v5491_v11  ;;  %v366_v44 = vpack.c.bf16 %v352_v43, %v5493_v10  ;;  %v368_v21 = vpack.c.bf16 %v356_v5, %v355_v39  ;;  %v2270_v55 = vld [vmem:[#allocation2 + $0x58] sm:$0xf0]  ;;  %v2396_v43 = vld [vmem:[#allocation2 + $0x148] sm:$0xf]  ;;  %1140 = vperm.xlu2 %2974, %v1122_v38  }
 0x1db   :  { %v987_v6 = vsel %vm5488_vm0, %v2968_v30, %v5487_v18  ;;  %v1011_v51 = vsel %vm4580_vm11, %v986_v61, 0.0  ;;  %v2361_v60 = vor.u32 %v2608_v33, %v2358_v42  ;;  %v2268_v59 = vld [vmem:[#allocation2 + $0x48] sm:$0xf]  ;;  %v370_v53 = vpack.c.bf16 %v360_v23, %v359_v0  ;;  %v2585_v36 = vld [vmem:[#allocation2 + $0x4c] sm:$0xf] }
 0x1dc   :  { %v1015_v62 = vsel %vm4580_vm11, %v987_v6, 0.0  ;;  %v1021_v40 = vpack.c.bf16 %v1011_v51, %v1010_v28  ;;  %v2285_v4 = vor.u32 %v2591_v19, %v2284_v25  ;;  %v2429_v20 = vor.u32 %v2627_v7, %v2428_v50  ;;  %v2623_v30 = vld [vmem:[#allocation2 + $0x174] sm:$0xf0]  ;;  %374 = vst [vmem:[#allocation2 + $0x8] sm:$0xff] %v366_v44  ;;  %v2572_v5 = vld [vmem:[%s5117_s3 + $0x40] sm:$0xf0] }
 0x1dd   :  { %v1023_v41 = vpack.c.bf16 %v1015_v62, %v1014_v1  ;;  %v2289_v16 = vor.u32 %v2589_v37, %v2286_v48  ;;  %v372_v46 = vpack.c.bf16 %v364_v58, %v363_v56  ;;  %v4699_v22 = vor.u32 %v2570_v8, %v2206_v49  ;;  %376 = vst [vmem:[#allocation2 + $0x18] sm:$0xff] %v368_v21  ;;  %v2619_v47 = vld [vmem:[#allocation2 + $0x154] sm:$0xf0]  ;;  %v2380_v63 = vld [vmem:[#allocation2 + $0x128] sm:$0xf] }
 0x1de   :  { %1029 = vst [vmem:[#allocation2 + $0x228] sm:$0xff] %v1021_v40  ;;  %1724 = vmatpush.bf16.msra.mxu0 %v2361_v60  ;;  %1779 = vmatpush.bf16.msra.mxu2 %v2285_v4  ;;  %v2269_v9 = vor.u32 %v2587_v57, %v2268_v59  ;;  %v2273_v31 = vor.u32 %v2585_v36, %v2270_v55  ;;  %v2615_v14 = vld [vmem:[#allocation2 + $0x134] sm:$0xf0]  ;;  %v2573_v62 = vld [vmem:[%s5117_s3 + $0x4c] sm:$0xf] }
 0x1df   :  { %1031 = vst [vmem:[#allocation2 + $0x238] sm:$0xff] %v1023_v41  ;;  %1807 = vmatpush.bf16.msra.mxu3 %v2429_v20  ;;  %1866 = vmatpush.bf16.msrb.mxu1 %v2289_v16  ;;  %v2413_v42 = vor.u32 %v2623_v30, %v2412_v29  ;;  %v2397_v52 = vor.u32 %v2619_v47, %v2396_v43  ;;  %v2643_v24 = vld [vmem:[#allocation2 + $0x214] sm:$0xf0]  ;;  %v2492_v18 = vld [vmem:[#allocation2 + $0x208] sm:$0xf] }
 0x1e0   :  { %378 = vst [vmem:[#allocation2 + $0x28] sm:$0xff] %v370_v53  ;;  %1648 = vmatmul.bf16.gmra.mxu1 %v4699_v22  ;;  %v4714_v0 = vor.u32 %v2571_v12, %v2204_v27  ;;  %v4716_v25 = vor.u32 %v2572_v5, %v2212_v2  ;;  %v2381_v19 = vor.u32 %v2615_v14, %v2380_v63  ;;  %v2611_v48 = vld [vmem:[#allocation2 + $0x114] sm:$0xf0]  ;;  %v2364_v40 = vld [vmem:[#allocation2 + $0x108] sm:$0xf] }
 0x1e1   :  { %380 = vst [vmem:[#allocation2 + $0x38] sm:$0xff] %v372_v46  ;;  %v2493_v11 = vor.u32 %v2643_v24, %v2492_v18  ;;  %v2218_v50 = vld [vmem:[%s5117_s3 + $0x54] sm:$0xf0]  ;;  %v2637_v41 = vld [vmem:[#allocation2 + $0x1ec] sm:$0xf]  ;;  %v2365_v8 = vor.u32 %v2611_v48, %v2364_v40  ;;  %v2045_v40 = vld [vmem:[%s5113_s0] sm:$0xff] }
 0x1e2   :  { %1780 = vmatpush.bf16.msra.mxu2 %v2269_v9  ;;  %v2478_v39 = vld [vmem:[#allocation2 + $0x1f8] sm:$0xf0]  ;;  %v4731_v21 = vor.u32 %v2573_v62, %v2218_v50  ;;  %v2633_v59 = vld [vmem:[#allocation2 + $0x1cc] sm:$0xf]  ;;  %v2216_v20 = vld [vmem:[%s5117_s3 + $0x48] sm:$0xf] }
 0x1e3   :  { %1808 = vmatpush.bf16.msra.mxu3 %v2413_v42  ;;  %1867 = vmatpush.bf16.msrb.mxu1 %v2273_v31  ;;  %v2236_v56 = vld [vmem:[#allocation2 + $0x8] sm:$0xf]  ;;  %v2577_v49 = vld [vmem:[#allocation2 + $0xc] sm:$0xf]  ;;  %v2481_v60 = vor.u32 %v2637_v41, %v2478_v39  ;;  %v2462_v57 = vld [vmem:[#allocation2 + $0x1d8] sm:$0xf0] }
 0x1e4   :  { %2516 = vmatmul.msk.bf16.gmra.mxu2 %vm1588_vm14, %v4716_v25  ;;  %v2579_v45 = vld [vmem:[#allocation2 + $0x14] sm:$0xf0]  ;;  %v2238_v17 = vld [vmem:[#allocation2 + $0x18] sm:$0xf0]  ;;  %v2641_v53 = vld [vmem:[#allocation2 + $0x20c] sm:$0xf]  ;;  %v2465_v36 = vor.u32 %v2633_v59, %v2462_v57 }
 0x1e5   :  { %v2508_v23 = vld [vmem:[#allocation2 + $0x228] sm:$0xf]  ;;  %v2645_v51 = vld [vmem:[#allocation2 + $0x22c] sm:$0xf]  ;;  %v2237_v10 = vor.u32 %v2579_v45, %v2236_v56  ;;  %v2241_v44 = vor.u32 %v2577_v49, %v2238_v17  ;;  %v2494_v4 = vld [vmem:[#allocation2 + $0x218] sm:$0xf0] }
 0x1e6   :  { %v2647_v37 = vld [vmem:[#allocation2 + $0x234] sm:$0xf0]  ;;  %1619 = vmatmul.bf16.gmra.mxu0 %v4714_v0  ;;  %1706 = vmatmul.bf16.gmra.mxu3 %v4714_v0  ;;  %v2510_v1 = vld [vmem:[#allocation2 + $0x238] sm:$0xf0]  ;;  %v2574_v16 = vld [vmem:[%s5117_s3 + $0x50] sm:$0xf0]  ;;  %v2497_v55 = vor.u32 %v2641_v53, %v2494_v4 }
 0x1e7   :  { %v2509_v26 = vor.u32 %v2647_v37, %v2508_v23  ;;  %1809 = vmatpush.bf16.msra.mxu3 %v2397_v52  ;;  %v2252_v54 = vld [vmem:[#allocation2 + $0x28] sm:$0xf]  ;;  %v2581_v61 = vld [vmem:[#allocation2 + $0x2c] sm:$0xf]  ;;  %v2513_v58 = vor.u32 %v2645_v51, %v2510_v1  ;;  %v2224_v46 = vld [vmem:[%s5117_s3 + $0x50] sm:$0xf]  ;;  %v4746_v30 = vor.u32 %v2574_v16, %v2216_v20 }
 0x1e8   :  { %v2583_v6 = vld [vmem:[#allocation2 + $0x34] sm:$0xf0]  ;;  %v2254_v7 = vld [vmem:[#allocation2 + $0x38] sm:$0xf0]  ;;  %v2629_v9 = vld [vmem:[#allocation2 + $0x1ac] sm:$0xf] }
 0x1e9   :  { %1839 = vmatpush.bf16.msrb.mxu0 %v2509_v26  ;;  %v2253_v33 = vor.u32 %v2583_v6, %v2252_v54  ;;  %v2257_v28 = vor.u32 %v2581_v61, %v2254_v7  ;;  %v2575_v29 = vld [vmem:[%s5117_s3 + $0x58] sm:$0xf0]  ;;  %v2625_v42 = vld [vmem:[#allocation2 + $0x18c] sm:$0xf] }
 0x1ea   :  { %v2446_v43 = vld [vmem:[#allocation2 + $0x1b8] sm:$0xf0]  ;;  %v4748_v47 = vor.u32 %v2575_v29, %v2224_v46  ;;  %v1125_v12 = vld [vmem:[%s5116_s4 + $0x28] sm:$0xff] }
 0x1eb   :  { %1810 = vmatpush.bf16.msra.mxu3 %v2381_v19  ;;  %1781 = vmatpush.bf16.msra.mxu2 %v2253_v33  ;;  %v2449_v31 = vor.u32 %v2629_v9, %v2446_v43  ;;  %v2430_v27 = vld [vmem:[#allocation2 + $0x198] sm:$0xf0]  ;;  %v2621_v5 = vld [vmem:[#allocation2 + $0x16c] sm:$0xf]  ;;  %v4778_v33 = vpop.permute.xlu0 %1130 }
 0x1ec   :  { %1868 = vmatpush.bf16.msrb.mxu1 %v2257_v28  ;;  %v2433_v2 = vor.u32 %v2625_v42, %v2430_v27  ;;  %1155 = vperm.xlu2 %2974, %v1125_v12   ;;  %v2414_v52 = vld [vmem:[#allocation2 + $0x178] sm:$0xf0]  ;;  %v2617_v37 = vld [vmem:[#allocation2 + $0x14c] sm:$0xf] }
 0x1ed   :  { %1840 = vmatpush.bf16.msrb.mxu0 %v2493_v11  ;;  %v2417_v23 = vor.u32 %v2621_v5, %v2414_v52  ;;  %v2398_v63 = vld [vmem:[#allocation2 + $0x158] sm:$0xf0]  ;;  %v2613_v26 = vld [vmem:[#allocation2 + $0x12c] sm:$0xf] }
 0x1ee   :  { %v2401_v14 = vor.u32 %v2617_v37, %v2398_v63  ;;  %v2382_v24 = vld [vmem:[#allocation2 + $0x138] sm:$0xf0]  ;;  %v2609_v18 = vld [vmem:[#allocation2 + $0x10c] sm:$0xf] }
 0x1ef   :  { %1811 = vmatpush.bf16.msra.mxu3 %v2365_v8  ;;  %1782 = vmatpush.bf16.msra.mxu2 %v2237_v10  ;;  %v2385_v54 = vor.u32 %v2613_v26, %v2382_v24  ;;  %v2366_v61 = vld [vmem:[#allocation2 + $0x118] sm:$0xf0] }
 0x1f0   :  { %1869 = vmatpush.bf16.msrb.mxu1 %v2241_v44  ;;  %v2369_v6 = vor.u32 %v2609_v18, %v2366_v61 }
 0x1f1   :  { %1653 = vmatmul.bf16.gmra.mxu1 %v4731_v21 }
 0x1f3   :  { %1891 = vmatpush.bf16.msrb.mxu2 %v2481_v60  ;;  %1926 = vmatpush.bf16.msrb.mxu3 %v2513_v58 }
 0x1f4   :  { %2517 = vmatmul.msk.bf16.gmra.mxu2 %vm1588_vm14, %v4748_v47 }
 0x1f6   :  { %1624 = vmatmul.bf16.gmra.mxu0 %v4746_v30  ;;  %1711 = vmatmul.bf16.gmra.mxu3 %v4746_v30 }
 0x1f7   :  { %1892 = vmatpush.bf16.msrb.mxu2 %v2465_v36  ;;  %1927 = vmatpush.bf16.msrb.mxu3 %v2497_v55  ;;  %v4816_v55 = vpop.permute.xlu0 %1145 }
 0x1fb   :  { %1893 = vmatpush.bf16.msrb.mxu2 %v2449_v31 }
 0x1ff   :  { %1894 = vmatpush.bf16.msrb.mxu2 %v2433_v2 }
 0x201   :  { %2518 = vmatmul.msk.bf16.vlgmr.msra.gmra.mxu1 %vm1588_vm14, %v4205_v32 }
 0x203   :  { %1895 = vmatpush.bf16.msrb.mxu2 %v2417_v23 }
 0x204   :  { %1783 = vmatmul.bf16.vlgmr.msra.gmra.mxu2 %v4203_v35 }
 0x206   :  { %1725 = vmatmul.bf16.vlgmr.msra.gmra.mxu0 %v4199_v3  ;;  %1812 = vmatmul.bf16.vlgmr.msra.gmra.mxu3 %v4199_v3 }
 0x207   :  { %1896 = vmatpush.bf16.msrb.mxu2 %v2401_v14 }
 0x20b   :  { %1897 = vmatpush.bf16.msrb.mxu2 %v2385_v54 }
 0x20f   :  { %1898 = vmatpush.bf16.msrb.mxu2 %v2369_v6 }
 0x211   :  { %2519 = vmatmul.msk.bf16.gmra.mxu1 %vm1588_vm14, %v4629_v15 }
 0x214   :  { %1788 = vmatmul.bf16.gmra.mxu2 %v4627_v13 }
 0x216   :  { %1730 = vmatmul.bf16.gmra.mxu0 %v4518_v34  ;;  %1817 = vmatmul.bf16.gmra.mxu3 %v4518_v34 }
 0x221   :  { %2520 = vmatmul.msk.bf16.gmra.mxu1 %vm1588_vm14, %v4716_v25 }
 0x224   :  { %1793 = vmatmul.bf16.gmra.mxu2 %v4714_v0 }
 0x226   :  { %1735 = vmatmul.bf16.gmra.mxu0 %v4699_v22  ;;  %1822 = vmatmul.bf16.gmra.mxu3 %v4699_v22  ;;  %v1639_v19 = vpop.f32.mrf.mxu1 }
 0x22c   :  { %v1610_v7 = vpop.f32.mrf.mxu0 }
 0x22d   :  { %v1611_v28 = vadd.f32 %v1610_v7, %v4778_v33 }
 0x22e   :  { %v1641_v48 = vpop.f32.mrf.mxu1 }
 0x22f   :  { %v1640_v1 = vadd.f32 %v1639_v19, %v1611_v28 }
 0x231   :  { %2521 = vmatmul.msk.bf16.gmra.mxu1 %vm1588_vm14, %v4748_v47 }
 0x233   :  { %v4781_v51 = vpop.f32.mrf.mxu3 }
 0x234   :  { %1798 = vmatmul.bf16.gmra.mxu2 %v4746_v30  ;;  %v1612_v62 = vpop.f32.mrf.mxu0  ;;  %v4800_v58 = vpop.permute.xlu2 %1140 }
 0x236   :  { %1740 = vmatmul.bf16.gmra.mxu0 %v4731_v21  ;;  %1827 = vmatmul.bf16.gmra.mxu3 %v4731_v21 }
 0x23d   :  { %v1668_v45 = vpop.f32.mrf.mxu2 }
 0x23e   :  { %v1669_v17 = vadd.f32 %v1668_v45, %v1640_v1 }
 0x240   :  { %vm1949_vm5 = vcmp.ge.f32.partialorder %v1669_v17, 0.0  ;;  %v1981_v50 = vmul.f32 0.01, %v1669_v17 }
 0x241   :  { %1870 = vmatmul.bf16.vlgmr.msrb.gmra.mxu1 %v4203_v35  ;;  %v4788_v35 = vpop.permute.xlu1 %1135 }
 0x242   :  { %v1613_v11 = vadd.f32 %v1612_v62, %v4788_v35  ;;  %v2013_v39 = vsel %vm1949_vm5, %v1669_v17, %v1981_v50  ;;  %v4856_v50 = vpop.permute.xlu0 %1160 }
 0x243   :  { %v2061_v56 = vadd.f32 %v2045_v40, %v2013_v39 }
 0x244   :  { %1899 = vmatmul.bf16.vlgmr.msrb.gmra.mxu2 %v4199_v3  ;;  %v4797_v3 = vpop.f32.mrf.mxu3 }
 0x245   :  { %2077 = vst [vmem:[%s5118_s5] sm:$0xff] %v2061_v56  ;;  %v1670_v8 = vpop.f32.mrf.mxu2 }
 0x246   :  { %2522 = vmatmul.msk.bf16.vlgmr.msrb.gmra.mxu0 %vm1588_vm14, %v4205_v32  ;;  %2526 = vmatmul.msk.bf16.vlgmr.msrb.gmra.mxu3 %vm1588_vm14, %v4205_v32  ;;  %v1644_v41 = vpop.f32.mrf.mxu1  ;;  %v1642_v32 = vadd.f32 %v1641_v48, %v1613_v11  ;;  %v4844_v61 = vpop.permute.xlu2 %1155 }
 0x248   :  { %v1671_v49 = vadd.f32 %v1670_v8, %v1642_v32 }
 0x249   :  { %v4828_v5 = vpop.permute.xlu1 %1150 }
 0x24a   :  { %vm1953_vm9 = vcmp.ge.f32.partialorder %v1671_v49, 0.0  ;;  %v1985_v38 = vmul.f32 0.01, %v1671_v49 }
 0x24c   :  { %v2047_v10 = vld [vmem:[%s5113_s0 + $0x10] sm:$0xff]  ;;  %v2017_v59 = vsel %vm1953_vm9, %v1671_v49, %v1985_v38 }
 0x24d   :  { %v2063_v53 = vadd.f32 %v2047_v10, %v2017_v59 }
 0x24e   :  { %v1646_v44 = vpop.f32.mrf.mxu1 }
 0x24f   :  { %2079 = vst [vmem:[%s5118_s5 + $0x10] sm:$0xff] %v2063_v53 }
 0x251   :  { %1875 = vmatmul.bf16.gmra.mxu1 %v4627_v13 }
 0x253   :  { %v1615_v60 = vpop.f32.mrf.mxu0 }
 0x254   :  { %v1616_v57 = vadd.f32 %v1615_v60, %v4800_v58  ;;  %1904 = vmatmul.bf16.gmra.mxu2 %v4518_v34  ;;  %v4872_v60 = vpop.permute.xlu1 %1165 }
 0x256   :  { %2523 = vmatmul.msk.bf16.gmra.mxu0 %vm1588_vm14, %v4629_v15  ;;  %2527 = vmatmul.msk.bf16.gmra.mxu3 %vm1588_vm14, %v4629_v15  ;;  %v1645_v13 = vadd.f32 %v1644_v41, %v1616_v57  ;;  %v1673_v20 = vpop.f32.mrf.mxu2  ;;  %v2049_v15 = vld [vmem:[%s5113_s0 + $0x20] sm:$0xff] }
 0x258   :  { %v1674_v36 = vadd.f32 %v1673_v20, %v1645_v13 }
 0x259   :  { %v4814_v4 = vpop.f32.mrf.mxu3 }
 0x25a   :  { %vm1957_vm8 = vcmp.ge.f32.partialorder %v1674_v36, 0.0  ;;  %v1989_v9 = vmul.f32 0.01, %v1674_v36 }
 0x25b   :  { %v1617_v16 = vpop.f32.mrf.mxu0 }
 0x25c   :  { %v1618_v29 = vadd.f32 %v1617_v16, %v4816_v55  ;;  %v2021_v43 = vsel %vm1957_vm8, %v1674_v36, %v1989_v9  ;;  %v1698_v16 = vadd.f32 %v4781_v51, %v4778_v33 }
 0x25d   :  { %v1649_v46 = vpop.f32.mrf.mxu1  ;;  %v2065_v34 = vadd.f32 %v2049_v15, %v2021_v43 }
 0x25e   :  { %v1647_v42 = vadd.f32 %v1646_v44, %v1618_v29  ;;  %v1675_v27 = vpop.f32.mrf.mxu2 }
 0x25f   :  { %2081 = vst [vmem:[%s5118_s5 + $0x20] sm:$0xff] %v2065_v34 }
 0x260   :  { %v1676_v2 = vadd.f32 %v1675_v27, %v1647_v42 }
 0x261   :  { %1880 = vmatmul.bf16.gmra.mxu1 %v4714_v0  ;;  %v4823_v31 = vpop.f32.mrf.mxu3 }
 0x262   :  { %vm1961_vm3 = vcmp.ge.f32.partialorder %v1676_v2, 0.0  ;;  %v1993_v37 = vmul.f32 0.01, %v1676_v2 }
 0x263   :  { %v1620_v12 = vpop.f32.mrf.mxu0 }
 0x264   :  { %v1621_v23 = vadd.f32 %v1620_v12, %v4828_v5  ;;  %v2025_v63 = vsel %vm1961_vm3, %v1676_v2, %v1993_v37  ;;  %1909 = vmatmul.bf16.gmra.mxu2 %v4699_v22  ;;  %v1700_v37 = vadd.f32 %v4797_v3, %v4788_v35 }
 0x265   :  { %v1651_v52 = vpop.f32.mrf.mxu1 }
 0x266   :  { %v2051_v0 = vld [vmem:[%s5113_s0 + $0x30] sm:$0xff]  ;;  %2524 = vmatmul.msk.bf16.gmra.mxu0 %vm1588_vm14, %v4716_v25  ;;  %2528 = vmatmul.msk.bf16.gmra.mxu3 %vm1588_vm14, %v4716_v25  ;;  %v1650_v24 = vadd.f32 %v1649_v46, %v1621_v23 }
 0x267   :  { %v2067_v14 = vadd.f32 %v2051_v0, %v2025_v63  ;;  %v1678_v54 = vpop.f32.mrf.mxu2 }
 0x268   :  { %v1679_v6 = vadd.f32 %v1678_v54, %v1650_v24 }
 0x269   :  { %v4839_v26 = vpop.f32.mrf.mxu3  ;;  %2083 = vst [vmem:[%s5118_s5 + $0x30] sm:$0xff] %v2067_v14 }
 0x26a   :  { %vm1965_vm10 = vcmp.ge.f32.partialorder %v1679_v6, 0.0  ;;  %v1997_v19 = vmul.f32 0.01, %v1679_v6 }
 0x26b   :  { %v1622_v18 = vpop.f32.mrf.mxu0 }
 0x26c   :  { %v1623_v22 = vadd.f32 %v1622_v18, %v4844_v61  ;;  %v2029_v48 = vsel %vm1965_vm10, %v1679_v6, %v1997_v19 }
 0x26e   :  { %v1654_v7 = vpop.f32.mrf.mxu1  ;;  %v1652_v62 = vadd.f32 %v1651_v52, %v1623_v22  ;;  %v1703_v22 = vadd.f32 %v4814_v4, %v4800_v58  ;;  %v1705_v4 = vadd.f32 %v4823_v31, %v4816_v55  ;;  %v1708_v31 = vadd.f32 %v4839_v26, %v4828_v5 }
 0x26f   :  { %v1680_v45 = vpop.f32.mrf.mxu2 }
 0x270   :  { %v2053_v25 = vld [vmem:[%s5113_s0 + $0x40] sm:$0xff]  ;;  %v1681_v11 = vadd.f32 %v1680_v45, %v1652_v62 }
 0x271   :  { %v2069_v28 = vadd.f32 %v2053_v25, %v2029_v48  ;;  %1885 = vmatmul.bf16.gmra.mxu1 %v4746_v30  ;;  %v4851_v1 = vpop.f32.mrf.mxu3 }
 0x272   :  { %vm1969_vm4 = vcmp.ge.f32.partialorder %v1681_v11, 0.0  ;;  %v2001_v39 = vmul.f32 0.01, %v1681_v11 }
 0x273   :  { %2085 = vst [vmem:[%s5118_s5 + $0x40] sm:$0xff] %v2069_v28  ;;  %v1625_v17 = vpop.f32.mrf.mxu0 }
 0x274   :  { %v1626_v30 = vadd.f32 %v1625_v17, %v4856_v50  ;;  %v2033_v56 = vsel %vm1969_vm4, %v1681_v11, %v2001_v39  ;;  %1914 = vmatmul.bf16.gmra.mxu2 %v4731_v21 }
 0x276   :  { %v1656_v40 = vpop.f32.mrf.mxu1  ;;  %2525 = vmatmul.msk.bf16.gmra.mxu0 %vm1588_vm14, %v4748_v47  ;;  %2529 = vmatmul.msk.bf16.gmra.mxu3 %vm1588_vm14, %v4748_v47  ;;  %v1655_v49 = vadd.f32 %v1654_v7, %v1626_v30 }
 0x277   :  { %v1683_v10 = vpop.f32.mrf.mxu2 }
 0x278   :  { %v1684_v44 = vadd.f32 %v1683_v10, %v1655_v49 }
 0x279   :  { %v4867_v8 = vpop.f32.mrf.mxu3 }
 0x27a   :  { %v2055_v41 = vld [vmem:[%s5113_s0 + $0x50] sm:$0xff]  ;;  %vm1973_vm14 = vcmp.ge.f32.partialorder %v1684_v44, 0.0  ;;  %v2005_v47 = vmul.f32 0.01, %v1684_v44 }
 0x27b   :  { %v2071_v32 = vadd.f32 %v2055_v41, %v2033_v56  ;;  %v1627_v38 = vpop.f32.mrf.mxu0 }
 0x27c   :  { %v1628_v57 = vadd.f32 %v1627_v38, %v4872_v60  ;;  %v2037_v53 = vsel %vm1973_vm14, %v1684_v44, %v2005_v47 }
 0x27d   :  { %2087 = vst [vmem:[%s5118_s5 + $0x50] sm:$0xff] %v2071_v32 }
 0x27e   :  { %v1755_v59 = vpop.f32.mrf.mxu1  ;;  %v1657_v36 = vadd.f32 %v1656_v40, %v1628_v57 }
 0x27f   :  { %v1685_v46 = vpop.f32.mrf.mxu2 }
 0x280   :  { %v1686_v15 = vadd.f32 %v1685_v46, %v1657_v36 }
 0x281   :  { %v4878_v20 = vpop.f32.mrf.mxu3 }
 0x282   :  { %vm1977_vm11 = vcmp.ge.f32.partialorder %v1686_v15, 0.0  ;;  %v2009_v34 = vmul.f32 0.01, %v1686_v15 }
 0x283   :  { %v1726_v29 = vpop.f32.mrf.mxu0 }
 0x284   :  { %v2057_v21 = vld [vmem:[%s5113_s0 + $0x60] sm:$0xff]  ;;  %v1727_v9 = vadd.f32 %v1726_v29, %v1698_v16  ;;  %v2041_v12 = vsel %vm1977_vm11, %v1686_v15, %v2009_v34  ;;  %v1710_v34 = vadd.f32 %v4851_v1, %v4844_v61  ;;  %v1713_v1 = vadd.f32 %v4867_v8, %v4856_v50 }
 0x285   :  { %v2073_v13 = vadd.f32 %v2057_v21, %v2037_v53  ;;  %v1715_v8 = vadd.f32 %v4878_v20, %v4872_v60 }
 0x286   :  { %v1757_v43 = vpop.f32.mrf.mxu1  ;;  %v1756_v27 = vadd.f32 %v1755_v59, %v1727_v9 }
 0x287   :  { %2089 = vst [vmem:[%s5118_s5 + $0x60] sm:$0xff] %v2073_v13  ;;  %v4898_v24 = vpop.f32.mrf.mxu2 }
 0x288   :  { %vm1950_vm12 = vcmp.ge.f32.partialorder %v1756_v27, 0.0  ;;  %v1982_v51 = vmul.f32 0.01, %v1756_v27 }
 0x289   :  { %v4891_v23 = vpop.f32.mrf.mxu3 }
 0x28a   :  { %v2014_v0 = vsel %vm1950_vm12, %v1756_v27, %v1982_v51 }
 0x28b   :  { %v1728_v14 = vpop.f32.mrf.mxu0 }
 0x28c   :  { %v1729_v54 = vadd.f32 %v1728_v14, %v1700_v37 }
 0x28e   :  { %v2059_v42 = vld [vmem:[%s5113_s0 + $0x70] sm:$0xff]  ;;  %v2046_v2 = vld [vmem:[%s5113_s0 + $0x8] sm:$0xff]  ;;  %v1760_v18 = vpop.f32.mrf.mxu1  ;;  %v1758_v6 = vadd.f32 %v1757_v43, %v1729_v54 }
 0x28f   :  { %v2075_v52 = vadd.f32 %v2059_v42, %v2041_v12  ;;  %v2062_v63 = vadd.f32 %v2046_v2, %v2014_v0  ;;  %v4910_v62 = vpop.f32.mrf.mxu2 }
 0x290   :  { %vm1954_vm2 = vcmp.ge.f32.partialorder %v1758_v6, 0.0  ;;  %v1986_v19 = vmul.f32 0.01, %v1758_v6 }
 0x291   :  { %2091 = vst [vmem:[%s5118_s5 + $0x70] sm:$0xff] %v2075_v52  ;;  %v4906_v25 = vpop.f32.mrf.mxu3 }
 0x292   :  { %2078 = vst [vmem:[%s5118_s5 + $0x8] sm:$0xff] %v2062_v63  ;;  %v2018_v7 = vsel %vm1954_vm2, %v1758_v6, %v1986_v19 }
 0x293   :  { %v1731_v28 = vpop.f32.mrf.mxu0 }
 0x294   :  { %v1732_v45 = vadd.f32 %v1731_v28, %v1703_v22 }
 0x296   :  { %v1762_v17 = vpop.f32.mrf.mxu1  ;;  %v1761_v11 = vadd.f32 %v1760_v18, %v1732_v45 }
 0x297   :  { %v4922_v49 = vpop.f32.mrf.mxu2 }
 0x298   :  { %vm1958_vm13 = vcmp.ge.f32.partialorder %v1761_v11, 0.0  ;;  %v1990_v40 = vmul.f32 0.01, %v1761_v11 }
 0x299   :  { %v2048_v3 = vld [vmem:[%s5113_s0 + $0x18] sm:$0xff]  ;;  %v4918_v39 = vpop.f32.mrf.mxu3 }
 0x29a   :  { %v2064_v48 = vadd.f32 %v2048_v3, %v2018_v7  ;;  %v2022_v30 = vsel %vm1958_vm13, %v1761_v11, %v1990_v40 }
 0x29b   :  { %v1733_v32 = vpop.f32.mrf.mxu0 }
 0x29c   :  { %2080 = vst [vmem:[%s5118_s5 + $0x18] sm:$0xff] %v2064_v48  ;;  %v1734_v38 = vadd.f32 %v1733_v32, %v1705_v4 }
 0x29e   :  { %v1765_v10 = vpop.f32.mrf.mxu1  ;;  %v1763_v44 = vadd.f32 %v1762_v17, %v1734_v38 }
 0x29f   :  { %v4934_v16 = vpop.f32.mrf.mxu2 }
 0x2a0   :  { %vm1962_vm6 = vcmp.ge.f32.partialorder %v1763_v44, 0.0  ;;  %v1994_v59 = vmul.f32 0.01, %v1763_v44 }
 0x2a1   :  { %v4930_v47 = vpop.f32.mrf.mxu3 }
 0x2a2   :  { %v2026_v21 = vsel %vm1962_vm6, %v1763_v44, %v1994_v59 }
 0x2a3   :  { %v2050_v41 = vld [vmem:[%s5113_s0 + $0x28] sm:$0xff]  ;;  %v1736_v13 = vpop.f32.mrf.mxu0 }
 0x2a4   :  { %v2066_v56 = vadd.f32 %v2050_v41, %v2022_v30  ;;  %v1737_v36 = vadd.f32 %v1736_v13, %v1708_v31  ;;  %v1785_v30 = vadd.f32 %v4898_v24, %v4778_v33 }
 0x2a6   :  { %2082 = vst [vmem:[%s5118_s5 + $0x28] sm:$0xff] %v2066_v56  ;;  %v1767_v46 = vpop.f32.mrf.mxu1  ;;  %v1766_v29 = vadd.f32 %v1765_v10, %v1737_v36  ;;  %v1814_v10 = vadd.f32 %v4891_v23, %v1785_v30 }
 0x2a7   :  { %v4946_v12 = vpop.f32.mrf.mxu2 }
 0x2a8   :  { %vm1966_vm1 = vcmp.ge.f32.partialorder %v1766_v29, 0.0  ;;  %v1998_v15 = vmul.f32 0.01, %v1766_v29 }
 0x2a9   :  { %v4942_v43 = vpop.f32.mrf.mxu3 }
 0x2aa   :  { %v2030_v26 = vsel %vm1966_vm1, %v1766_v29, %v1998_v15 }
 0x2ab   :  { %v1738_v27 = vpop.f32.mrf.mxu0 }
 0x2ac   :  { %v1739_v51 = vadd.f32 %v1738_v27, %v1710_v34 }
 0x2ad   :  { %v2052_v57 = vld [vmem:[%s5113_s0 + $0x38] sm:$0xff] }
 0x2ae   :  { %v2068_v53 = vadd.f32 %v2052_v57, %v2026_v21  ;;  %v1770_v2 = vpop.f32.mrf.mxu1  ;;  %v1768_v52 = vadd.f32 %v1767_v46, %v1739_v51  ;;  %v1790_v51 = vadd.f32 %v4922_v49, %v4800_v58 }
 0x2af   :  { %v4958_v6 = vpop.f32.mrf.mxu2 }
 0x2b0   :  { %2084 = vst [vmem:[%s5118_s5 + $0x38] sm:$0xff] %v2068_v53  ;;  %vm1970_vm15 = vcmp.ge.f32.partialorder %v1768_v52, 0.0  ;;  %v2002_v37 = vmul.f32 0.01, %v1768_v52  ;;  %v1787_v53 = vadd.f32 %v4910_v62, %v4788_v35 }
 0x2b1   :  { %v4954_v63 = vpop.f32.mrf.mxu3 }
 0x2b2   :  { %v2034_v14 = vsel %vm1970_vm15, %v1768_v52, %v2002_v37  ;;  %v1816_v15 = vadd.f32 %v4906_v25, %v1787_v53 }
 0x2b3   :  { %v1741_v18 = vpop.f32.mrf.mxu0 }
 0x2b4   :  { %v1742_v19 = vadd.f32 %v1741_v18, %v1713_v1 }
 0x2b6   :  { %v1772_v3 = vpop.f32.mrf.mxu1  ;;  %v1771_v7 = vadd.f32 %v1770_v2, %v1742_v19 }
 0x2b7   :  { %v2054_v9 = vld [vmem:[%s5113_s0 + $0x48] sm:$0xff]  ;;  %v4970_v40 = vpop.f32.mrf.mxu2 }
 0x2b8   :  { %v2070_v42 = vadd.f32 %v2054_v9, %v2030_v26  ;;  %vm1974_vm7 = vcmp.ge.f32.partialorder %v1771_v7, 0.0  ;;  %v2006_v22 = vmul.f32 0.01, %v1771_v7 }
 0x2b9   :  { %v4966_v28 = vpop.f32.mrf.mxu3 }
 0x2ba   :  { %2086 = vst [vmem:[%s5118_s5 + $0x48] sm:$0xff] %v2070_v42  ;;  %v2038_v45 = vsel %vm1974_vm7, %v1771_v7, %v2006_v22 }
 0x2bb   :  { %v1743_v11 = vpop.f32.mrf.mxu0 }
 0x2bc   :  { %v1744_v41 = vadd.f32 %v1743_v11, %v1715_v8  ;;  %v1792_v8 = vadd.f32 %v4934_v16, %v4816_v55 }
 0x2be   :  { %v1871_v4 = vpop.f32.mrf.mxu1  ;;  %v1773_v56 = vadd.f32 %v1772_v3, %v1744_v41  ;;  %v1821_v16 = vadd.f32 %v4930_v47, %v1792_v8 }
 0x2bf   :  { %v4983_v57 = vpop.f32.mrf.mxu2  ;;  %v1872_v9 = vadd.f32 %v1871_v4, %v4778_v33 }
 0x2c0   :  { %vm1978_vm0 = vcmp.ge.f32.partialorder %v1773_v56, 0.0  ;;  %v2010_v32 = vmul.f32 0.01, %v1773_v56 }
 0x2c1   :  { %v2056_v0 = vld [vmem:[%s5113_s0 + $0x58] sm:$0xff]  ;;  %v4980_v38 = vpop.f32.mrf.mxu3 }
 0x2c2   :  { %v2072_v54 = vadd.f32 %v2056_v0, %v2034_v14  ;;  %v2042_v44 = vsel %vm1978_vm0, %v1773_v56, %v2010_v32 }
 0x2c3   :  { %v1842_v31 = vpop.f32.mrf.mxu0 }
 0x2c4   :  { %2088 = vst [vmem:[%s5118_s5 + $0x58] sm:$0xff] %v2072_v54  ;;  %v1843_v21 = vadd.f32 %v1842_v31, %v1814_v10  ;;  %v1819_v54 = vadd.f32 %v4918_v39, %v1790_v51 }
 0x2c6   :  { %v1873_v24 = vpop.f32.mrf.mxu1  ;;  %vm1951_vm5 = vcmp.ge.f32.partialorder %v1843_v21, 0.0  ;;  %v1983_v13 = vmul.f32 0.01, %v1843_v21 }
 0x2c7   :  { %v1900_v34 = vpop.f32.mrf.mxu2  ;;  %v1874_v49 = vadd.f32 %v1873_v24, %v4788_v35 }
 0x2c8   :  { %v2015_v36 = vsel %vm1951_vm5, %v1843_v21, %v1983_v13  ;;  %v1901_v42 = vadd.f32 %v1900_v34, %v1872_v9  ;;  %v1795_v21 = vadd.f32 %v4946_v12, %v4828_v5 }
 0x2c9   :  { %v1929_v29 = vpop.f32.mrf.mxu3 }
 0x2ca   :  { %v1930_v52 = vadd.f32 %v1929_v29, %v1901_v42  ;;  %v1824_v9 = vadd.f32 %v4942_v43, %v1795_v21 }
 0x2cb   :  { %v2058_v48 = vld [vmem:[%s5113_s0 + $0x68] sm:$0xff]  ;;  %v1844_v26 = vpop.f32.mrf.mxu0 }
 0x2cc   :  { %v2074_v17 = vadd.f32 %v2058_v48, %v2038_v45  ;;  %v1845_v62 = vadd.f32 %v1844_v26, %v1816_v15  ;;  %vm1952_vm8 = vcmp.ge.f32.partialorder %v1930_v52, 0.0  ;;  %v1984_v37 = vmul.f32 0.01, %v1930_v52 }
 0x2ce   :  { %2090 = vst [vmem:[%s5118_s5 + $0x68] sm:$0xff] %v2074_v17  ;;  %v1876_v27 = vpop.f32.mrf.mxu1  ;;  %vm1955_vm9 = vcmp.ge.f32.partialorder %v1845_v62, 0.0  ;;  %v1987_v2 = vmul.f32 0.01, %v1845_v62  ;;  %v2016_v18 = vsel %vm1952_vm8, %v1930_v52, %v1984_v37 }
 0x2cf   :  { %v1902_v7 = vpop.f32.mrf.mxu2  ;;  %v1877_v11 = vadd.f32 %v1876_v27, %v4800_v58 }
 0x2d0   :  { %v2019_v33 = vsel %vm1955_vm9, %v1845_v62, %v1987_v2  ;;  %v1903_v48 = vadd.f32 %v1902_v7, %v1874_v49  ;;  %v1797_v2 = vadd.f32 %v4958_v6, %v4844_v61 }
 0x2d1   :  { %v1931_v14 = vpop.f32.mrf.mxu3 }
 0x2d2   :  { %v1932_v45 = vadd.f32 %v1931_v14, %v1903_v48  ;;  %v1826_v14 = vadd.f32 %v4954_v63, %v1797_v2  ;;  %v1800_v63 = vadd.f32 %v4970_v40, %v4856_v50 }
 0x2d3   :  { %v1847_v3 = vpop.f32.mrf.mxu0 }
 0x2d4   :  { %v1848_v22 = vadd.f32 %v1847_v3, %v1819_v54  ;;  %vm1956_vm10 = vcmp.ge.f32.partialorder %v1932_v45, 0.0  ;;  %v1988_v4 = vmul.f32 0.01, %v1932_v45 }
 0x2d5   :  { %v2060_v20 = vld [vmem:[%s5113_s0 + $0x78] sm:$0xff] }
 0x2d6   :  { %v2076_v59 = vadd.f32 %v2060_v20, %v2042_v44  ;;  %vm1959_vm3 = vcmp.ge.f32.partialorder %v1848_v22, 0.0  ;;  %v1991_v39 = vmul.f32 0.01, %v1848_v22  ;;  %v1878_v17 = vpop.f32.mrf.mxu1  ;;  %v2020_v20 = vsel %vm1956_vm10, %v1932_v45, %v1988_v4 }
 0x2d7   :  { %v1879_v12 = vadd.f32 %v1878_v17, %v4816_v55 }
 0x2d8   :  { %2092 = vst [vmem:[%s5118_s5 + $0x78] sm:$0xff] %v2076_v59  ;;  %v2023_v41 = vsel %vm1959_vm3, %v1848_v22, %v1991_v39  ;;  %v1905_v59 = vpop.f32.mrf.mxu2 }
 0x2d9   :  { %v1934_v32 = vpop.f32.mrf.mxu3  ;;  %v1906_v31 = vadd.f32 %v1905_v59, %v1877_v11 }
 0x2db   :  { %v1849_v44 = vpop.f32.mrf.mxu0  ;;  %v1935_v53 = vadd.f32 %v1934_v32, %v1906_v31 }
 0x2dc   :  { %v1850_v58 = vadd.f32 %v1849_v44, %v1821_v16 }
 0x2dd   :  { %vm1960_vm14 = vcmp.ge.f32.partialorder %v1935_v53, 0.0 }
 0x2de   :  { %vm1963_vm4 = vcmp.ge.f32.partialorder %v1850_v58, 0.0  ;;  %v1995_v24 = vmul.f32 0.01, %v1850_v58 }
 0x2df   :  { %v2530_v23 = vld [vmem:[%s5113_s0 + $0x80] sm:$0xff] }
 0x2e0   :  { %v2109_v46 = vadd.f32 %v2530_v23, %v2015_v36  ;;  %v2027_v13 = vsel %vm1963_vm4, %v1850_v58, %v1995_v24  ;;  %v1992_v23 = vmul.f32 0.01, %v1935_v53  ;;  %v1907_v42 = vpop.f32.mrf.mxu2 }
 0x2e1   :  { %v1936_v15 = vpop.f32.mrf.mxu3  ;;  %v1908_v51 = vadd.f32 %v1907_v42, %v1879_v12 }
 0x2e2   :  { %2546 = vst [vmem:[%s5118_s5 + $0x80] sm:$0xff] %v2109_v46  ;;  %v1881_v46 = vpop.f32.mrf.mxu1  ;;  %v2024_v26 = vsel %vm1960_vm14, %v1935_v53, %v1992_v23 }
 0x2e3   :  { %v1852_v62 = vpop.f32.mrf.mxu0  ;;  %v1882_v6 = vadd.f32 %v1881_v46, %v4828_v5 }
 0x2e4   :  { %v1853_v27 = vadd.f32 %v1852_v62, %v1824_v9 }
 0x2e6   :  { %vm1967_vm11 = vcmp.ge.f32.partialorder %v1853_v27, 0.0  ;;  %v1999_v43 = vmul.f32 0.01, %v1853_v27 }
 0x2e8   :  { %v2031_v52 = vsel %vm1967_vm11, %v1853_v27, %v1999_v43  ;;  %v1910_v3 = vpop.f32.mrf.mxu2 }
 0x2e9   :  { %v2532_v25 = vld [vmem:[%s5113_s0 + $0x90] sm:$0xff]  ;;  %v2531_v0 = vld [vmem:[%s5113_s0 + $0x88] sm:$0xff]  ;;  %v1911_v22 = vadd.f32 %v1910_v3, %v1882_v6 }
 0x2ea   :  { %v2111_v1 = vadd.f32 %v2532_v25, %v2019_v33  ;;  %v2110_v19 = vadd.f32 %v2531_v0, %v2016_v18  ;;  %v1937_v25 = vadd.f32 %v1936_v15, %v1908_v51  ;;  %v1883_v49 = vpop.f32.mrf.mxu1 }
 0x2eb   :  { %v1884_v40 = vadd.f32 %v1883_v49, %v4844_v61 }
 0x2ec   :  { %2548 = vst [vmem:[%s5118_s5 + $0x90] sm:$0xff] %v2111_v1  ;;  %vm1964_vm12 = vcmp.ge.f32.partialorder %v1937_v25, 0.0  ;;  %v1996_v33 = vmul.f32 0.01, %v1937_v25  ;;  %v1939_v1 = vpop.f32.mrf.mxu3 }
 0x2ed   :  { %2547 = vst [vmem:[%s5118_s5 + $0x88] sm:$0xff] %v2110_v19  ;;  %v1854_v19 = vpop.f32.mrf.mxu0  ;;  %v1940_v8 = vadd.f32 %v1939_v1, %v1911_v22 }
 0x2ee   :  { %v2028_v54 = vsel %vm1964_vm12, %v1937_v25, %v1996_v33  ;;  %v1855_v7 = vadd.f32 %v1854_v19, %v1826_v14 }
 0x2ef   :  { %vm1968_vm13 = vcmp.ge.f32.partialorder %v1940_v8, 0.0 }
 0x2f0   :  { %vm1971_vm2 = vcmp.ge.f32.partialorder %v1855_v7, 0.0  ;;  %v2003_v5 = vmul.f32 0.01, %v1855_v7  ;;  %v1912_v32 = vpop.f32.mrf.mxu2 }
 0x2f2   :  { %v2035_v39 = vsel %vm1971_vm2, %v1855_v7, %v2003_v5 }
 0x2f4   :  { %v2534_v35 = vld [vmem:[%s5113_s0 + $0xa0] sm:$0xff]  ;;  %v2533_v30 = vld [vmem:[%s5113_s0 + $0x98] sm:$0xff]  ;;  %v1941_v11 = vpop.f32.mrf.mxu3 }
 0x2f5   :  { %v2113_v56 = vadd.f32 %v2534_v35, %v2023_v41  ;;  %v2112_v10 = vadd.f32 %v2533_v30, %v2020_v20  ;;  %v2000_v35 = vmul.f32 0.01, %v1940_v8  ;;  %v1829_v41 = vadd.f32 %v4966_v28, %v1800_v63 }
 0x2f6   :  { %v1913_v20 = vadd.f32 %v1912_v32, %v1884_v40  ;;  %v1802_v28 = vadd.f32 %v4983_v57, %v4872_v60 }
 0x2f7   :  { %2550 = vst [vmem:[%s5118_s5 + $0xa0] sm:$0xff] %v2113_v56  ;;  %v2032_v4 = vsel %vm1968_vm13, %v1940_v8, %v2000_v35  ;;  %v1857_v56 = vpop.f32.mrf.mxu0 }
 0x2f8   :  { %2549 = vst [vmem:[%s5118_s5 + $0x98] sm:$0xff] %v2112_v10  ;;  %v1858_v16 = vadd.f32 %v1857_v56, %v1829_v41  ;;  %v1886_v10 = vpop.f32.mrf.mxu1  ;;  %v1942_v59 = vadd.f32 %v1941_v11, %v1913_v20  ;;  %v1915_v46 = vpop.f32.mrf.mxu2 }
 0x2f9   :  { %v1887_v53 = vadd.f32 %v1886_v10, %v4856_v50 }
 0x2fa   :  { %vm1975_vm6 = vcmp.ge.f32.partialorder %v1858_v16, 0.0  ;;  %v2007_v61 = vmul.f32 0.01, %v1858_v16  ;;  %vm1972_vm1 = vcmp.ge.f32.partialorder %v1942_v59, 0.0  ;;  %v2004_v31 = vmul.f32 0.01, %v1942_v59 }
 0x2fb   :  { %v1916_v15 = vadd.f32 %v1915_v46, %v1887_v53 }
 0x2fc   :  { %v2039_v58 = vsel %vm1975_vm6, %v1858_v16, %v2007_v61  ;;  %v2036_v57 = vsel %vm1972_vm1, %v1942_v59, %v2004_v31 }
 0x2ff   :  { %v2536_v47 = vld [vmem:[%s5113_s0 + $0xb0] sm:$0xff]  ;;  %v2535_v36 = vld [vmem:[%s5113_s0 + $0xa8] sm:$0xff] }
 0x300   :  { %v2115_v29 = vadd.f32 %v2536_v47, %v2027_v13  ;;  %v2114_v34 = vadd.f32 %v2535_v36, %v2024_v26  ;;  %v1831_v47 = vadd.f32 %v4980_v38, %v1802_v28  ;;  %v1944_v13 = vpop.f32.mrf.mxu3  ;;  %v1859_v36 = vpop.f32.mrf.mxu0 }
 0x301   :  { %v1945_v38 = vadd.f32 %v1944_v13, %v1916_v15  ;;  %v1888_v12 = vpop.f32.mrf.mxu1  ;;  %v1917_v43 = vpop.f32.mrf.mxu2 }
 0x302   :  { %2552 = vst [vmem:[%s5118_s5 + $0xb0] sm:$0xff] %v2115_v29  ;;  %v1860_v29 = vadd.f32 %v1859_v36, %v1831_v47  ;;  %v1889_v27 = vadd.f32 %v1888_v12, %v4872_v60 }
 0x303   :  { %2551 = vst [vmem:[%s5118_s5 + $0xa8] sm:$0xff] %v2114_v34  ;;  %vm1976_vm7 = vcmp.ge.f32.partialorder %v1945_v38, 0.0  ;;  %v2008_v34 = vmul.f32 0.01, %v1945_v38 }
 0x304   :  { %vm1979_vm15 = vcmp.ge.f32.partialorder %v1860_v29, 0.0  ;;  %v2011_v9 = vmul.f32 0.01, %v1860_v29 }
 0x305   :  { %v2040_v51 = vsel %vm1976_vm7, %v1945_v38, %v2008_v34 }
 0x306   :  { %v2043_v26 = vsel %vm1979_vm15, %v1860_v29, %v2011_v9 }
 0x308   :  { %v1946_v25 = vpop.f32.mrf.mxu3 }
 0x30a   :  { %v2538_v55 = vld [vmem:[%s5113_s0 + $0xc0] sm:$0xff]  ;;  %v2537_v37 = vld [vmem:[%s5113_s0 + $0xb8] sm:$0xff] }
 0x30b   :  { %v2117_v0 = vadd.f32 %v2538_v55, %v2031_v52  ;;  %v2116_v18 = vadd.f32 %v2537_v37, %v2028_v54  ;;  %v1918_v55 = vadd.f32 %v1917_v43, %v1889_v27 }
 0x30d   :  { %2554 = vst [vmem:[%s5118_s5 + $0xc0] sm:$0xff] %v2117_v0  ;;  %v1947_v52 = vadd.f32 %v1946_v25, %v1918_v55 }
 0x30e   :  { %2553 = vst [vmem:[%s5118_s5 + $0xb8] sm:$0xff] %v2116_v18 }
 0x30f   :  { %vm1980_vm0 = vcmp.ge.f32.partialorder %v1947_v52, 0.0  ;;  %v2012_v33 = vmul.f32 0.01, %v1947_v52 }
 0x311   :  { %v2044_v37 = vsel %vm1980_vm0, %v1947_v52, %v2012_v33 }
 0x315   :  { %v2540_v48 = vld [vmem:[%s5113_s0 + $0xd0] sm:$0xff]  ;;  %v2539_v45 = vld [vmem:[%s5113_s0 + $0xc8] sm:$0xff] }
 0x316   :  { %v2119_v17 = vadd.f32 %v2540_v48, %v2035_v39  ;;  %v2118_v30 = vadd.f32 %v2539_v45, %v2032_v4 }
 0x318   :  { %2556 = vst [vmem:[%s5118_s5 + $0xd0] sm:$0xff] %v2119_v17 }
 0x319   :  { %2555 = vst [vmem:[%s5118_s5 + $0xc8] sm:$0xff] %v2118_v30 }
 0x320   :  { %v2542_v44 = vld [vmem:[%s5113_s0 + $0xe0] sm:$0xff]  ;;  %v2541_v21 = vld [vmem:[%s5113_s0 + $0xd8] sm:$0xff] }
 0x321   :  { %v2121_v24 = vadd.f32 %v2542_v44, %v2039_v58  ;;  %v2120_v23 = vadd.f32 %v2541_v21, %v2036_v57 }
 0x323   :  { %2558 = vst [vmem:[%s5118_s5 + $0xe0] sm:$0xff] %v2121_v24 }
 0x324   :  { %2557 = vst [vmem:[%s5118_s5 + $0xd8] sm:$0xff] %v2120_v23 }
 0x32b   :  { %v2544_v50 = vld [vmem:[%s5113_s0 + $0xf0] sm:$0xff]  ;;  %v2543_v62 = vld [vmem:[%s5113_s0 + $0xe8] sm:$0xff] }
 0x32c   :  { %v2123_v42 = vadd.f32 %v2544_v50, %v2043_v26  ;;  %v2122_v2 = vadd.f32 %v2543_v62, %v2040_v51 }
 0x32e   :  { %2560 = vst [vmem:[%s5118_s5 + $0xf0] sm:$0xff] %v2123_v42 }
 0x32f   :  { %2559 = vst [vmem:[%s5118_s5 + $0xe8] sm:$0xff] %v2122_v2 }
 0x336   :  { %v2545_v60 = vld [vmem:[%s5113_s0 + $0xf8] sm:$0xff] }
 0x337   :  { %v2124_v0 = vadd.f32 %v2545_v60, %v2044_v37 }
 0x339   :  { %2561 = vst [vmem:[%s5118_s5 + $0xf8] sm:$0xff] %v2124_v0 }

</bundles_post_ra>
